<compile_context>
chip_gen: v6e
topology: v6e:2x2x1
jax: 0.10.0
libtpu: 0.0.40
codegen_flags: <defaults>
</compile_context>

<pallas_src>
import functools

import jax
import jax.numpy as jnp
from jax.experimental import pallas as pl
from jax.experimental.pallas import tpu as pltpu

# ----------------------------- hyper parameters ------------------------------
IMG = 16          # input spatial size
IN_CHANS = 3
PATCH = 4         # patch_size == patch_stride, patch_padding = 0 (non-overlapping)
EMBED = 32        # embed_dim
DEPTH = 2
HEADS = 4
MLP_RATIO = 4.0
LN_EPS = 1e-5
BN_EPS = 1e-5
BLOCK_B = 8       # images folded into one grid step (batch blocking)


# ------------------------------ in-kernel helpers ----------------------------
def _layer_norm(x, gamma, beta, eps=LN_EPS):
    mu = jnp.mean(x, axis=-1, keepdims=True)
    xc = x - mu
    var = jnp.mean(xc * xc, axis=-1, keepdims=True)
    return xc * jax.lax.rsqrt(var + eps) * gamma + beta


def _gelu(x):
    # TODO(synk): torch.nn.GELU default is the exact erf form; erf has no guaranteed
    # Mosaic lowering, so the (very close) tanh approximation is used here.
    c = 0.7978845608028654  # sqrt(2/pi)
    return 0.5 * x * (1.0 + jnp.tanh(c * (x + 0.044715 * x * x * x)))


# ------------------------------ fused forward kernel -------------------------
def vit_kernel(p_ref, mask_ref, pew_ref, pem_ref, dwbn_ref, wqkv_ref, wproj_ref,
               wfc1_ref, wfc2_ref, vc_ref, bfc1_ref, sp_ref, cls_ref,
               *, H, W, num_heads, depth, bb):
    f32, bf16 = jnp.float32, jnp.bfloat16
    HW = H * W
    S = bb * HW                       # spatial tokens in this batch block
    C = sp_ref.shape[2]
    hd = C // num_heads

    # ---- ConvEmbed (non-overlapping patch conv as one matmul) + LayerNorm + cls ----
    y = jnp.dot(p_ref[0].astype(bf16), pew_ref[...],
                preferred_element_type=f32) + pem_ref[0:1, :]
    y = _layer_norm(y, pem_ref[1:2, :], pem_ref[2:3, :])
    cls0 = jnp.broadcast_to(pem_ref[3:4, :], (bb, C))
    # token layout: [all spatial rows, image-major] then [bb cls rows]; the spatial
    # slab starts at row 0 and has bb*HW (multiple of 8) rows, so slices stay aligned.
    x = jnp.concatenate([y, cls0], axis=0)                          # (S + bb, C)

    # DEPTH=2 -> static unroll.
    # TODO(synk): switch to lax.fori_loop + pl.ds indexing into the weight slabs if
    # depth is ever increased (static unrolling does not bound live ranges).
    for l in range(depth):
        # ---- norm1 ----
        xn = _layer_norm(x, vc_ref[l, 0:1, :], vc_ref[l, 1:2, :])
        xs = xn[0:S, :]                                             # spatial tokens
        xc = xn[S:, :]                                              # cls tokens (bb, C)

        # ---- q/k/v depthwise 3x3 conv (groups=C, bias=False) + folded eval BN ----
        # q|k|v lane-packed to 3C lanes; each tap is an in-register circular roll
        # along the row (sublane) axis; host-built masks zero rows whose neighbour
        # would wrap across an image or spatial border.
        xsp3 = jnp.concatenate([xs, xs, xs], axis=1)                # (S, 3C)
        acc = xsp3 * dwbn_ref[l, 4:5, :]                            # centre tap, mask == 1
        for di in range(3):
            for dj in range(3):
                if di == 1 and dj == 1:
                    continue
                t9 = di * 3 + dj
                off = (di - 1) * W + (dj - 1)                       # flat source offset
                rolled = pltpu.roll(xsp3, (-off) % S, axis=0)       # rolled[t] == xsp3[t+off] where mask==1
                acc = acc + rolled * mask_ref[:, t9:t9 + 1] * dwbn_ref[l, t9:t9 + 1, :]
        acc = acc * dwbn_ref[l, 9:10, :] + dwbn_ref[l, 10:11, :]    # folded eval-mode BN

        cls3 = jnp.concatenate([xc, xc, xc], axis=1)                # conv is identity on cls
        qkv_in = jnp.concatenate([acc, cls3], axis=0)               # (S + bb, 3C)

        # ---- fused q/k/v linear projections (block-diag weight, scale folded in Wq) ----
        qkv = jnp.dot(qkv_in.astype(bf16), wqkv_ref[l],
                      preferred_element_type=f32)                   # (S + bb, 3C)

        # ---- multi-head attention, batched over the bb images of this block ----
        def to_bt(z):   # (S + bb, C) -> (bb, T, C) with the cls token first (torch order)
            zc = z[S:, :].reshape(bb, 1, C)
            zs = z[0:S, :].reshape(bb, HW, C)
            return jnp.concatenate([zc, zs], axis=1)

        q3 = to_bt(qkv[:, 0:C])
        k3 = to_bt(qkv[:, C:2 * C])
        v3 = to_bt(qkv[:, 2 * C:3 * C])

        head_outs = []
        for h in range(num_heads):          # per-head: no score mask, no wasted exp
            qh = q3[:, :, h * hd:(h + 1) * hd].astype(bf16)
            kh = k3[:, :, h * hd:(h + 1) * hd].astype(bf16)
            vh = v3[:, :, h * hd:(h + 1) * hd].astype(bf16)
            sc = jnp.einsum('bqd,bkd->bqk', qh, kh,
                            preferred_element_type=f32)             # (bb, T, T), f32 stats
            mx = jnp.max(sc, axis=-1, keepdims=True)
            e = jnp.exp(sc - mx)
            p = e / jnp.sum(e, axis=-1, keepdims=True)              # exact softmax (f32)
            head_outs.append(jnp.einsum('bqk,bkd->bqd', p.astype(bf16), vh,
                                        preferred_element_type=f32))  # (bb, T, hd)
        attn3 = jnp.concatenate(head_outs, axis=2)                  # (bb, T, C)

        # back to the token-major layout used by the residual stream
        attn = jnp.concatenate([attn3[:, 1:, :].reshape(S, C),
                                attn3[:, 0:1, :].reshape(bb, C)], axis=0)

        # ---- output projection + residual ----
        attn = jnp.dot(attn.astype(bf16), wproj_ref[l],
                       preferred_element_type=f32) + vc_ref[l, 4:5, :]
        x1 = x + attn

        # ---- norm2 + MLP + residual ----
        xn2 = _layer_norm(x1, vc_ref[l, 2:3, :], vc_ref[l, 3:4, :])
        h1 = jnp.dot(xn2.astype(bf16), wfc1_ref[l],
                     preferred_element_type=f32) + bfc1_ref[l]
        h1 = _gelu(h1)
        h2 = jnp.dot(h1.astype(bf16), wfc2_ref[l],
                     preferred_element_type=f32) + vc_ref[l, 5:6, :]
        x = x1 + h2

    # Lane width is C=32 (<128) -> masked stores; acceptable at this output size.
    sp_ref[0] = x[0:S, :].astype(sp_ref.dtype)
    cls_ref[0] = x[S:, :].astype(cls_ref.dtype)


# ------------------------------ host-side constants --------------------------
def _conv_tap_masks(H, W, bb):
    """(bb*HW, 9) f32 validity mask per 3x3 tap (hoisted out of the kernel)."""
    t = jnp.arange(H * W)
    hh = t // W
    ww = t % W
    cols = []
    for di in range(3):
        for dj in range(3):
            valid = ((hh + di - 1 >= 0) & (hh + di - 1 <= H - 1) &
                     (ww + dj - 1 >= 0) & (ww + dj - 1 <= W - 1))
            cols.append(valid.astype(jnp.float32))
    m = jnp.stack(cols, axis=1)                                     # (HW, 9)
    return jnp.tile(m, (bb, 1))                                     # (bb*HW, 9)


# ------------------------------ parameter init (deterministic) ---------------
def init_params(key):
    K = PATCH * PATCH * IN_CHANS
    C = EMBED
    C3 = 3 * C
    HD = int(EMBED * MLP_RATIO)
    scale = float(C) ** -0.5          # dim_out ** -0.5 (CvT uses dim_out, NOT head_dim)

    def nrm(k, shape, s=0.05):
        return (s * jax.random.normal(k, shape)).astype(jnp.float32)

    keys = jax.random.split(key, 8 + DEPTH)

    # patch-embed: weight rows in (kh, kw, cin) order to match the host im2col.
    pe_w = nrm(keys[0], (K, C))
    pe_b = nrm(keys[1], (1, C))
    pe_ln_g = 1.0 + nrm(keys[2], (1, C))
    pe_ln_b = nrm(keys[3], (1, C))
    cls = (0.02 * jax.random.normal(keys[4], (1, C))).astype(jnp.float32)
    pe_misc = jnp.concatenate([pe_b, pe_ln_g, pe_ln_b, cls], axis=0)       # (4, C)

    dwbn, wqkv, wproj, wfc1, wfc2, vecs_c, bfc1 = [], [], [], [], [], [], []
    for j in range(DEPTH):
        bk = jax.random.split(keys[8 + j], 16)
        ln1_g = 1.0 + nrm(bk[0], (1, C))
        ln1_b = nrm(bk[1], (1, C))
        wdw = nrm(bk[2], (3, 3, 3, C), s=0.1)                 # [q/k/v, kh, kw, C]
        bn_gamma = 1.0 + nrm(bk[3], (3, C), s=0.1)
        bn_beta = nrm(bk[4], (3, C), s=0.1)
        bn_rm = nrm(bk[5], (3, C), s=0.1)
        bn_rv = 1.0 + jnp.abs(nrm(bk[6], (3, C), s=0.1))
        bn_scale = bn_gamma * jax.lax.rsqrt(bn_rv + BN_EPS)   # eval-mode BN folded
        bn_shift = bn_beta - bn_rm * bn_scale
        # lane-pack the 9 taps + BN scale/shift: rows [tap0..tap8, scale, shift], lanes q|k|v
        taps = jnp.transpose(wdw, (1, 2, 0, 3)).reshape(9, C3)
        dwbn.append(jnp.concatenate(
            [taps, bn_scale.reshape(1, C3), bn_shift.reshape(1, C3)], axis=0))

        wqkv3 = nrm(bk[7], (3, C, C))                         # (in, out) orientation, no bias
        w_bd = jnp.zeros((C3, C3), jnp.float32)
        w_bd = w_bd.at[0:C, 0:C].set(wqkv3[0] * scale)        # attention scale folded into Wq
        w_bd = w_bd.at[C:2 * C, C:2 * C].set(wqkv3[1])
        w_bd = w_bd.at[2 * C:3 * C, 2 * C:3 * C].set(wqkv3[2])
        wqkv.append(w_bd)

        wproj.append(nrm(bk[8], (C, C)))
        bproj = nrm(bk[9], (1, C))
        ln2_g = 1.0 + nrm(bk[10], (1, C))
        ln2_b = nrm(bk[11], (1, C))
        wfc1.append(nrm(bk[12], (C, HD)))
        bfc1.append(nrm(bk[13], (1, HD)))
        wfc2.append(nrm(bk[14], (HD, C)))
        bfc2 = nrm(bk[15], (1, C))
        vecs_c.append(jnp.concatenate([ln1_g, ln1_b, ln2_g, ln2_b, bproj, bfc2], axis=0))

    return {
        "pe_w": pe_w.astype(jnp.bfloat16),                    # (K, C)       bf16 MXU operand
        "pe_misc": pe_misc,                                   # (4, C)       f32
        "dwbn": jnp.stack(dwbn),                              # (D, 11, 3C)  f32 (VPU)
        "wqkv": jnp.stack(wqkv).astype(jnp.bfloat16),         # (D, 3C, 3C)  bf16
        "wproj": jnp.stack(wproj).astype(jnp.bfloat16),       # (D, C, C)    bf16
        "wfc1": jnp.stack(wfc1).astype(jnp.bfloat16),         # (D, C, HD)   bf16
        "wfc2": jnp.stack(wfc2).astype(jnp.bfloat16),         # (D, HD, C)   bf16
        "vecs_c": jnp.stack(vecs_c),                          # (D, 6, C)    f32
        "bfc1": jnp.stack(bfc1),                              # (D, 1, HD)   f32
    }


# ------------------------------ full forward ---------------------------------
def vit_forward(x_nchw, params):
    B = x_nchw.shape[0]
    H = W = IMG // PATCH
    HW = H * W
    C = EMBED
    K = PATCH * PATCH * IN_CHANS
    HD = int(EMBED * MLP_RATIO)

    bb = min(BLOCK_B, B)
    n_blk = pl.cdiv(B, bb)
    Bp = n_blk * bb

    # NCHW -> (B, HW, K) patch im2col with (ph, pw, cin) column order (matches the
    # (kh, kw, cin) row order of pe_w).  Pure layout glue: stride == patch, padding 0.
    xi = jnp.transpose(x_nchw, (0, 2, 3, 1))
    xi = xi.reshape(B, H, PATCH, W, PATCH, IN_CHANS)
    patches = jnp.transpose(xi, (0, 1, 3, 2, 4, 5)).reshape(B, HW, K)
    if Bp != B:
        patches = jnp.pad(patches, ((0, Bp - B), (0, 0), (0, 0)))
    patches = patches.reshape(n_blk, bb * HW, K)          # image-major rows per block

    masks = _conv_tap_masks(H, W, bb)

    kernel = functools.partial(vit_kernel, H=H, W=W, num_heads=HEADS,
                               depth=DEPTH, bb=bb)
    sp, cls = pl.pallas_call(
        kernel,
        out_shape=(jax.ShapeDtypeStruct((n_blk, bb * HW, C), jnp.float32),
                   jax.ShapeDtypeStruct((n_blk, bb, C), jnp.float32)),
        grid=(n_blk,),
        in_specs=[
            pl.BlockSpec((1, bb * HW, K), lambda b: (b, 0, 0)),         # patches
            pl.BlockSpec((bb * HW, 9), lambda b: (0, 0)),               # hoisted conv tap masks
            pl.BlockSpec((K, C), lambda b: (0, 0)),                     # patch-embed weight (bf16)
            pl.BlockSpec((4, C), lambda b: (0, 0)),                     # pe bias/LN/cls (f32)
            pl.BlockSpec((DEPTH, 11, 3 * C), lambda b: (0, 0, 0)),      # dw taps + folded BN (f32)
            pl.BlockSpec((DEPTH, 3 * C, 3 * C), lambda b: (0, 0, 0)),   # block-diag Wqkv (bf16)
            pl.BlockSpec((DEPTH, C, C), lambda b: (0, 0, 0)),           # Wproj (bf16)
            pl.BlockSpec((DEPTH, C, HD), lambda b: (0, 0, 0)),          # Wfc1 (bf16)
            pl.BlockSpec((DEPTH, HD, C), lambda b: (0, 0, 0)),          # Wfc2 (bf16)
            pl.BlockSpec((DEPTH, 6, C), lambda b: (0, 0, 0)),           # LN params + biases (f32)
            pl.BlockSpec((DEPTH, 1, HD), lambda b: (0, 0, 0)),          # fc1 bias (f32)
        ],
        out_specs=(pl.BlockSpec((1, bb * HW, C), lambda b: (b, 0, 0)),
                   pl.BlockSpec((1, bb, C), lambda b: (b, 0, 0))),
        compiler_params=pltpu.CompilerParams(dimension_semantics=("parallel",)),
    )(patches, masks, params["pe_w"], params["pe_misc"], params["dwbn"],
      params["wqkv"], params["wproj"], params["wfc1"], params["wfc2"],
      params["vecs_c"], params["bfc1"])

    sp = sp.reshape(Bp, HW, C)[:B]                                      # (B, HW, C)
    cls_out = cls.reshape(Bp, 1, C)[:B]                                 # (B, 1, C)
    x_out = jnp.transpose(sp, (0, 2, 1)).reshape(B, C, H, W)            # NCHW, like torch
    return x_out, cls_out


if __name__ == "__main__":
    key = jax.random.PRNGKey(0)
    pkey, xkey = jax.random.split(key)
    params = init_params(pkey)
    x = jax.random.normal(xkey, (2, IN_CHANS, IMG, IMG), dtype=jnp.float32)

    fwd = jax.jit(vit_forward)
    x_out, cls_out = fwd(x, params)
    jax.block_until_ready((x_out, cls_out))

    assert x_out.shape == (2, EMBED, IMG // PATCH, IMG // PATCH)
    assert cls_out.shape == (2, 1, EMBED)
    assert bool(jnp.all(jnp.isfinite(x_out))) and bool(jnp.all(jnp.isfinite(cls_out)))
    print("KERNEL_OK")
</pallas_src>

<mosaic_0001>
module attributes {stable_mosaic.version = 11 : i64} {
  func.func @vit_kernel(%arg0: i32, %arg1: memref<1x32x48xf32, #tpu.memory_space<vmem>>, %arg2: memref<32x9xf32, #tpu.memory_space<vmem>>, %arg3: memref<48x32xbf16, #tpu.memory_space<vmem>>, %arg4: memref<4x32xf32, #tpu.memory_space<vmem>>, %arg5: memref<2x11x96xf32, #tpu.memory_space<vmem>>, %arg6: memref<2x96x96xbf16, #tpu.memory_space<vmem>>, %arg7: memref<2x32x32xbf16, #tpu.memory_space<vmem>>, %arg8: memref<2x32x128xbf16, #tpu.memory_space<vmem>>, %arg9: memref<2x128x32xbf16, #tpu.memory_space<vmem>>, %arg10: memref<2x6x32xf32, #tpu.memory_space<vmem>>, %arg11: memref<2x1x128xf32, #tpu.memory_space<vmem>>, %arg12: memref<1x32x32xf32, #tpu.memory_space<vmem>>, %arg13: memref<1x2x32xf32, #tpu.memory_space<vmem>>) attributes {dimension_semantics = [#tpu.dimension_semantics<parallel>], iteration_bounds = array<i64: 1>, scalar_prefetch = 0 : i64, scratch_operands = 0 : i64, tpu.core_type = #tpu.core_type<tc>, window_params = [{transform_indices = @transform_0, window_bounds = array<i64: 1, 32, 48>}, {pipeline_mode = #tpu.pipeline_mode<synchronous>, transform_indices = @transform_1, window_bounds = array<i64: 32, 9>}, {pipeline_mode = #tpu.pipeline_mode<synchronous>, transform_indices = @transform_2, window_bounds = array<i64: 48, 32>}, {pipeline_mode = #tpu.pipeline_mode<synchronous>, transform_indices = @transform_3, window_bounds = array<i64: 4, 32>}, {pipeline_mode = #tpu.pipeline_mode<synchronous>, transform_indices = @transform_4, window_bounds = array<i64: 2, 11, 96>}, {pipeline_mode = #tpu.pipeline_mode<synchronous>, transform_indices = @transform_5, window_bounds = array<i64: 2, 96, 96>}, {pipeline_mode = #tpu.pipeline_mode<synchronous>, transform_indices = @transform_6, window_bounds = array<i64: 2, 32, 32>}, {pipeline_mode = #tpu.pipeline_mode<synchronous>, transform_indices = @transform_7, window_bounds = array<i64: 2, 32, 128>}, {pipeline_mode = #tpu.pipeline_mode<synchronous>, transform_indices = @transform_8, window_bounds = array<i64: 2, 128, 32>}, {pipeline_mode = #tpu.pipeline_mode<synchronous>, transform_indices = @transform_9, window_bounds = array<i64: 2, 6, 32>}, {pipeline_mode = #tpu.pipeline_mode<synchronous>, transform_indices = @transform_10, window_bounds = array<i64: 2, 1, 128>}, {transform_indices = @transform_11, window_bounds = array<i64: 1, 32, 32>}, {transform_indices = @transform_12, window_bounds = array<i64: 1, 2, 32>}]} {
    %c0 = arith.constant 0 : index
    %c0_0 = arith.constant 0 : index
    %c0_1 = arith.constant 0 : index
    %0 = vector.load %arg1[%c0, %c0_0, %c0_1] : memref<1x32x48xf32, #tpu.memory_space<vmem>>, vector<1x32x48xf32>
    %1 = vector.shape_cast %0 : vector<1x32x48xf32> to vector<32x48xf32>
    %2 = arith.truncf %1 : vector<32x48xf32> to vector<32x48xbf16>
    %c0_2 = arith.constant 0 : index
    %c0_3 = arith.constant 0 : index
    %3 = vector.load %arg3[%c0_2, %c0_3] : memref<48x32xbf16, #tpu.memory_space<vmem>>, vector<48x32xbf16>
    %cst = arith.constant dense<0.000000e+00> : vector<32x32xf32>
    %4 = tpu.matmul %2, %3, %cst {dimension_numbers = #tpu.dot_dimension_numbers<[1], [0], [0], [1], [0, 0, 1, 1], [], []>} : vector<32x48xbf16>, vector<48x32xbf16>, vector<32x32xf32> -> vector<32x32xf32>
    %c0_4 = arith.constant 0 : index
    %c0_5 = arith.constant 0 : index
    %5 = vector.load %arg4[%c0_4, %c0_5] : memref<4x32xf32, #tpu.memory_space<vmem>>, vector<1x32xf32>
    %6 = vector.broadcast %5 : vector<1x32xf32> to vector<32x32xf32>
    %7 = arith.addf %4, %6 : vector<32x32xf32>
    %c1 = arith.constant 1 : index
    %c0_6 = arith.constant 0 : index
    %8 = vector.load %arg4[%c1, %c0_6] : memref<4x32xf32, #tpu.memory_space<vmem>>, vector<1x32xf32>
    %c2 = arith.constant 2 : index
    %c0_7 = arith.constant 0 : index
    %9 = vector.load %arg4[%c2, %c0_7] : memref<4x32xf32, #tpu.memory_space<vmem>>, vector<1x32xf32>
    %cst_8 = arith.constant dense<0.000000e+00> : vector<32xf32>
    %10 = vector.multi_reduction <add>, %7, %cst_8 [1] : vector<32x32xf32> to vector<32xf32>
    %11 = vector.shape_cast %10 : vector<32xf32> to vector<32x1xf32>
    %cst_9 = arith.constant 3.200000e+01 : f32
    %12 = vector.broadcast %cst_9 : f32 to vector<32x1xf32>
    %13 = arith.divf %11, %12 : vector<32x1xf32>
    %14 = vector.broadcast %13 : vector<32x1xf32> to vector<32x32xf32>
    %15 = arith.subf %7, %14 : vector<32x32xf32>
    %16 = arith.mulf %15, %15 : vector<32x32xf32>
    %cst_10 = arith.constant dense<0.000000e+00> : vector<32xf32>
    %17 = vector.multi_reduction <add>, %16, %cst_10 [1] : vector<32x32xf32> to vector<32xf32>
    %18 = vector.shape_cast %17 : vector<32xf32> to vector<32x1xf32>
    %cst_11 = arith.constant 3.200000e+01 : f32
    %19 = vector.broadcast %cst_11 : f32 to vector<32x1xf32>
    %20 = arith.divf %18, %19 : vector<32x1xf32>
    %cst_12 = arith.constant 9.99999974E-6 : f32
    %21 = vector.broadcast %cst_12 : f32 to vector<32x1xf32>
    %22 = arith.addf %20, %21 : vector<32x1xf32>
    %23 = math.rsqrt %22 : vector<32x1xf32>
    %24 = vector.broadcast %23 : vector<32x1xf32> to vector<32x32xf32>
    %25 = arith.mulf %15, %24 : vector<32x32xf32>
    %26 = vector.broadcast %8 : vector<1x32xf32> to vector<32x32xf32>
    %27 = arith.mulf %25, %26 : vector<32x32xf32>
    %28 = vector.broadcast %9 : vector<1x32xf32> to vector<32x32xf32>
    %29 = arith.addf %27, %28 : vector<32x32xf32>
    %c3 = arith.constant 3 : index
    %c0_13 = arith.constant 0 : index
    %30 = vector.load %arg4[%c3, %c0_13] : memref<4x32xf32, #tpu.memory_space<vmem>>, vector<1x32xf32>
    %31 = vector.shape_cast %30 : vector<1x32xf32> to vector<1x32xf32>
    %32 = vector.broadcast %31 : vector<1x32xf32> to vector<2x32xf32>
    %33 = tpu.concatenate %29, %32 in 0 : vector<32x32xf32>, vector<2x32xf32> -> vector<34x32xf32>
    %c0_14 = arith.constant 0 : index
    %c0_15 = arith.constant 0 : index
    %c0_16 = arith.constant 0 : index
    %34 = vector.load %arg10[%c0_14, %c0_15, %c0_16] : memref<2x6x32xf32, #tpu.memory_space<vmem>>, vector<1x1x32xf32>
    %35 = vector.shape_cast %34 : vector<1x1x32xf32> to vector<1x32xf32>
    %c0_17 = arith.constant 0 : index
    %c1_18 = arith.constant 1 : index
    %c0_19 = arith.constant 0 : index
    %36 = vector.load %arg10[%c0_17, %c1_18, %c0_19] : memref<2x6x32xf32, #tpu.memory_space<vmem>>, vector<1x1x32xf32>
    %37 = vector.shape_cast %36 : vector<1x1x32xf32> to vector<1x32xf32>
    %cst_20 = arith.constant dense<0.000000e+00> : vector<34xf32>
    %38 = vector.multi_reduction <add>, %33, %cst_20 [1] : vector<34x32xf32> to vector<34xf32>
    %39 = vector.shape_cast %38 : vector<34xf32> to vector<34x1xf32>
    %cst_21 = arith.constant 3.200000e+01 : f32
    %40 = vector.broadcast %cst_21 : f32 to vector<34x1xf32>
    %41 = arith.divf %39, %40 : vector<34x1xf32>
    %42 = vector.broadcast %41 : vector<34x1xf32> to vector<34x32xf32>
    %43 = arith.subf %33, %42 : vector<34x32xf32>
    %44 = arith.mulf %43, %43 : vector<34x32xf32>
    %cst_22 = arith.constant dense<0.000000e+00> : vector<34xf32>
    %45 = vector.multi_reduction <add>, %44, %cst_22 [1] : vector<34x32xf32> to vector<34xf32>
    %46 = vector.shape_cast %45 : vector<34xf32> to vector<34x1xf32>
    %cst_23 = arith.constant 3.200000e+01 : f32
    %47 = vector.broadcast %cst_23 : f32 to vector<34x1xf32>
    %48 = arith.divf %46, %47 : vector<34x1xf32>
    %cst_24 = arith.constant 9.99999974E-6 : f32
    %49 = vector.broadcast %cst_24 : f32 to vector<34x1xf32>
    %50 = arith.addf %48, %49 : vector<34x1xf32>
    %51 = math.rsqrt %50 : vector<34x1xf32>
    %52 = vector.broadcast %51 : vector<34x1xf32> to vector<34x32xf32>
    %53 = arith.mulf %43, %52 : vector<34x32xf32>
    %54 = vector.broadcast %35 : vector<1x32xf32> to vector<34x32xf32>
    %55 = arith.mulf %53, %54 : vector<34x32xf32>
    %56 = vector.broadcast %37 : vector<1x32xf32> to vector<34x32xf32>
    %57 = arith.addf %55, %56 : vector<34x32xf32>
    %58 = vector.extract_strided_slice %57 {offsets = [0, 0], sizes = [32, 32], strides = [1, 1]} : vector<34x32xf32> to vector<32x32xf32>
    %59 = vector.extract_strided_slice %57 {offsets = [32, 0], sizes = [2, 32], strides = [1, 1]} : vector<34x32xf32> to vector<2x32xf32>
    %60 = tpu.concatenate %58, %58, %58 in 1 : vector<32x32xf32>, vector<32x32xf32>, vector<32x32xf32> -> vector<32x96xf32>
    %c0_25 = arith.constant 0 : index
    %c4 = arith.constant 4 : index
    %c0_26 = arith.constant 0 : index
    %61 = vector.load %arg5[%c0_25, %c4, %c0_26] : memref<2x11x96xf32, #tpu.memory_space<vmem>>, vector<1x1x96xf32>
    %62 = vector.shape_cast %61 : vector<1x1x96xf32> to vector<1x96xf32>
    %63 = vector.broadcast %62 : vector<1x96xf32> to vector<32x96xf32>
    %64 = arith.mulf %60, %63 : vector<32x96xf32>
    %c5_i32 = arith.constant 5 : i32
    %65 = tpu.dynamic_rotate %60 by %c5_i32 dim 0 : vector<32x96xf32>, i32 -> vector<32x96xf32>
    %c0_27 = arith.constant 0 : index
    %c0_28 = arith.constant 0 : index
    %66 = vector.load %arg2[%c0_27, %c0_28] : memref<32x9xf32, #tpu.memory_space<vmem>>, vector<32x1xf32>
    %67 = vector.broadcast %66 : vector<32x1xf32> to vector<32x96xf32>
    %68 = arith.mulf %65, %67 : vector<32x96xf32>
    %c0_29 = arith.constant 0 : index
    %c0_30 = arith.constant 0 : index
    %c0_31 = arith.constant 0 : index
    %69 = vector.load %arg5[%c0_29, %c0_30, %c0_31] : memref<2x11x96xf32, #tpu.memory_space<vmem>>, vector<1x1x96xf32>
    %70 = vector.shape_cast %69 : vector<1x1x96xf32> to vector<1x96xf32>
    %71 = vector.broadcast %70 : vector<1x96xf32> to vector<32x96xf32>
    %72 = arith.mulf %68, %71 : vector<32x96xf32>
    %73 = arith.addf %64, %72 : vector<32x96xf32>
    %c4_i32 = arith.constant 4 : i32
    %74 = tpu.dynamic_rotate %60 by %c4_i32 dim 0 : vector<32x96xf32>, i32 -> vector<32x96xf32>
    %c0_32 = arith.constant 0 : index
    %c1_33 = arith.constant 1 : index
    %75 = vector.load %arg2[%c0_32, %c1_33] : memref<32x9xf32, #tpu.memory_space<vmem>>, vector<32x1xf32>
    %76 = vector.broadcast %75 : vector<32x1xf32> to vector<32x96xf32>
    %77 = arith.mulf %74, %76 : vector<32x96xf32>
    %c0_34 = arith.constant 0 : index
    %c1_35 = arith.constant 1 : index
    %c0_36 = arith.constant 0 : index
    %78 = vector.load %arg5[%c0_34, %c1_35, %c0_36] : memref<2x11x96xf32, #tpu.memory_space<vmem>>, vector<1x1x96xf32>
    %79 = vector.shape_cast %78 : vector<1x1x96xf32> to vector<1x96xf32>
    %80 = vector.broadcast %79 : vector<1x96xf32> to vector<32x96xf32>
    %81 = arith.mulf %77, %80 : vector<32x96xf32>
    %82 = arith.addf %73, %81 : vector<32x96xf32>
    %c3_i32 = arith.constant 3 : i32
    %83 = tpu.dynamic_rotate %60 by %c3_i32 dim 0 : vector<32x96xf32>, i32 -> vector<32x96xf32>
    %c0_37 = arith.constant 0 : index
    %c2_38 = arith.constant 2 : index
    %84 = vector.load %arg2[%c0_37, %c2_38] : memref<32x9xf32, #tpu.memory_space<vmem>>, vector<32x1xf32>
    %85 = vector.broadcast %84 : vector<32x1xf32> to vector<32x96xf32>
    %86 = arith.mulf %83, %85 : vector<32x96xf32>
    %c0_39 = arith.constant 0 : index
    %c2_40 = arith.constant 2 : index
    %c0_41 = arith.constant 0 : index
    %87 = vector.load %arg5[%c0_39, %c2_40, %c0_41] : memref<2x11x96xf32, #tpu.memory_space<vmem>>, vector<1x1x96xf32>
    %88 = vector.shape_cast %87 : vector<1x1x96xf32> to vector<1x96xf32>
    %89 = vector.broadcast %88 : vector<1x96xf32> to vector<32x96xf32>
    %90 = arith.mulf %86, %89 : vector<32x96xf32>
    %91 = arith.addf %82, %90 : vector<32x96xf32>
    %c1_i32 = arith.constant 1 : i32
    %92 = tpu.dynamic_rotate %60 by %c1_i32 dim 0 : vector<32x96xf32>, i32 -> vector<32x96xf32>
    %c0_42 = arith.constant 0 : index
    %c3_43 = arith.constant 3 : index
    %93 = vector.load %arg2[%c0_42, %c3_43] : memref<32x9xf32, #tpu.memory_space<vmem>>, vector<32x1xf32>
    %94 = vector.broadcast %93 : vector<32x1xf32> to vector<32x96xf32>
    %95 = arith.mulf %92, %94 : vector<32x96xf32>
    %c0_44 = arith.constant 0 : index
    %c3_45 = arith.constant 3 : index
    %c0_46 = arith.constant 0 : index
    %96 = vector.load %arg5[%c0_44, %c3_45, %c0_46] : memref<2x11x96xf32, #tpu.memory_space<vmem>>, vector<1x1x96xf32>
    %97 = vector.shape_cast %96 : vector<1x1x96xf32> to vector<1x96xf32>
    %98 = vector.broadcast %97 : vector<1x96xf32> to vector<32x96xf32>
    %99 = arith.mulf %95, %98 : vector<32x96xf32>
    %100 = arith.addf %91, %99 : vector<32x96xf32>
    %c31_i32 = arith.constant 31 : i32
    %101 = tpu.dynamic_rotate %60 by %c31_i32 dim 0 : vector<32x96xf32>, i32 -> vector<32x96xf32>
    %c0_47 = arith.constant 0 : index
    %c5 = arith.constant 5 : index
    %102 = vector.load %arg2[%c0_47, %c5] : memref<32x9xf32, #tpu.memory_space<vmem>>, vector<32x1xf32>
    %103 = vector.broadcast %102 : vector<32x1xf32> to vector<32x96xf32>
    %104 = arith.mulf %101, %103 : vector<32x96xf32>
    %c0_48 = arith.constant 0 : index
    %c5_49 = arith.constant 5 : index
    %c0_50 = arith.constant 0 : index
    %105 = vector.load %arg5[%c0_48, %c5_49, %c0_50] : memref<2x11x96xf32, #tpu.memory_space<vmem>>, vector<1x1x96xf32>
    %106 = vector.shape_cast %105 : vector<1x1x96xf32> to vector<1x96xf32>
    %107 = vector.broadcast %106 : vector<1x96xf32> to vector<32x96xf32>
    %108 = arith.mulf %104, %107 : vector<32x96xf32>
    %109 = arith.addf %100, %108 : vector<32x96xf32>
    %c29_i32 = arith.constant 29 : i32
    %110 = tpu.dynamic_rotate %60 by %c29_i32 dim 0 : vector<32x96xf32>, i32 -> vector<32x96xf32>
    %c0_51 = arith.constant 0 : index
    %c6 = arith.constant 6 : index
    %111 = vector.load %arg2[%c0_51, %c6] : memref<32x9xf32, #tpu.memory_space<vmem>>, vector<32x1xf32>
    %112 = vector.broadcast %111 : vector<32x1xf32> to vector<32x96xf32>
    %113 = arith.mulf %110, %112 : vector<32x96xf32>
    %c0_52 = arith.constant 0 : index
    %c6_53 = arith.constant 6 : index
    %c0_54 = arith.constant 0 : index
    %114 = vector.load %arg5[%c0_52, %c6_53, %c0_54] : memref<2x11x96xf32, #tpu.memory_space<vmem>>, vector<1x1x96xf32>
    %115 = vector.shape_cast %114 : vector<1x1x96xf32> to vector<1x96xf32>
    %116 = vector.broadcast %115 : vector<1x96xf32> to vector<32x96xf32>
    %117 = arith.mulf %113, %116 : vector<32x96xf32>
    %118 = arith.addf %109, %117 : vector<32x96xf32>
    %c28_i32 = arith.constant 28 : i32
    %119 = tpu.dynamic_rotate %60 by %c28_i32 dim 0 : vector<32x96xf32>, i32 -> vector<32x96xf32>
    %c0_55 = arith.constant 0 : index
    %c7 = arith.constant 7 : index
    %120 = vector.load %arg2[%c0_55, %c7] : memref<32x9xf32, #tpu.memory_space<vmem>>, vector<32x1xf32>
    %121 = vector.broadcast %120 : vector<32x1xf32> to vector<32x96xf32>
    %122 = arith.mulf %119, %121 : vector<32x96xf32>
    %c0_56 = arith.constant 0 : index
    %c7_57 = arith.constant 7 : index
    %c0_58 = arith.constant 0 : index
    %123 = vector.load %arg5[%c0_56, %c7_57, %c0_58] : memref<2x11x96xf32, #tpu.memory_space<vmem>>, vector<1x1x96xf32>
    %124 = vector.shape_cast %123 : vector<1x1x96xf32> to vector<1x96xf32>
    %125 = vector.broadcast %124 : vector<1x96xf32> to vector<32x96xf32>
    %126 = arith.mulf %122, %125 : vector<32x96xf32>
    %127 = arith.addf %118, %126 : vector<32x96xf32>
    %c27_i32 = arith.constant 27 : i32
    %128 = tpu.dynamic_rotate %60 by %c27_i32 dim 0 : vector<32x96xf32>, i32 -> vector<32x96xf32>
    %c0_59 = arith.constant 0 : index
    %c8 = arith.constant 8 : index
    %129 = vector.load %arg2[%c0_59, %c8] : memref<32x9xf32, #tpu.memory_space<vmem>>, vector<32x1xf32>
    %130 = vector.broadcast %129 : vector<32x1xf32> to vector<32x96xf32>
    %131 = arith.mulf %128, %130 : vector<32x96xf32>
    %c0_60 = arith.constant 0 : index
    %c8_61 = arith.constant 8 : index
    %c0_62 = arith.constant 0 : index
    %132 = vector.load %arg5[%c0_60, %c8_61, %c0_62] : memref<2x11x96xf32, #tpu.memory_space<vmem>>, vector<1x1x96xf32>
    %133 = vector.shape_cast %132 : vector<1x1x96xf32> to vector<1x96xf32>
    %134 = vector.broadcast %133 : vector<1x96xf32> to vector<32x96xf32>
    %135 = arith.mulf %131, %134 : vector<32x96xf32>
    %136 = arith.addf %127, %135 : vector<32x96xf32>
    %c0_63 = arith.constant 0 : index
    %c9 = arith.constant 9 : index
    %c0_64 = arith.constant 0 : index
    %137 = vector.load %arg5[%c0_63, %c9, %c0_64] : memref<2x11x96xf32, #tpu.memory_space<vmem>>, vector<1x1x96xf32>
    %138 = vector.shape_cast %137 : vector<1x1x96xf32> to vector<1x96xf32>
    %139 = vector.broadcast %138 : vector<1x96xf32> to vector<32x96xf32>
    %140 = arith.mulf %136, %139 : vector<32x96xf32>
    %c0_65 = arith.constant 0 : index
    %c10 = arith.constant 10 : index
    %c0_66 = arith.constant 0 : index
    %141 = vector.load %arg5[%c0_65, %c10, %c0_66] : memref<2x11x96xf32, #tpu.memory_space<vmem>>, vector<1x1x96xf32>
    %142 = vector.shape_cast %141 : vector<1x1x96xf32> to vector<1x96xf32>
    %143 = vector.broadcast %142 : vector<1x96xf32> to vector<32x96xf32>
    %144 = arith.addf %140, %143 : vector<32x96xf32>
    %145 = tpu.concatenate %59, %59, %59 in 1 : vector<2x32xf32>, vector<2x32xf32>, vector<2x32xf32> -> vector<2x96xf32>
    %146 = tpu.concatenate %144, %145 in 0 : vector<32x96xf32>, vector<2x96xf32> -> vector<34x96xf32>
    %147 = arith.truncf %146 : vector<34x96xf32> to vector<34x96xbf16>
    %c0_67 = arith.constant 0 : index
    %c0_68 = arith.constant 0 : index
    %c0_69 = arith.constant 0 : index
    %148 = vector.load %arg6[%c0_67, %c0_68, %c0_69] : memref<2x96x96xbf16, #tpu.memory_space<vmem>>, vector<1x96x96xbf16>
    %149 = vector.shape_cast %148 : vector<1x96x96xbf16> to vector<96x96xbf16>
    %cst_70 = arith.constant dense<0.000000e+00> : vector<34x96xf32>
    %150 = tpu.matmul %147, %149, %cst_70 {dimension_numbers = #tpu.dot_dimension_numbers<[1], [0], [0], [1], [0, 0, 1, 1], [], []>} : vector<34x96xbf16>, vector<96x96xbf16>, vector<34x96xf32> -> vector<34x96xf32>
    %151 = vector.extract_strided_slice %150 {offsets = [0, 0], sizes = [34, 32], strides = [1, 1]} : vector<34x96xf32> to vector<34x32xf32>
    %152 = vector.extract_strided_slice %151 {offsets = [32, 0], sizes = [2, 32], strides = [1, 1]} : vector<34x32xf32> to vector<2x32xf32>
    %153 = vector.shape_cast %152 : vector<2x32xf32> to vector<2x1x32xf32>
    %154 = vector.extract_strided_slice %151 {offsets = [0, 0], sizes = [32, 32], strides = [1, 1]} : vector<34x32xf32> to vector<32x32xf32>
    %155 = vector.shape_cast %154 : vector<32x32xf32> to vector<2x16x32xf32>
    %156 = tpu.concatenate %153, %155 in 1 : vector<2x1x32xf32>, vector<2x16x32xf32> -> vector<2x17x32xf32>
    %157 = vector.extract_strided_slice %150 {offsets = [0, 32], sizes = [34, 32], strides = [1, 1]} : vector<34x96xf32> to vector<34x32xf32>
    %158 = vector.extract_strided_slice %157 {offsets = [32, 0], sizes = [2, 32], strides = [1, 1]} : vector<34x32xf32> to vector<2x32xf32>
    %159 = vector.shape_cast %158 : vector<2x32xf32> to vector<2x1x32xf32>
    %160 = vector.extract_strided_slice %157 {offsets = [0, 0], sizes = [32, 32], strides = [1, 1]} : vector<34x32xf32> to vector<32x32xf32>
    %161 = vector.shape_cast %160 : vector<32x32xf32> to vector<2x16x32xf32>
    %162 = tpu.concatenate %159, %161 in 1 : vector<2x1x32xf32>, vector<2x16x32xf32> -> vector<2x17x32xf32>
    %163 = vector.extract_strided_slice %150 {offsets = [0, 64], sizes = [34, 32], strides = [1, 1]} : vector<34x96xf32> to vector<34x32xf32>
    %164 = vector.extract_strided_slice %163 {offsets = [32, 0], sizes = [2, 32], strides = [1, 1]} : vector<34x32xf32> to vector<2x32xf32>
    %165 = vector.shape_cast %164 : vector<2x32xf32> to vector<2x1x32xf32>
    %166 = vector.extract_strided_slice %163 {offsets = [0, 0], sizes = [32, 32], strides = [1, 1]} : vector<34x32xf32> to vector<32x32xf32>
    %167 = vector.shape_cast %166 : vector<32x32xf32> to vector<2x16x32xf32>
    %168 = tpu.concatenate %165, %167 in 1 : vector<2x1x32xf32>, vector<2x16x32xf32> -> vector<2x17x32xf32>
    %169 = vector.extract_strided_slice %156 {offsets = [0, 0, 0], sizes = [2, 17, 8], strides = [1, 1, 1]} : vector<2x17x32xf32> to vector<2x17x8xf32>
    %170 = arith.truncf %169 : vector<2x17x8xf32> to vector<2x17x8xbf16>
    %171 = vector.extract_strided_slice %162 {offsets = [0, 0, 0], sizes = [2, 17, 8], strides = [1, 1, 1]} : vector<2x17x32xf32> to vector<2x17x8xf32>
    %172 = arith.truncf %171 : vector<2x17x8xf32> to vector<2x17x8xbf16>
    %173 = vector.extract_strided_slice %168 {offsets = [0, 0, 0], sizes = [2, 17, 8], strides = [1, 1, 1]} : vector<2x17x32xf32> to vector<2x17x8xf32>
    %174 = arith.truncf %173 : vector<2x17x8xf32> to vector<2x17x8xbf16>
    "tpu.trace_start"() <{level = 10 : i32, message = "bqd,bkd->bqk"}> : () -> ()
    %cst_71 = arith.constant dense<0.000000e+00> : vector<2x17x17xf32>
    %175 = tpu.matmul %170, %172, %cst_71 {dimension_numbers = #tpu.dot_dimension_numbers<[2], [2], [1], [1], [0, 0, 0, 1, 1, 1], [0], [0]>} : vector<2x17x8xbf16>, vector<2x17x8xbf16>, vector<2x17x17xf32> -> vector<2x17x17xf32>
    "tpu.trace_stop"() : () -> ()
    %cst_72 = arith.constant dense<0xFF800000> : vector<2x17xf32>
    %176 = vector.multi_reduction <maximumf>, %175, %cst_72 [2] : vector<2x17x17xf32> to vector<2x17xf32>
    %177 = vector.shape_cast %176 : vector<2x17xf32> to vector<2x17x1xf32>
    %178 = vector.broadcast %177 : vector<2x17x1xf32> to vector<2x17x17xf32>
    %179 = arith.subf %175, %178 : vector<2x17x17xf32>
    %180 = math.exp %179 : vector<2x17x17xf32>
    %cst_73 = arith.constant dense<0.000000e+00> : vector<2x17xf32>
    %181 = vector.multi_reduction <add>, %180, %cst_73 [2] : vector<2x17x17xf32> to vector<2x17xf32>
    %182 = vector.shape_cast %181 : vector<2x17xf32> to vector<2x17x1xf32>
    %183 = vector.broadcast %182 : vector<2x17x1xf32> to vector<2x17x17xf32>
    %184 = arith.divf %180, %183 : vector<2x17x17xf32>
    %185 = arith.truncf %184 : vector<2x17x17xf32> to vector<2x17x17xbf16>
    "tpu.trace_start"() <{level = 10 : i32, message = "bqk,bkd->bqd"}> : () -> ()
    %cst_74 = arith.constant dense<0.000000e+00> : vector<2x17x8xf32>
    %186 = tpu.matmul %185, %174, %cst_74 {dimension_numbers = #tpu.dot_dimension_numbers<[2], [1], [1], [2], [0, 0, 0, 1, 1, 2], [0], [0]>} : vector<2x17x17xbf16>, vector<2x17x8xbf16>, vector<2x17x8xf32> -> vector<2x17x8xf32>
    "tpu.trace_stop"() : () -> ()
    %187 = vector.extract_strided_slice %156 {offsets = [0, 0, 8], sizes = [2, 17, 8], strides = [1, 1, 1]} : vector<2x17x32xf32> to vector<2x17x8xf32>
    %188 = arith.truncf %187 : vector<2x17x8xf32> to vector<2x17x8xbf16>
    %189 = vector.extract_strided_slice %162 {offsets = [0, 0, 8], sizes = [2, 17, 8], strides = [1, 1, 1]} : vector<2x17x32xf32> to vector<2x17x8xf32>
    %190 = arith.truncf %189 : vector<2x17x8xf32> to vector<2x17x8xbf16>
    %191 = vector.extract_strided_slice %168 {offsets = [0, 0, 8], sizes = [2, 17, 8], strides = [1, 1, 1]} : vector<2x17x32xf32> to vector<2x17x8xf32>
    %192 = arith.truncf %191 : vector<2x17x8xf32> to vector<2x17x8xbf16>
    "tpu.trace_start"() <{level = 10 : i32, message = "bqd,bkd->bqk"}> : () -> ()
    %cst_75 = arith.constant dense<0.000000e+00> : vector<2x17x17xf32>
    %193 = tpu.matmul %188, %190, %cst_75 {dimension_numbers = #tpu.dot_dimension_numbers<[2], [2], [1], [1], [0, 0, 0, 1, 1, 1], [0], [0]>} : vector<2x17x8xbf16>, vector<2x17x8xbf16>, vector<2x17x17xf32> -> vector<2x17x17xf32>
    "tpu.trace_stop"() : () -> ()
    %cst_76 = arith.constant dense<0xFF800000> : vector<2x17xf32>
    %194 = vector.multi_reduction <maximumf>, %193, %cst_76 [2] : vector<2x17x17xf32> to vector<2x17xf32>
    %195 = vector.shape_cast %194 : vector<2x17xf32> to vector<2x17x1xf32>
    %196 = vector.broadcast %195 : vector<2x17x1xf32> to vector<2x17x17xf32>
    %197 = arith.subf %193, %196 : vector<2x17x17xf32>
    %198 = math.exp %197 : vector<2x17x17xf32>
    %cst_77 = arith.constant dense<0.000000e+00> : vector<2x17xf32>
    %199 = vector.multi_reduction <add>, %198, %cst_77 [2] : vector<2x17x17xf32> to vector<2x17xf32>
    %200 = vector.shape_cast %199 : vector<2x17xf32> to vector<2x17x1xf32>
    %201 = vector.broadcast %200 : vector<2x17x1xf32> to vector<2x17x17xf32>
    %202 = arith.divf %198, %201 : vector<2x17x17xf32>
    %203 = arith.truncf %202 : vector<2x17x17xf32> to vector<2x17x17xbf16>
    "tpu.trace_start"() <{level = 10 : i32, message = "bqk,bkd->bqd"}> : () -> ()
    %cst_78 = arith.constant dense<0.000000e+00> : vector<2x17x8xf32>
    %204 = tpu.matmul %203, %192, %cst_78 {dimension_numbers = #tpu.dot_dimension_numbers<[2], [1], [1], [2], [0, 0, 0, 1, 1, 2], [0], [0]>} : vector<2x17x17xbf16>, vector<2x17x8xbf16>, vector<2x17x8xf32> -> vector<2x17x8xf32>
    "tpu.trace_stop"() : () -> ()
    %205 = vector.extract_strided_slice %156 {offsets = [0, 0, 16], sizes = [2, 17, 8], strides = [1, 1, 1]} : vector<2x17x32xf32> to vector<2x17x8xf32>
    %206 = arith.truncf %205 : vector<2x17x8xf32> to vector<2x17x8xbf16>
    %207 = vector.extract_strided_slice %162 {offsets = [0, 0, 16], sizes = [2, 17, 8], strides = [1, 1, 1]} : vector<2x17x32xf32> to vector<2x17x8xf32>
    %208 = arith.truncf %207 : vector<2x17x8xf32> to vector<2x17x8xbf16>
    %209 = vector.extract_strided_slice %168 {offsets = [0, 0, 16], sizes = [2, 17, 8], strides = [1, 1, 1]} : vector<2x17x32xf32> to vector<2x17x8xf32>
    %210 = arith.truncf %209 : vector<2x17x8xf32> to vector<2x17x8xbf16>
    "tpu.trace_start"() <{level = 10 : i32, message = "bqd,bkd->bqk"}> : () -> ()
    %cst_79 = arith.constant dense<0.000000e+00> : vector<2x17x17xf32>
    %211 = tpu.matmul %206, %208, %cst_79 {dimension_numbers = #tpu.dot_dimension_numbers<[2], [2], [1], [1], [0, 0, 0, 1, 1, 1], [0], [0]>} : vector<2x17x8xbf16>, vector<2x17x8xbf16>, vector<2x17x17xf32> -> vector<2x17x17xf32>
    "tpu.trace_stop"() : () -> ()
    %cst_80 = arith.constant dense<0xFF800000> : vector<2x17xf32>
    %212 = vector.multi_reduction <maximumf>, %211, %cst_80 [2] : vector<2x17x17xf32> to vector<2x17xf32>
    %213 = vector.shape_cast %212 : vector<2x17xf32> to vector<2x17x1xf32>
    %214 = vector.broadcast %213 : vector<2x17x1xf32> to vector<2x17x17xf32>
    %215 = arith.subf %211, %214 : vector<2x17x17xf32>
    %216 = math.exp %215 : vector<2x17x17xf32>
    %cst_81 = arith.constant dense<0.000000e+00> : vector<2x17xf32>
    %217 = vector.multi_reduction <add>, %216, %cst_81 [2] : vector<2x17x17xf32> to vector<2x17xf32>
    %218 = vector.shape_cast %217 : vector<2x17xf32> to vector<2x17x1xf32>
    %219 = vector.broadcast %218 : vector<2x17x1xf32> to vector<2x17x17xf32>
    %220 = arith.divf %216, %219 : vector<2x17x17xf32>
    %221 = arith.truncf %220 : vector<2x17x17xf32> to vector<2x17x17xbf16>
    "tpu.trace_start"() <{level = 10 : i32, message = "bqk,bkd->bqd"}> : () -> ()
    %cst_82 = arith.constant dense<0.000000e+00> : vector<2x17x8xf32>
    %222 = tpu.matmul %221, %210, %cst_82 {dimension_numbers = #tpu.dot_dimension_numbers<[2], [1], [1], [2], [0, 0, 0, 1, 1, 2], [0], [0]>} : vector<2x17x17xbf16>, vector<2x17x8xbf16>, vector<2x17x8xf32> -> vector<2x17x8xf32>
    "tpu.trace_stop"() : () -> ()
    %223 = vector.extract_strided_slice %156 {offsets = [0, 0, 24], sizes = [2, 17, 8], strides = [1, 1, 1]} : vector<2x17x32xf32> to vector<2x17x8xf32>
    %224 = arith.truncf %223 : vector<2x17x8xf32> to vector<2x17x8xbf16>
    %225 = vector.extract_strided_slice %162 {offsets = [0, 0, 24], sizes = [2, 17, 8], strides = [1, 1, 1]} : vector<2x17x32xf32> to vector<2x17x8xf32>
    %226 = arith.truncf %225 : vector<2x17x8xf32> to vector<2x17x8xbf16>
    %227 = vector.extract_strided_slice %168 {offsets = [0, 0, 24], sizes = [2, 17, 8], strides = [1, 1, 1]} : vector<2x17x32xf32> to vector<2x17x8xf32>
    %228 = arith.truncf %227 : vector<2x17x8xf32> to vector<2x17x8xbf16>
    "tpu.trace_start"() <{level = 10 : i32, message = "bqd,bkd->bqk"}> : () -> ()
    %cst_83 = arith.constant dense<0.000000e+00> : vector<2x17x17xf32>
    %229 = tpu.matmul %224, %226, %cst_83 {dimension_numbers = #tpu.dot_dimension_numbers<[2], [2], [1], [1], [0, 0, 0, 1, 1, 1], [0], [0]>} : vector<2x17x8xbf16>, vector<2x17x8xbf16>, vector<2x17x17xf32> -> vector<2x17x17xf32>
    "tpu.trace_stop"() : () -> ()
    %cst_84 = arith.constant dense<0xFF800000> : vector<2x17xf32>
    %230 = vector.multi_reduction <maximumf>, %229, %cst_84 [2] : vector<2x17x17xf32> to vector<2x17xf32>
    %231 = vector.shape_cast %230 : vector<2x17xf32> to vector<2x17x1xf32>
    %232 = vector.broadcast %231 : vector<2x17x1xf32> to vector<2x17x17xf32>
    %233 = arith.subf %229, %232 : vector<2x17x17xf32>
    %234 = math.exp %233 : vector<2x17x17xf32>
    %cst_85 = arith.constant dense<0.000000e+00> : vector<2x17xf32>
    %235 = vector.multi_reduction <add>, %234, %cst_85 [2] : vector<2x17x17xf32> to vector<2x17xf32>
    %236 = vector.shape_cast %235 : vector<2x17xf32> to vector<2x17x1xf32>
    %237 = vector.broadcast %236 : vector<2x17x1xf32> to vector<2x17x17xf32>
    %238 = arith.divf %234, %237 : vector<2x17x17xf32>
    %239 = arith.truncf %238 : vector<2x17x17xf32> to vector<2x17x17xbf16>
    "tpu.trace_start"() <{level = 10 : i32, message = "bqk,bkd->bqd"}> : () -> ()
    %cst_86 = arith.constant dense<0.000000e+00> : vector<2x17x8xf32>
    %240 = tpu.matmul %239, %228, %cst_86 {dimension_numbers = #tpu.dot_dimension_numbers<[2], [1], [1], [2], [0, 0, 0, 1, 1, 2], [0], [0]>} : vector<2x17x17xbf16>, vector<2x17x8xbf16>, vector<2x17x8xf32> -> vector<2x17x8xf32>
    "tpu.trace_stop"() : () -> ()
    %241 = tpu.concatenate %186, %204, %222, %240 in 2 : vector<2x17x8xf32>, vector<2x17x8xf32>, vector<2x17x8xf32>, vector<2x17x8xf32> -> vector<2x17x32xf32>
    %242 = vector.extract_strided_slice %241 {offsets = [0, 1, 0], sizes = [2, 16, 32], strides = [1, 1, 1]} : vector<2x17x32xf32> to vector<2x16x32xf32>
    %243 = vector.shape_cast %242 : vector<2x16x32xf32> to vector<32x32xf32>
    %244 = vector.extract_strided_slice %241 {offsets = [0, 0, 0], sizes = [2, 1, 32], strides = [1, 1, 1]} : vector<2x17x32xf32> to vector<2x1x32xf32>
    %245 = vector.shape_cast %244 : vector<2x1x32xf32> to vector<2x32xf32>
    %246 = tpu.concatenate %243, %245 in 0 : vector<32x32xf32>, vector<2x32xf32> -> vector<34x32xf32>
    %247 = arith.truncf %246 : vector<34x32xf32> to vector<34x32xbf16>
    %c0_87 = arith.constant 0 : index
    %c0_88 = arith.constant 0 : index
    %c0_89 = arith.constant 0 : index
    %248 = vector.load %arg7[%c0_87, %c0_88, %c0_89] : memref<2x32x32xbf16, #tpu.memory_space<vmem>>, vector<1x32x32xbf16>
    %249 = vector.shape_cast %248 : vector<1x32x32xbf16> to vector<32x32xbf16>
    %cst_90 = arith.constant dense<0.000000e+00> : vector<34x32xf32>
    %250 = tpu.matmul %247, %249, %cst_90 {dimension_numbers = #tpu.dot_dimension_numbers<[1], [0], [0], [1], [0, 0, 1, 1], [], []>} : vector<34x32xbf16>, vector<32x32xbf16>, vector<34x32xf32> -> vector<34x32xf32>
    %c0_91 = arith.constant 0 : index
    %c4_92 = arith.constant 4 : index
    %c0_93 = arith.constant 0 : index
    %251 = vector.load %arg10[%c0_91, %c4_92, %c0_93] : memref<2x6x32xf32, #tpu.memory_space<vmem>>, vector<1x1x32xf32>
    %252 = vector.shape_cast %251 : vector<1x1x32xf32> to vector<1x32xf32>
    %253 = vector.broadcast %252 : vector<1x32xf32> to vector<34x32xf32>
    %254 = arith.addf %250, %253 : vector<34x32xf32>
    %255 = arith.addf %33, %254 : vector<34x32xf32>
    %c0_94 = arith.constant 0 : index
    %c2_95 = arith.constant 2 : index
    %c0_96 = arith.constant 0 : index
    %256 = vector.load %arg10[%c0_94, %c2_95, %c0_96] : memref<2x6x32xf32, #tpu.memory_space<vmem>>, vector<1x1x32xf32>
    %257 = vector.shape_cast %256 : vector<1x1x32xf32> to vector<1x32xf32>
    %c0_97 = arith.constant 0 : index
    %c3_98 = arith.constant 3 : index
    %c0_99 = arith.constant 0 : index
    %258 = vector.load %arg10[%c0_97, %c3_98, %c0_99] : memref<2x6x32xf32, #tpu.memory_space<vmem>>, vector<1x1x32xf32>
    %259 = vector.shape_cast %258 : vector<1x1x32xf32> to vector<1x32xf32>
    %cst_100 = arith.constant dense<0.000000e+00> : vector<34xf32>
    %260 = vector.multi_reduction <add>, %255, %cst_100 [1] : vector<34x32xf32> to vector<34xf32>
    %261 = vector.shape_cast %260 : vector<34xf32> to vector<34x1xf32>
    %cst_101 = arith.constant 3.200000e+01 : f32
    %262 = vector.broadcast %cst_101 : f32 to vector<34x1xf32>
    %263 = arith.divf %261, %262 : vector<34x1xf32>
    %264 = vector.broadcast %263 : vector<34x1xf32> to vector<34x32xf32>
    %265 = arith.subf %255, %264 : vector<34x32xf32>
    %266 = arith.mulf %265, %265 : vector<34x32xf32>
    %cst_102 = arith.constant dense<0.000000e+00> : vector<34xf32>
    %267 = vector.multi_reduction <add>, %266, %cst_102 [1] : vector<34x32xf32> to vector<34xf32>
    %268 = vector.shape_cast %267 : vector<34xf32> to vector<34x1xf32>
    %cst_103 = arith.constant 3.200000e+01 : f32
    %269 = vector.broadcast %cst_103 : f32 to vector<34x1xf32>
    %270 = arith.divf %268, %269 : vector<34x1xf32>
    %cst_104 = arith.constant 9.99999974E-6 : f32
    %271 = vector.broadcast %cst_104 : f32 to vector<34x1xf32>
    %272 = arith.addf %270, %271 : vector<34x1xf32>
    %273 = math.rsqrt %272 : vector<34x1xf32>
    %274 = vector.broadcast %273 : vector<34x1xf32> to vector<34x32xf32>
    %275 = arith.mulf %265, %274 : vector<34x32xf32>
    %276 = vector.broadcast %257 : vector<1x32xf32> to vector<34x32xf32>
    %277 = arith.mulf %275, %276 : vector<34x32xf32>
    %278 = vector.broadcast %259 : vector<1x32xf32> to vector<34x32xf32>
    %279 = arith.addf %277, %278 : vector<34x32xf32>
    %280 = arith.truncf %279 : vector<34x32xf32> to vector<34x32xbf16>
    %c0_105 = arith.constant 0 : index
    %c0_106 = arith.constant 0 : index
    %c0_107 = arith.constant 0 : index
    %281 = vector.load %arg8[%c0_105, %c0_106, %c0_107] : memref<2x32x128xbf16, #tpu.memory_space<vmem>>, vector<1x32x128xbf16>
    %282 = vector.shape_cast %281 : vector<1x32x128xbf16> to vector<32x128xbf16>
    %cst_108 = arith.constant dense<0.000000e+00> : vector<34x128xf32>
    %283 = tpu.matmul %280, %282, %cst_108 {dimension_numbers = #tpu.dot_dimension_numbers<[1], [0], [0], [1], [0, 0, 1, 1], [], []>} : vector<34x32xbf16>, vector<32x128xbf16>, vector<34x128xf32> -> vector<34x128xf32>
    %c0_109 = arith.constant 0 : index
    %c0_110 = arith.constant 0 : index
    %c0_111 = arith.constant 0 : index
    %284 = vector.load %arg11[%c0_109, %c0_110, %c0_111] : memref<2x1x128xf32, #tpu.memory_space<vmem>>, vector<1x1x128xf32>
    %285 = vector.shape_cast %284 : vector<1x1x128xf32> to vector<1x128xf32>
    %286 = vector.broadcast %285 : vector<1x128xf32> to vector<34x128xf32>
    %287 = arith.addf %283, %286 : vector<34x128xf32>
    %cst_112 = arith.constant 5.000000e-01 : f32
    %288 = vector.broadcast %cst_112 : f32 to vector<34x128xf32>
    %289 = arith.mulf %288, %287 : vector<34x128xf32>
    %cst_113 = arith.constant 4.471500e-02 : f32
    %290 = vector.broadcast %cst_113 : f32 to vector<34x128xf32>
    %291 = arith.mulf %290, %287 : vector<34x128xf32>
    %292 = arith.mulf %291, %287 : vector<34x128xf32>
    %293 = arith.mulf %292, %287 : vector<34x128xf32>
    %294 = arith.addf %287, %293 : vector<34x128xf32>
    %cst_114 = arith.constant 0.797884583 : f32
    %295 = vector.broadcast %cst_114 : f32 to vector<34x128xf32>
    %296 = arith.mulf %295, %294 : vector<34x128xf32>
    %297 = math.tanh %296 : vector<34x128xf32>
    %cst_115 = arith.constant 1.000000e+00 : f32
    %298 = vector.broadcast %cst_115 : f32 to vector<34x128xf32>
    %299 = arith.addf %298, %297 : vector<34x128xf32>
    %300 = arith.mulf %289, %299 : vector<34x128xf32>
    %301 = arith.truncf %300 : vector<34x128xf32> to vector<34x128xbf16>
    %c0_116 = arith.constant 0 : index
    %c0_117 = arith.constant 0 : index
    %c0_118 = arith.constant 0 : index
    %302 = vector.load %arg9[%c0_116, %c0_117, %c0_118] : memref<2x128x32xbf16, #tpu.memory_space<vmem>>, vector<1x128x32xbf16>
    %303 = vector.shape_cast %302 : vector<1x128x32xbf16> to vector<128x32xbf16>
    %cst_119 = arith.constant dense<0.000000e+00> : vector<34x32xf32>
    %304 = tpu.matmul %301, %303, %cst_119 {dimension_numbers = #tpu.dot_dimension_numbers<[1], [0], [0], [1], [0, 0, 1, 1], [], []>} : vector<34x128xbf16>, vector<128x32xbf16>, vector<34x32xf32> -> vector<34x32xf32>
    %c0_120 = arith.constant 0 : index
    %c5_121 = arith.constant 5 : index
    %c0_122 = arith.constant 0 : index
    %305 = vector.load %arg10[%c0_120, %c5_121, %c0_122] : memref<2x6x32xf32, #tpu.memory_space<vmem>>, vector<1x1x32xf32>
    %306 = vector.shape_cast %305 : vector<1x1x32xf32> to vector<1x32xf32>
    %307 = vector.broadcast %306 : vector<1x32xf32> to vector<34x32xf32>
    %308 = arith.addf %304, %307 : vector<34x32xf32>
    %309 = arith.addf %255, %308 : vector<34x32xf32>
    %c1_123 = arith.constant 1 : index
    %c0_124 = arith.constant 0 : index
    %c0_125 = arith.constant 0 : index
    %310 = vector.load %arg10[%c1_123, %c0_124, %c0_125] : memref<2x6x32xf32, #tpu.memory_space<vmem>>, vector<1x1x32xf32>
    %311 = vector.shape_cast %310 : vector<1x1x32xf32> to vector<1x32xf32>
    %c1_126 = arith.constant 1 : index
    %c1_127 = arith.constant 1 : index
    %c0_128 = arith.constant 0 : index
    %312 = vector.load %arg10[%c1_126, %c1_127, %c0_128] : memref<2x6x32xf32, #tpu.memory_space<vmem>>, vector<1x1x32xf32>
    %313 = vector.shape_cast %312 : vector<1x1x32xf32> to vector<1x32xf32>
    %cst_129 = arith.constant dense<0.000000e+00> : vector<34xf32>
    %314 = vector.multi_reduction <add>, %309, %cst_129 [1] : vector<34x32xf32> to vector<34xf32>
    %315 = vector.shape_cast %314 : vector<34xf32> to vector<34x1xf32>
    %cst_130 = arith.constant 3.200000e+01 : f32
    %316 = vector.broadcast %cst_130 : f32 to vector<34x1xf32>
    %317 = arith.divf %315, %316 : vector<34x1xf32>
    %318 = vector.broadcast %317 : vector<34x1xf32> to vector<34x32xf32>
    %319 = arith.subf %309, %318 : vector<34x32xf32>
    %320 = arith.mulf %319, %319 : vector<34x32xf32>
    %cst_131 = arith.constant dense<0.000000e+00> : vector<34xf32>
    %321 = vector.multi_reduction <add>, %320, %cst_131 [1] : vector<34x32xf32> to vector<34xf32>
    %322 = vector.shape_cast %321 : vector<34xf32> to vector<34x1xf32>
    %cst_132 = arith.constant 3.200000e+01 : f32
    %323 = vector.broadcast %cst_132 : f32 to vector<34x1xf32>
    %324 = arith.divf %322, %323 : vector<34x1xf32>
    %cst_133 = arith.constant 9.99999974E-6 : f32
    %325 = vector.broadcast %cst_133 : f32 to vector<34x1xf32>
    %326 = arith.addf %324, %325 : vector<34x1xf32>
    %327 = math.rsqrt %326 : vector<34x1xf32>
    %328 = vector.broadcast %327 : vector<34x1xf32> to vector<34x32xf32>
    %329 = arith.mulf %319, %328 : vector<34x32xf32>
    %330 = vector.broadcast %311 : vector<1x32xf32> to vector<34x32xf32>
    %331 = arith.mulf %329, %330 : vector<34x32xf32>
    %332 = vector.broadcast %313 : vector<1x32xf32> to vector<34x32xf32>
    %333 = arith.addf %331, %332 : vector<34x32xf32>
    %334 = vector.extract_strided_slice %333 {offsets = [0, 0], sizes = [32, 32], strides = [1, 1]} : vector<34x32xf32> to vector<32x32xf32>
    %335 = vector.extract_strided_slice %333 {offsets = [32, 0], sizes = [2, 32], strides = [1, 1]} : vector<34x32xf32> to vector<2x32xf32>
    %336 = tpu.concatenate %334, %334, %334 in 1 : vector<32x32xf32>, vector<32x32xf32>, vector<32x32xf32> -> vector<32x96xf32>
    %c1_134 = arith.constant 1 : index
    %c4_135 = arith.constant 4 : index
    %c0_136 = arith.constant 0 : index
    %337 = vector.load %arg5[%c1_134, %c4_135, %c0_136] : memref<2x11x96xf32, #tpu.memory_space<vmem>>, vector<1x1x96xf32>
    %338 = vector.shape_cast %337 : vector<1x1x96xf32> to vector<1x96xf32>
    %339 = vector.broadcast %338 : vector<1x96xf32> to vector<32x96xf32>
    %340 = arith.mulf %336, %339 : vector<32x96xf32>
    %c5_i32_137 = arith.constant 5 : i32
    %341 = tpu.dynamic_rotate %336 by %c5_i32_137 dim 0 : vector<32x96xf32>, i32 -> vector<32x96xf32>
    %c0_138 = arith.constant 0 : index
    %c0_139 = arith.constant 0 : index
    %342 = vector.load %arg2[%c0_138, %c0_139] : memref<32x9xf32, #tpu.memory_space<vmem>>, vector<32x1xf32>
    %343 = vector.broadcast %342 : vector<32x1xf32> to vector<32x96xf32>
    %344 = arith.mulf %341, %343 : vector<32x96xf32>
    %c1_140 = arith.constant 1 : index
    %c0_141 = arith.constant 0 : index
    %c0_142 = arith.constant 0 : index
    %345 = vector.load %arg5[%c1_140, %c0_141, %c0_142] : memref<2x11x96xf32, #tpu.memory_space<vmem>>, vector<1x1x96xf32>
    %346 = vector.shape_cast %345 : vector<1x1x96xf32> to vector<1x96xf32>
    %347 = vector.broadcast %346 : vector<1x96xf32> to vector<32x96xf32>
    %348 = arith.mulf %344, %347 : vector<32x96xf32>
    %349 = arith.addf %340, %348 : vector<32x96xf32>
    %c4_i32_143 = arith.constant 4 : i32
    %350 = tpu.dynamic_rotate %336 by %c4_i32_143 dim 0 : vector<32x96xf32>, i32 -> vector<32x96xf32>
    %c0_144 = arith.constant 0 : index
    %c1_145 = arith.constant 1 : index
    %351 = vector.load %arg2[%c0_144, %c1_145] : memref<32x9xf32, #tpu.memory_space<vmem>>, vector<32x1xf32>
    %352 = vector.broadcast %351 : vector<32x1xf32> to vector<32x96xf32>
    %353 = arith.mulf %350, %352 : vector<32x96xf32>
    %c1_146 = arith.constant 1 : index
    %c1_147 = arith.constant 1 : index
    %c0_148 = arith.constant 0 : index
    %354 = vector.load %arg5[%c1_146, %c1_147, %c0_148] : memref<2x11x96xf32, #tpu.memory_space<vmem>>, vector<1x1x96xf32>
    %355 = vector.shape_cast %354 : vector<1x1x96xf32> to vector<1x96xf32>
    %356 = vector.broadcast %355 : vector<1x96xf32> to vector<32x96xf32>
    %357 = arith.mulf %353, %356 : vector<32x96xf32>
    %358 = arith.addf %349, %357 : vector<32x96xf32>
    %c3_i32_149 = arith.constant 3 : i32
    %359 = tpu.dynamic_rotate %336 by %c3_i32_149 dim 0 : vector<32x96xf32>, i32 -> vector<32x96xf32>
    %c0_150 = arith.constant 0 : index
    %c2_151 = arith.constant 2 : index
    %360 = vector.load %arg2[%c0_150, %c2_151] : memref<32x9xf32, #tpu.memory_space<vmem>>, vector<32x1xf32>
    %361 = vector.broadcast %360 : vector<32x1xf32> to vector<32x96xf32>
    %362 = arith.mulf %359, %361 : vector<32x96xf32>
    %c1_152 = arith.constant 1 : index
    %c2_153 = arith.constant 2 : index
    %c0_154 = arith.constant 0 : index
    %363 = vector.load %arg5[%c1_152, %c2_153, %c0_154] : memref<2x11x96xf32, #tpu.memory_space<vmem>>, vector<1x1x96xf32>
    %364 = vector.shape_cast %363 : vector<1x1x96xf32> to vector<1x96xf32>
    %365 = vector.broadcast %364 : vector<1x96xf32> to vector<32x96xf32>
    %366 = arith.mulf %362, %365 : vector<32x96xf32>
    %367 = arith.addf %358, %366 : vector<32x96xf32>
    %c1_i32_155 = arith.constant 1 : i32
    %368 = tpu.dynamic_rotate %336 by %c1_i32_155 dim 0 : vector<32x96xf32>, i32 -> vector<32x96xf32>
    %c0_156 = arith.constant 0 : index
    %c3_157 = arith.constant 3 : index
    %369 = vector.load %arg2[%c0_156, %c3_157] : memref<32x9xf32, #tpu.memory_space<vmem>>, vector<32x1xf32>
    %370 = vector.broadcast %369 : vector<32x1xf32> to vector<32x96xf32>
    %371 = arith.mulf %368, %370 : vector<32x96xf32>
    %c1_158 = arith.constant 1 : index
    %c3_159 = arith.constant 3 : index
    %c0_160 = arith.constant 0 : index
    %372 = vector.load %arg5[%c1_158, %c3_159, %c0_160] : memref<2x11x96xf32, #tpu.memory_space<vmem>>, vector<1x1x96xf32>
    %373 = vector.shape_cast %372 : vector<1x1x96xf32> to vector<1x96xf32>
    %374 = vector.broadcast %373 : vector<1x96xf32> to vector<32x96xf32>
    %375 = arith.mulf %371, %374 : vector<32x96xf32>
    %376 = arith.addf %367, %375 : vector<32x96xf32>
    %c31_i32_161 = arith.constant 31 : i32
    %377 = tpu.dynamic_rotate %336 by %c31_i32_161 dim 0 : vector<32x96xf32>, i32 -> vector<32x96xf32>
    %c0_162 = arith.constant 0 : index
    %c5_163 = arith.constant 5 : index
    %378 = vector.load %arg2[%c0_162, %c5_163] : memref<32x9xf32, #tpu.memory_space<vmem>>, vector<32x1xf32>
    %379 = vector.broadcast %378 : vector<32x1xf32> to vector<32x96xf32>
    %380 = arith.mulf %377, %379 : vector<32x96xf32>
    %c1_164 = arith.constant 1 : index
    %c5_165 = arith.constant 5 : index
    %c0_166 = arith.constant 0 : index
    %381 = vector.load %arg5[%c1_164, %c5_165, %c0_166] : memref<2x11x96xf32, #tpu.memory_space<vmem>>, vector<1x1x96xf32>
    %382 = vector.shape_cast %381 : vector<1x1x96xf32> to vector<1x96xf32>
    %383 = vector.broadcast %382 : vector<1x96xf32> to vector<32x96xf32>
    %384 = arith.mulf %380, %383 : vector<32x96xf32>
    %385 = arith.addf %376, %384 : vector<32x96xf32>
    %c29_i32_167 = arith.constant 29 : i32
    %386 = tpu.dynamic_rotate %336 by %c29_i32_167 dim 0 : vector<32x96xf32>, i32 -> vector<32x96xf32>
    %c0_168 = arith.constant 0 : index
    %c6_169 = arith.constant 6 : index
    %387 = vector.load %arg2[%c0_168, %c6_169] : memref<32x9xf32, #tpu.memory_space<vmem>>, vector<32x1xf32>
    %388 = vector.broadcast %387 : vector<32x1xf32> to vector<32x96xf32>
    %389 = arith.mulf %386, %388 : vector<32x96xf32>
    %c1_170 = arith.constant 1 : index
    %c6_171 = arith.constant 6 : index
    %c0_172 = arith.constant 0 : index
    %390 = vector.load %arg5[%c1_170, %c6_171, %c0_172] : memref<2x11x96xf32, #tpu.memory_space<vmem>>, vector<1x1x96xf32>
    %391 = vector.shape_cast %390 : vector<1x1x96xf32> to vector<1x96xf32>
    %392 = vector.broadcast %391 : vector<1x96xf32> to vector<32x96xf32>
    %393 = arith.mulf %389, %392 : vector<32x96xf32>
    %394 = arith.addf %385, %393 : vector<32x96xf32>
    %c28_i32_173 = arith.constant 28 : i32
    %395 = tpu.dynamic_rotate %336 by %c28_i32_173 dim 0 : vector<32x96xf32>, i32 -> vector<32x96xf32>
    %c0_174 = arith.constant 0 : index
    %c7_175 = arith.constant 7 : index
    %396 = vector.load %arg2[%c0_174, %c7_175] : memref<32x9xf32, #tpu.memory_space<vmem>>, vector<32x1xf32>
    %397 = vector.broadcast %396 : vector<32x1xf32> to vector<32x96xf32>
    %398 = arith.mulf %395, %397 : vector<32x96xf32>
    %c1_176 = arith.constant 1 : index
    %c7_177 = arith.constant 7 : index
    %c0_178 = arith.constant 0 : index
    %399 = vector.load %arg5[%c1_176, %c7_177, %c0_178] : memref<2x11x96xf32, #tpu.memory_space<vmem>>, vector<1x1x96xf32>
    %400 = vector.shape_cast %399 : vector<1x1x96xf32> to vector<1x96xf32>
    %401 = vector.broadcast %400 : vector<1x96xf32> to vector<32x96xf32>
    %402 = arith.mulf %398, %401 : vector<32x96xf32>
    %403 = arith.addf %394, %402 : vector<32x96xf32>
    %c27_i32_179 = arith.constant 27 : i32
    %404 = tpu.dynamic_rotate %336 by %c27_i32_179 dim 0 : vector<32x96xf32>, i32 -> vector<32x96xf32>
    %c0_180 = arith.constant 0 : index
    %c8_181 = arith.constant 8 : index
    %405 = vector.load %arg2[%c0_180, %c8_181] : memref<32x9xf32, #tpu.memory_space<vmem>>, vector<32x1xf32>
    %406 = vector.broadcast %405 : vector<32x1xf32> to vector<32x96xf32>
    %407 = arith.mulf %404, %406 : vector<32x96xf32>
    %c1_182 = arith.constant 1 : index
    %c8_183 = arith.constant 8 : index
    %c0_184 = arith.constant 0 : index
    %408 = vector.load %arg5[%c1_182, %c8_183, %c0_184] : memref<2x11x96xf32, #tpu.memory_space<vmem>>, vector<1x1x96xf32>
    %409 = vector.shape_cast %408 : vector<1x1x96xf32> to vector<1x96xf32>
    %410 = vector.broadcast %409 : vector<1x96xf32> to vector<32x96xf32>
    %411 = arith.mulf %407, %410 : vector<32x96xf32>
    %412 = arith.addf %403, %411 : vector<32x96xf32>
    %c1_185 = arith.constant 1 : index
    %c9_186 = arith.constant 9 : index
    %c0_187 = arith.constant 0 : index
    %413 = vector.load %arg5[%c1_185, %c9_186, %c0_187] : memref<2x11x96xf32, #tpu.memory_space<vmem>>, vector<1x1x96xf32>
    %414 = vector.shape_cast %413 : vector<1x1x96xf32> to vector<1x96xf32>
    %415 = vector.broadcast %414 : vector<1x96xf32> to vector<32x96xf32>
    %416 = arith.mulf %412, %415 : vector<32x96xf32>
    %c1_188 = arith.constant 1 : index
    %c10_189 = arith.constant 10 : index
    %c0_190 = arith.constant 0 : index
    %417 = vector.load %arg5[%c1_188, %c10_189, %c0_190] : memref<2x11x96xf32, #tpu.memory_space<vmem>>, vector<1x1x96xf32>
    %418 = vector.shape_cast %417 : vector<1x1x96xf32> to vector<1x96xf32>
    %419 = vector.broadcast %418 : vector<1x96xf32> to vector<32x96xf32>
    %420 = arith.addf %416, %419 : vector<32x96xf32>
    %421 = tpu.concatenate %335, %335, %335 in 1 : vector<2x32xf32>, vector<2x32xf32>, vector<2x32xf32> -> vector<2x96xf32>
    %422 = tpu.concatenate %420, %421 in 0 : vector<32x96xf32>, vector<2x96xf32> -> vector<34x96xf32>
    %423 = arith.truncf %422 : vector<34x96xf32> to vector<34x96xbf16>
    %c1_191 = arith.constant 1 : index
    %c0_192 = arith.constant 0 : index
    %c0_193 = arith.constant 0 : index
    %424 = vector.load %arg6[%c1_191, %c0_192, %c0_193] : memref<2x96x96xbf16, #tpu.memory_space<vmem>>, vector<1x96x96xbf16>
    %425 = vector.shape_cast %424 : vector<1x96x96xbf16> to vector<96x96xbf16>
    %cst_194 = arith.constant dense<0.000000e+00> : vector<34x96xf32>
    %426 = tpu.matmul %423, %425, %cst_194 {dimension_numbers = #tpu.dot_dimension_numbers<[1], [0], [0], [1], [0, 0, 1, 1], [], []>} : vector<34x96xbf16>, vector<96x96xbf16>, vector<34x96xf32> -> vector<34x96xf32>
    %427 = vector.extract_strided_slice %426 {offsets = [0, 0], sizes = [34, 32], strides = [1, 1]} : vector<34x96xf32> to vector<34x32xf32>
    %428 = vector.extract_strided_slice %427 {offsets = [32, 0], sizes = [2, 32], strides = [1, 1]} : vector<34x32xf32> to vector<2x32xf32>
    %429 = vector.shape_cast %428 : vector<2x32xf32> to vector<2x1x32xf32>
    %430 = vector.extract_strided_slice %427 {offsets = [0, 0], sizes = [32, 32], strides = [1, 1]} : vector<34x32xf32> to vector<32x32xf32>
    %431 = vector.shape_cast %430 : vector<32x32xf32> to vector<2x16x32xf32>
    %432 = tpu.concatenate %429, %431 in 1 : vector<2x1x32xf32>, vector<2x16x32xf32> -> vector<2x17x32xf32>
    %433 = vector.extract_strided_slice %426 {offsets = [0, 32], sizes = [34, 32], strides = [1, 1]} : vector<34x96xf32> to vector<34x32xf32>
    %434 = vector.extract_strided_slice %433 {offsets = [32, 0], sizes = [2, 32], strides = [1, 1]} : vector<34x32xf32> to vector<2x32xf32>
    %435 = vector.shape_cast %434 : vector<2x32xf32> to vector<2x1x32xf32>
    %436 = vector.extract_strided_slice %433 {offsets = [0, 0], sizes = [32, 32], strides = [1, 1]} : vector<34x32xf32> to vector<32x32xf32>
    %437 = vector.shape_cast %436 : vector<32x32xf32> to vector<2x16x32xf32>
    %438 = tpu.concatenate %435, %437 in 1 : vector<2x1x32xf32>, vector<2x16x32xf32> -> vector<2x17x32xf32>
    %439 = vector.extract_strided_slice %426 {offsets = [0, 64], sizes = [34, 32], strides = [1, 1]} : vector<34x96xf32> to vector<34x32xf32>
    %440 = vector.extract_strided_slice %439 {offsets = [32, 0], sizes = [2, 32], strides = [1, 1]} : vector<34x32xf32> to vector<2x32xf32>
    %441 = vector.shape_cast %440 : vector<2x32xf32> to vector<2x1x32xf32>
    %442 = vector.extract_strided_slice %439 {offsets = [0, 0], sizes = [32, 32], strides = [1, 1]} : vector<34x32xf32> to vector<32x32xf32>
    %443 = vector.shape_cast %442 : vector<32x32xf32> to vector<2x16x32xf32>
    %444 = tpu.concatenate %441, %443 in 1 : vector<2x1x32xf32>, vector<2x16x32xf32> -> vector<2x17x32xf32>
    %445 = vector.extract_strided_slice %432 {offsets = [0, 0, 0], sizes = [2, 17, 8], strides = [1, 1, 1]} : vector<2x17x32xf32> to vector<2x17x8xf32>
    %446 = arith.truncf %445 : vector<2x17x8xf32> to vector<2x17x8xbf16>
    %447 = vector.extract_strided_slice %438 {offsets = [0, 0, 0], sizes = [2, 17, 8], strides = [1, 1, 1]} : vector<2x17x32xf32> to vector<2x17x8xf32>
    %448 = arith.truncf %447 : vector<2x17x8xf32> to vector<2x17x8xbf16>
    %449 = vector.extract_strided_slice %444 {offsets = [0, 0, 0], sizes = [2, 17, 8], strides = [1, 1, 1]} : vector<2x17x32xf32> to vector<2x17x8xf32>
    %450 = arith.truncf %449 : vector<2x17x8xf32> to vector<2x17x8xbf16>
    "tpu.trace_start"() <{level = 10 : i32, message = "bqd,bkd->bqk"}> : () -> ()
    %cst_195 = arith.constant dense<0.000000e+00> : vector<2x17x17xf32>
    %451 = tpu.matmul %446, %448, %cst_195 {dimension_numbers = #tpu.dot_dimension_numbers<[2], [2], [1], [1], [0, 0, 0, 1, 1, 1], [0], [0]>} : vector<2x17x8xbf16>, vector<2x17x8xbf16>, vector<2x17x17xf32> -> vector<2x17x17xf32>
    "tpu.trace_stop"() : () -> ()
    %cst_196 = arith.constant dense<0xFF800000> : vector<2x17xf32>
    %452 = vector.multi_reduction <maximumf>, %451, %cst_196 [2] : vector<2x17x17xf32> to vector<2x17xf32>
    %453 = vector.shape_cast %452 : vector<2x17xf32> to vector<2x17x1xf32>
    %454 = vector.broadcast %453 : vector<2x17x1xf32> to vector<2x17x17xf32>
    %455 = arith.subf %451, %454 : vector<2x17x17xf32>
    %456 = math.exp %455 : vector<2x17x17xf32>
    %cst_197 = arith.constant dense<0.000000e+00> : vector<2x17xf32>
    %457 = vector.multi_reduction <add>, %456, %cst_197 [2] : vector<2x17x17xf32> to vector<2x17xf32>
    %458 = vector.shape_cast %457 : vector<2x17xf32> to vector<2x17x1xf32>
    %459 = vector.broadcast %458 : vector<2x17x1xf32> to vector<2x17x17xf32>
    %460 = arith.divf %456, %459 : vector<2x17x17xf32>
    %461 = arith.truncf %460 : vector<2x17x17xf32> to vector<2x17x17xbf16>
    "tpu.trace_start"() <{level = 10 : i32, message = "bqk,bkd->bqd"}> : () -> ()
    %cst_198 = arith.constant dense<0.000000e+00> : vector<2x17x8xf32>
    %462 = tpu.matmul %461, %450, %cst_198 {dimension_numbers = #tpu.dot_dimension_numbers<[2], [1], [1], [2], [0, 0, 0, 1, 1, 2], [0], [0]>} : vector<2x17x17xbf16>, vector<2x17x8xbf16>, vector<2x17x8xf32> -> vector<2x17x8xf32>
    "tpu.trace_stop"() : () -> ()
    %463 = vector.extract_strided_slice %432 {offsets = [0, 0, 8], sizes = [2, 17, 8], strides = [1, 1, 1]} : vector<2x17x32xf32> to vector<2x17x8xf32>
    %464 = arith.truncf %463 : vector<2x17x8xf32> to vector<2x17x8xbf16>
    %465 = vector.extract_strided_slice %438 {offsets = [0, 0, 8], sizes = [2, 17, 8], strides = [1, 1, 1]} : vector<2x17x32xf32> to vector<2x17x8xf32>
    %466 = arith.truncf %465 : vector<2x17x8xf32> to vector<2x17x8xbf16>
    %467 = vector.extract_strided_slice %444 {offsets = [0, 0, 8], sizes = [2, 17, 8], strides = [1, 1, 1]} : vector<2x17x32xf32> to vector<2x17x8xf32>
    %468 = arith.truncf %467 : vector<2x17x8xf32> to vector<2x17x8xbf16>
    "tpu.trace_start"() <{level = 10 : i32, message = "bqd,bkd->bqk"}> : () -> ()
    %cst_199 = arith.constant dense<0.000000e+00> : vector<2x17x17xf32>
    %469 = tpu.matmul %464, %466, %cst_199 {dimension_numbers = #tpu.dot_dimension_numbers<[2], [2], [1], [1], [0, 0, 0, 1, 1, 1], [0], [0]>} : vector<2x17x8xbf16>, vector<2x17x8xbf16>, vector<2x17x17xf32> -> vector<2x17x17xf32>
    "tpu.trace_stop"() : () -> ()
    %cst_200 = arith.constant dense<0xFF800000> : vector<2x17xf32>
    %470 = vector.multi_reduction <maximumf>, %469, %cst_200 [2] : vector<2x17x17xf32> to vector<2x17xf32>
    %471 = vector.shape_cast %470 : vector<2x17xf32> to vector<2x17x1xf32>
    %472 = vector.broadcast %471 : vector<2x17x1xf32> to vector<2x17x17xf32>
    %473 = arith.subf %469, %472 : vector<2x17x17xf32>
    %474 = math.exp %473 : vector<2x17x17xf32>
    %cst_201 = arith.constant dense<0.000000e+00> : vector<2x17xf32>
    %475 = vector.multi_reduction <add>, %474, %cst_201 [2] : vector<2x17x17xf32> to vector<2x17xf32>
    %476 = vector.shape_cast %475 : vector<2x17xf32> to vector<2x17x1xf32>
    %477 = vector.broadcast %476 : vector<2x17x1xf32> to vector<2x17x17xf32>
    %478 = arith.divf %474, %477 : vector<2x17x17xf32>
    %479 = arith.truncf %478 : vector<2x17x17xf32> to vector<2x17x17xbf16>
    "tpu.trace_start"() <{level = 10 : i32, message = "bqk,bkd->bqd"}> : () -> ()
    %cst_202 = arith.constant dense<0.000000e+00> : vector<2x17x8xf32>
    %480 = tpu.matmul %479, %468, %cst_202 {dimension_numbers = #tpu.dot_dimension_numbers<[2], [1], [1], [2], [0, 0, 0, 1, 1, 2], [0], [0]>} : vector<2x17x17xbf16>, vector<2x17x8xbf16>, vector<2x17x8xf32> -> vector<2x17x8xf32>
    "tpu.trace_stop"() : () -> ()
    %481 = vector.extract_strided_slice %432 {offsets = [0, 0, 16], sizes = [2, 17, 8], strides = [1, 1, 1]} : vector<2x17x32xf32> to vector<2x17x8xf32>
    %482 = arith.truncf %481 : vector<2x17x8xf32> to vector<2x17x8xbf16>
    %483 = vector.extract_strided_slice %438 {offsets = [0, 0, 16], sizes = [2, 17, 8], strides = [1, 1, 1]} : vector<2x17x32xf32> to vector<2x17x8xf32>
    %484 = arith.truncf %483 : vector<2x17x8xf32> to vector<2x17x8xbf16>
    %485 = vector.extract_strided_slice %444 {offsets = [0, 0, 16], sizes = [2, 17, 8], strides = [1, 1, 1]} : vector<2x17x32xf32> to vector<2x17x8xf32>
    %486 = arith.truncf %485 : vector<2x17x8xf32> to vector<2x17x8xbf16>
    "tpu.trace_start"() <{level = 10 : i32, message = "bqd,bkd->bqk"}> : () -> ()
    %cst_203 = arith.constant dense<0.000000e+00> : vector<2x17x17xf32>
    %487 = tpu.matmul %482, %484, %cst_203 {dimension_numbers = #tpu.dot_dimension_numbers<[2], [2], [1], [1], [0, 0, 0, 1, 1, 1], [0], [0]>} : vector<2x17x8xbf16>, vector<2x17x8xbf16>, vector<2x17x17xf32> -> vector<2x17x17xf32>
    "tpu.trace_stop"() : () -> ()
    %cst_204 = arith.constant dense<0xFF800000> : vector<2x17xf32>
    %488 = vector.multi_reduction <maximumf>, %487, %cst_204 [2] : vector<2x17x17xf32> to vector<2x17xf32>
    %489 = vector.shape_cast %488 : vector<2x17xf32> to vector<2x17x1xf32>
    %490 = vector.broadcast %489 : vector<2x17x1xf32> to vector<2x17x17xf32>
    %491 = arith.subf %487, %490 : vector<2x17x17xf32>
    %492 = math.exp %491 : vector<2x17x17xf32>
    %cst_205 = arith.constant dense<0.000000e+00> : vector<2x17xf32>
    %493 = vector.multi_reduction <add>, %492, %cst_205 [2] : vector<2x17x17xf32> to vector<2x17xf32>
    %494 = vector.shape_cast %493 : vector<2x17xf32> to vector<2x17x1xf32>
    %495 = vector.broadcast %494 : vector<2x17x1xf32> to vector<2x17x17xf32>
    %496 = arith.divf %492, %495 : vector<2x17x17xf32>
    %497 = arith.truncf %496 : vector<2x17x17xf32> to vector<2x17x17xbf16>
    "tpu.trace_start"() <{level = 10 : i32, message = "bqk,bkd->bqd"}> : () -> ()
    %cst_206 = arith.constant dense<0.000000e+00> : vector<2x17x8xf32>
    %498 = tpu.matmul %497, %486, %cst_206 {dimension_numbers = #tpu.dot_dimension_numbers<[2], [1], [1], [2], [0, 0, 0, 1, 1, 2], [0], [0]>} : vector<2x17x17xbf16>, vector<2x17x8xbf16>, vector<2x17x8xf32> -> vector<2x17x8xf32>
    "tpu.trace_stop"() : () -> ()
    %499 = vector.extract_strided_slice %432 {offsets = [0, 0, 24], sizes = [2, 17, 8], strides = [1, 1, 1]} : vector<2x17x32xf32> to vector<2x17x8xf32>
    %500 = arith.truncf %499 : vector<2x17x8xf32> to vector<2x17x8xbf16>
    %501 = vector.extract_strided_slice %438 {offsets = [0, 0, 24], sizes = [2, 17, 8], strides = [1, 1, 1]} : vector<2x17x32xf32> to vector<2x17x8xf32>
    %502 = arith.truncf %501 : vector<2x17x8xf32> to vector<2x17x8xbf16>
    %503 = vector.extract_strided_slice %444 {offsets = [0, 0, 24], sizes = [2, 17, 8], strides = [1, 1, 1]} : vector<2x17x32xf32> to vector<2x17x8xf32>
    %504 = arith.truncf %503 : vector<2x17x8xf32> to vector<2x17x8xbf16>
    "tpu.trace_start"() <{level = 10 : i32, message = "bqd,bkd->bqk"}> : () -> ()
    %cst_207 = arith.constant dense<0.000000e+00> : vector<2x17x17xf32>
    %505 = tpu.matmul %500, %502, %cst_207 {dimension_numbers = #tpu.dot_dimension_numbers<[2], [2], [1], [1], [0, 0, 0, 1, 1, 1], [0], [0]>} : vector<2x17x8xbf16>, vector<2x17x8xbf16>, vector<2x17x17xf32> -> vector<2x17x17xf32>
    "tpu.trace_stop"() : () -> ()
    %cst_208 = arith.constant dense<0xFF800000> : vector<2x17xf32>
    %506 = vector.multi_reduction <maximumf>, %505, %cst_208 [2] : vector<2x17x17xf32> to vector<2x17xf32>
    %507 = vector.shape_cast %506 : vector<2x17xf32> to vector<2x17x1xf32>
    %508 = vector.broadcast %507 : vector<2x17x1xf32> to vector<2x17x17xf32>
    %509 = arith.subf %505, %508 : vector<2x17x17xf32>
    %510 = math.exp %509 : vector<2x17x17xf32>
    %cst_209 = arith.constant dense<0.000000e+00> : vector<2x17xf32>
    %511 = vector.multi_reduction <add>, %510, %cst_209 [2] : vector<2x17x17xf32> to vector<2x17xf32>
    %512 = vector.shape_cast %511 : vector<2x17xf32> to vector<2x17x1xf32>
    %513 = vector.broadcast %512 : vector<2x17x1xf32> to vector<2x17x17xf32>
    %514 = arith.divf %510, %513 : vector<2x17x17xf32>
    %515 = arith.truncf %514 : vector<2x17x17xf32> to vector<2x17x17xbf16>
    "tpu.trace_start"() <{level = 10 : i32, message = "bqk,bkd->bqd"}> : () -> ()
    %cst_210 = arith.constant dense<0.000000e+00> : vector<2x17x8xf32>
    %516 = tpu.matmul %515, %504, %cst_210 {dimension_numbers = #tpu.dot_dimension_numbers<[2], [1], [1], [2], [0, 0, 0, 1, 1, 2], [0], [0]>} : vector<2x17x17xbf16>, vector<2x17x8xbf16>, vector<2x17x8xf32> -> vector<2x17x8xf32>
    "tpu.trace_stop"() : () -> ()
    %517 = tpu.concatenate %462, %480, %498, %516 in 2 : vector<2x17x8xf32>, vector<2x17x8xf32>, vector<2x17x8xf32>, vector<2x17x8xf32> -> vector<2x17x32xf32>
    %518 = vector.extract_strided_slice %517 {offsets = [0, 1, 0], sizes = [2, 16, 32], strides = [1, 1, 1]} : vector<2x17x32xf32> to vector<2x16x32xf32>
    %519 = vector.shape_cast %518 : vector<2x16x32xf32> to vector<32x32xf32>
    %520 = vector.extract_strided_slice %517 {offsets = [0, 0, 0], sizes = [2, 1, 32], strides = [1, 1, 1]} : vector<2x17x32xf32> to vector<2x1x32xf32>
    %521 = vector.shape_cast %520 : vector<2x1x32xf32> to vector<2x32xf32>
    %522 = tpu.concatenate %519, %521 in 0 : vector<32x32xf32>, vector<2x32xf32> -> vector<34x32xf32>
    %523 = arith.truncf %522 : vector<34x32xf32> to vector<34x32xbf16>
    %c1_211 = arith.constant 1 : index
    %c0_212 = arith.constant 0 : index
    %c0_213 = arith.constant 0 : index
    %524 = vector.load %arg7[%c1_211, %c0_212, %c0_213] : memref<2x32x32xbf16, #tpu.memory_space<vmem>>, vector<1x32x32xbf16>
    %525 = vector.shape_cast %524 : vector<1x32x32xbf16> to vector<32x32xbf16>
    %cst_214 = arith.constant dense<0.000000e+00> : vector<34x32xf32>
    %526 = tpu.matmul %523, %525, %cst_214 {dimension_numbers = #tpu.dot_dimension_numbers<[1], [0], [0], [1], [0, 0, 1, 1], [], []>} : vector<34x32xbf16>, vector<32x32xbf16>, vector<34x32xf32> -> vector<34x32xf32>
    %c1_215 = arith.constant 1 : index
    %c4_216 = arith.constant 4 : index
    %c0_217 = arith.constant 0 : index
    %527 = vector.load %arg10[%c1_215, %c4_216, %c0_217] : memref<2x6x32xf32, #tpu.memory_space<vmem>>, vector<1x1x32xf32>
    %528 = vector.shape_cast %527 : vector<1x1x32xf32> to vector<1x32xf32>
    %529 = vector.broadcast %528 : vector<1x32xf32> to vector<34x32xf32>
    %530 = arith.addf %526, %529 : vector<34x32xf32>
    %531 = arith.addf %309, %530 : vector<34x32xf32>
    %c1_218 = arith.constant 1 : index
    %c2_219 = arith.constant 2 : index
    %c0_220 = arith.constant 0 : index
    %532 = vector.load %arg10[%c1_218, %c2_219, %c0_220] : memref<2x6x32xf32, #tpu.memory_space<vmem>>, vector<1x1x32xf32>
    %533 = vector.shape_cast %532 : vector<1x1x32xf32> to vector<1x32xf32>
    %c1_221 = arith.constant 1 : index
    %c3_222 = arith.constant 3 : index
    %c0_223 = arith.constant 0 : index
    %534 = vector.load %arg10[%c1_221, %c3_222, %c0_223] : memref<2x6x32xf32, #tpu.memory_space<vmem>>, vector<1x1x32xf32>
    %535 = vector.shape_cast %534 : vector<1x1x32xf32> to vector<1x32xf32>
    %cst_224 = arith.constant dense<0.000000e+00> : vector<34xf32>
    %536 = vector.multi_reduction <add>, %531, %cst_224 [1] : vector<34x32xf32> to vector<34xf32>
    %537 = vector.shape_cast %536 : vector<34xf32> to vector<34x1xf32>
    %cst_225 = arith.constant 3.200000e+01 : f32
    %538 = vector.broadcast %cst_225 : f32 to vector<34x1xf32>
    %539 = arith.divf %537, %538 : vector<34x1xf32>
    %540 = vector.broadcast %539 : vector<34x1xf32> to vector<34x32xf32>
    %541 = arith.subf %531, %540 : vector<34x32xf32>
    %542 = arith.mulf %541, %541 : vector<34x32xf32>
    %cst_226 = arith.constant dense<0.000000e+00> : vector<34xf32>
    %543 = vector.multi_reduction <add>, %542, %cst_226 [1] : vector<34x32xf32> to vector<34xf32>
    %544 = vector.shape_cast %543 : vector<34xf32> to vector<34x1xf32>
    %cst_227 = arith.constant 3.200000e+01 : f32
    %545 = vector.broadcast %cst_227 : f32 to vector<34x1xf32>
    %546 = arith.divf %544, %545 : vector<34x1xf32>
    %cst_228 = arith.constant 9.99999974E-6 : f32
    %547 = vector.broadcast %cst_228 : f32 to vector<34x1xf32>
    %548 = arith.addf %546, %547 : vector<34x1xf32>
    %549 = math.rsqrt %548 : vector<34x1xf32>
    %550 = vector.broadcast %549 : vector<34x1xf32> to vector<34x32xf32>
    %551 = arith.mulf %541, %550 : vector<34x32xf32>
    %552 = vector.broadcast %533 : vector<1x32xf32> to vector<34x32xf32>
    %553 = arith.mulf %551, %552 : vector<34x32xf32>
    %554 = vector.broadcast %535 : vector<1x32xf32> to vector<34x32xf32>
    %555 = arith.addf %553, %554 : vector<34x32xf32>
    %556 = arith.truncf %555 : vector<34x32xf32> to vector<34x32xbf16>
    %c1_229 = arith.constant 1 : index
    %c0_230 = arith.constant 0 : index
    %c0_231 = arith.constant 0 : index
    %557 = vector.load %arg8[%c1_229, %c0_230, %c0_231] : memref<2x32x128xbf16, #tpu.memory_space<vmem>>, vector<1x32x128xbf16>
    %558 = vector.shape_cast %557 : vector<1x32x128xbf16> to vector<32x128xbf16>
    %cst_232 = arith.constant dense<0.000000e+00> : vector<34x128xf32>
    %559 = tpu.matmul %556, %558, %cst_232 {dimension_numbers = #tpu.dot_dimension_numbers<[1], [0], [0], [1], [0, 0, 1, 1], [], []>} : vector<34x32xbf16>, vector<32x128xbf16>, vector<34x128xf32> -> vector<34x128xf32>
    %c1_233 = arith.constant 1 : index
    %c0_234 = arith.constant 0 : index
    %c0_235 = arith.constant 0 : index
    %560 = vector.load %arg11[%c1_233, %c0_234, %c0_235] : memref<2x1x128xf32, #tpu.memory_space<vmem>>, vector<1x1x128xf32>
    %561 = vector.shape_cast %560 : vector<1x1x128xf32> to vector<1x128xf32>
    %562 = vector.broadcast %561 : vector<1x128xf32> to vector<34x128xf32>
    %563 = arith.addf %559, %562 : vector<34x128xf32>
    %cst_236 = arith.constant 5.000000e-01 : f32
    %564 = vector.broadcast %cst_236 : f32 to vector<34x128xf32>
    %565 = arith.mulf %564, %563 : vector<34x128xf32>
    %cst_237 = arith.constant 4.471500e-02 : f32
    %566 = vector.broadcast %cst_237 : f32 to vector<34x128xf32>
    %567 = arith.mulf %566, %563 : vector<34x128xf32>
    %568 = arith.mulf %567, %563 : vector<34x128xf32>
    %569 = arith.mulf %568, %563 : vector<34x128xf32>
    %570 = arith.addf %563, %569 : vector<34x128xf32>
    %cst_238 = arith.constant 0.797884583 : f32
    %571 = vector.broadcast %cst_238 : f32 to vector<34x128xf32>
    %572 = arith.mulf %571, %570 : vector<34x128xf32>
    %573 = math.tanh %572 : vector<34x128xf32>
    %cst_239 = arith.constant 1.000000e+00 : f32
    %574 = vector.broadcast %cst_239 : f32 to vector<34x128xf32>
    %575 = arith.addf %574, %573 : vector<34x128xf32>
    %576 = arith.mulf %565, %575 : vector<34x128xf32>
    %577 = arith.truncf %576 : vector<34x128xf32> to vector<34x128xbf16>
    %c1_240 = arith.constant 1 : index
    %c0_241 = arith.constant 0 : index
    %c0_242 = arith.constant 0 : index
    %578 = vector.load %arg9[%c1_240, %c0_241, %c0_242] : memref<2x128x32xbf16, #tpu.memory_space<vmem>>, vector<1x128x32xbf16>
    %579 = vector.shape_cast %578 : vector<1x128x32xbf16> to vector<128x32xbf16>
    %cst_243 = arith.constant dense<0.000000e+00> : vector<34x32xf32>
    %580 = tpu.matmul %577, %579, %cst_243 {dimension_numbers = #tpu.dot_dimension_numbers<[1], [0], [0], [1], [0, 0, 1, 1], [], []>} : vector<34x128xbf16>, vector<128x32xbf16>, vector<34x32xf32> -> vector<34x32xf32>
    %c1_244 = arith.constant 1 : index
    %c5_245 = arith.constant 5 : index
    %c0_246 = arith.constant 0 : index
    %581 = vector.load %arg10[%c1_244, %c5_245, %c0_246] : memref<2x6x32xf32, #tpu.memory_space<vmem>>, vector<1x1x32xf32>
    %582 = vector.shape_cast %581 : vector<1x1x32xf32> to vector<1x32xf32>
    %583 = vector.broadcast %582 : vector<1x32xf32> to vector<34x32xf32>
    %584 = arith.addf %580, %583 : vector<34x32xf32>
    %585 = arith.addf %531, %584 : vector<34x32xf32>
    %586 = vector.extract_strided_slice %585 {offsets = [0, 0], sizes = [32, 32], strides = [1, 1]} : vector<34x32xf32> to vector<32x32xf32>
    %c0_247 = arith.constant 0 : index
    %c0_248 = arith.constant 0 : index
    %c0_249 = arith.constant 0 : index
    %587 = vector.load %arg12[%c0_247, %c0_248, %c0_249] : memref<1x32x32xf32, #tpu.memory_space<vmem>>, vector<1x32x32xf32>
    %588 = vector.shape_cast %587 : vector<1x32x32xf32> to vector<32x32xf32>
    %589 = vector.shape_cast %586 : vector<32x32xf32> to vector<1x32x32xf32>
    tpu.vector_store %arg12[%c0_247, %c0_248, %c0_249], %589 {strides = array<i32>} : memref<1x32x32xf32, #tpu.memory_space<vmem>>, vector<1x32x32xf32>,
    %590 = vector.extract_strided_slice %585 {offsets = [32, 0], sizes = [2, 32], strides = [1, 1]} : vector<34x32xf32> to vector<2x32xf32>
    %c0_250 = arith.constant 0 : index
    %c0_251 = arith.constant 0 : index
    %c0_252 = arith.constant 0 : index
    %591 = vector.load %arg13[%c0_250, %c0_251, %c0_252] : memref<1x2x32xf32, #tpu.memory_space<vmem>>, vector<1x2x32xf32>
    %592 = vector.shape_cast %591 : vector<1x2x32xf32> to vector<2x32xf32>
    %593 = vector.shape_cast %590 : vector<2x32xf32> to vector<1x2x32xf32>
    tpu.vector_store %arg13[%c0_250, %c0_251, %c0_252], %593 {strides = array<i32>} : memref<1x2x32xf32, #tpu.memory_space<vmem>>, vector<1x2x32xf32>,
    return
  }
  func.func @transform_0(%arg0: i32) -> (i32, i32, i32) {
    %c0_i32 = arith.constant 0 : i32
    %c0_i32_0 = arith.constant 0 : i32
    %c0_i32_1 = arith.constant 0 : i32
    return %arg0, %c0_i32, %c0_i32_0 : i32, i32, i32
  }
  func.func @transform_1(%arg0: i32) -> (i32, i32) {
    %c0_i32 = arith.constant 0 : i32
    %c0_i32_0 = arith.constant 0 : i32
    %c0_i32_1 = arith.constant 0 : i32
    return %c0_i32, %c0_i32_0 : i32, i32
  }
  func.func @transform_2(%arg0: i32) -> (i32, i32) {
    %c0_i32 = arith.constant 0 : i32
    %c0_i32_0 = arith.constant 0 : i32
    %c0_i32_1 = arith.constant 0 : i32
    return %c0_i32, %c0_i32_0 : i32, i32
  }
  func.func @transform_3(%arg0: i32) -> (i32, i32) {
    %c0_i32 = arith.constant 0 : i32
    %c0_i32_0 = arith.constant 0 : i32
    %c0_i32_1 = arith.constant 0 : i32
    return %c0_i32, %c0_i32_0 : i32, i32
  }
  func.func @transform_4(%arg0: i32) -> (i32, i32, i32) {
    %c0_i32 = arith.constant 0 : i32
    %c0_i32_0 = arith.constant 0 : i32
    %c0_i32_1 = arith.constant 0 : i32
    %c0_i32_2 = arith.constant 0 : i32
    return %c0_i32, %c0_i32_0, %c0_i32_1 : i32, i32, i32
  }
  func.func @transform_5(%arg0: i32) -> (i32, i32, i32) {
    %c0_i32 = arith.constant 0 : i32
    %c0_i32_0 = arith.constant 0 : i32
    %c0_i32_1 = arith.constant 0 : i32
    %c0_i32_2 = arith.constant 0 : i32
    return %c0_i32, %c0_i32_0, %c0_i32_1 : i32, i32, i32
  }
  func.func @transform_6(%arg0: i32) -> (i32, i32, i32) {
    %c0_i32 = arith.constant 0 : i32
    %c0_i32_0 = arith.constant 0 : i32
    %c0_i32_1 = arith.constant 0 : i32
    %c0_i32_2 = arith.constant 0 : i32
    return %c0_i32, %c0_i32_0, %c0_i32_1 : i32, i32, i32
  }
  func.func @transform_7(%arg0: i32) -> (i32, i32, i32) {
    %c0_i32 = arith.constant 0 : i32
    %c0_i32_0 = arith.constant 0 : i32
    %c0_i32_1 = arith.constant 0 : i32
    %c0_i32_2 = arith.constant 0 : i32
    return %c0_i32, %c0_i32_0, %c0_i32_1 : i32, i32, i32
  }
  func.func @transform_8(%arg0: i32) -> (i32, i32, i32) {
    %c0_i32 = arith.constant 0 : i32
    %c0_i32_0 = arith.constant 0 : i32
    %c0_i32_1 = arith.constant 0 : i32
    %c0_i32_2 = arith.constant 0 : i32
    return %c0_i32, %c0_i32_0, %c0_i32_1 : i32, i32, i32
  }
  func.func @transform_9(%arg0: i32) -> (i32, i32, i32) {
    %c0_i32 = arith.constant 0 : i32
    %c0_i32_0 = arith.constant 0 : i32
    %c0_i32_1 = arith.constant 0 : i32
    %c0_i32_2 = arith.constant 0 : i32
    return %c0_i32, %c0_i32_0, %c0_i32_1 : i32, i32, i32
  }
  func.func @transform_10(%arg0: i32) -> (i32, i32, i32) {
    %c0_i32 = arith.constant 0 : i32
    %c0_i32_0 = arith.constant 0 : i32
    %c0_i32_1 = arith.constant 0 : i32
    %c0_i32_2 = arith.constant 0 : i32
    return %c0_i32, %c0_i32_0, %c0_i32_1 : i32, i32, i32
  }
  func.func @transform_11(%arg0: i32) -> (i32, i32, i32) {
    %c0_i32 = arith.constant 0 : i32
    %c0_i32_0 = arith.constant 0 : i32
    %c0_i32_1 = arith.constant 0 : i32
    return %arg0, %c0_i32, %c0_i32_0 : i32, i32, i32
  }
  func.func @transform_12(%arg0: i32) -> (i32, i32, i32) {
    %c0_i32 = arith.constant 0 : i32
    %c0_i32_0 = arith.constant 0 : i32
    %c0_i32_1 = arith.constant 0 : i32
    return %arg0, %c0_i32, %c0_i32_0 : i32, i32, i32
  }
}

</mosaic_0001>

<bundles_post_ra>
// kernel: vit_forward.1
= control target key start
LH: loop header
LB: loop body
LE: loop exit
PB: predicated region body
PF: predicated region fallthrough
CT: control target
= control target key end

     0   :  { %18 = vsyncpa [#allocation3], 0  ;;  %vm78_vm0 = vcmask 392192   ;;  %s8812_s0 = inlined_call_operand.vmem [shape: f32[1,32,48], index: 0, kind: input, shape index: {}]   ;;  %s8813_s1 = inlined_call_operand.vmem [shape: f32[32,9], index: 1, kind: input, shape index: {}]   ;;  %s8814_s2 = inlined_call_operand.vmem [shape: bf16[48,32], index: 2, kind: input, shape index: {}]   ;;  %s8815_s3 = inlined_call_operand.vmem [shape: f32[4,32], index: 3, kind: input, shape index: {}]   ;;  %s8816_s4 = inlined_call_operand.vmem [shape: f32[2,11,96], index: 4, kind: input, shape index: {}]   ;;  %s8817_s5 = inlined_call_operand.vmem [shape: bf16[2,96,96], index: 5, kind: input, shape index: {}]   ;;  %s8818_s6 = inlined_call_operand.vmem [shape: bf16[2,32,32], index: 6, kind: input, shape index: {}]   ;;  %s8819_s7 = inlined_call_operand.vmem [shape: bf16[2,32,128], index: 7, kind: input, shape index: {}]   ;;  %s8820_s8 = inlined_call_operand.vmem [shape: bf16[2,128,32], index: 8, kind: input, shape index: {}]   ;;  %s8821_s9 = inlined_call_operand.vmem [shape: f32[2,6,32], index: 9, kind: input, shape index: {}]   ;;  %s8822_s10 = inlined_call_operand.vmem [shape: f32[2,1,128], index: 10, kind: input, shape index: {}]   ;;  %s8823_s11 = inlined_call_operand.hbm [shape: f32[1,32,32], index: 11, kind: output, shape index: {0}]   ;;  %s8824_s12 = inlined_call_operand.hbm [shape: f32[1,2,32], index: 12, kind: output, shape index: {1}]  }
   0x1   :  { %v6324_v0 = vld [vmem:[%s8814_s2 + $0x10] sm:$0xff]   ;;  %v6325_v1 = vld [vmem:[%s8814_s2 + $0x8] sm:$0xff]   ;;  %v43_v2 = vld [vmem:[%s8812_s0] sm:$0xff] }
   0x2   :  { %5701 = vmatprep.subr.bf16.mxu0 %v6324_v0  ;;  %v44_v3 = vld [vmem:[%s8812_s0 + $0x8] sm:$0xff]  ;;  %v6326_v4 = vld [vmem:[%s8814_s2] sm:$0xff]   ;;  %v45_v6 = vld [vmem:[%s8812_s0 + $0x10] sm:$0xff] }
   0x3   :  { %5702 = vmatpush3.bf16.msra.mxu0 %v6324_v0  ;;  %v47_v5 = vpack.c.bf16 %v44_v3, %v43_v2  ;;  %v46_v7 = vld [vmem:[%s8812_s0 + $0x18] sm:$0xff] }
   0x4   :  { %5703 = vmatprep.subr.bf16.mxu0 %v6325_v1  ;;  %v48_v8 = vpack.c.bf16 %v46_v7, %v45_v6 }
   0x5   :  { %5707 = vmatprep.mubr.msk.bf16.mxu0 %vm78_vm0, %v47_v5 }
   0x7   :  { %5704 = vmatpush3.bf16.msra.mxu0 %v6325_v1 }
   0x8   :  { %5705 = vmatprep.subr.bf16.mxu0 %v6326_v4 }
   0xb   :  { %5706 = vmatpush3.bf16.msra.mxu0 %v6326_v4 }
   0xe   :  { %5708 = vmatmul.mubr.msk.bf16.vlgmr.msra.gmra.mxu0 %vm78_vm0, %v48_v8 }
   0xf   :  { %19 = vsyncpa [#allocation5], 0  ;;  %v5291_v10 = vld [vmem:[%s8815_s3] ss:$0 sm:$0xff]  ;;  %vm136_vm1 = vcmask 261120   ;;  %vm225_vm2 = vcmask 254976  }
  0x10   :  { %v5297_v55 = vld [vmem:[%s8815_s3 + $0x1] ss:$0 sm:$0xff]  ;;  %v5298_v57 = vld [vmem:[%s8815_s3 + $0x2] ss:$0 sm:$0xff]  ;;  %s6676_s17 = smov 32   ;;  %s6677_s18 = smov 64  }
  0x11   :  { %vm6679_vm3 = vmmov 0   ;;  %vm329_vm4 = vcmask 523264   ;;  %vm740_vm10 = vcmask 785408   ;;  %s6680_s15 = smov 96   ;;  %vm835_vm11 = vcmask 1040384   ;;  %s6682_s16 = smov 88  }
  0x12   :  { %vm860_vm12 = vcmask 64512   ;;  %vm8848_vm13 = vcmask 138240   ;;  %vm8847_vm14 = vcmask 131072   ;;  %s6683_s0 = smov 120   ;;  %s6684_s2 = smov 56   ;;  %vm2260_vm15 = vcmask 195584  }
  0x13   :  { %s6685_s19 = smov 80   ;;  %s6686_s20 = smov 112   ;;  %vm2253_vm0 = vcmask 130048  }
  0x14   :  { %s6687_s21 = smov 48   ;;  %s6688_s22 = smov 72  }
  0x15   :  { %s6689_s23 = smov 104   ;;  %s6690_s24 = smov 40  }
  0x16   :  { %s6691_s25 = smov 8   ;;  %s8851_s26 = smov 16  }
  0x17   :  { %s8849_s27 = smov 24  }
  0xce   :  { %v5709_v9 = vpop.f32.mrf.mxu0 }
  0xcf   :  { %v128_v17 = vadd.f32 %v5709_v9, %v5291_v10  ;;  %v5299_v9 = vld [vmem:[%s8815_s3 + $0x3] ss:$0 sm:$0xff] }
  0xd0   :  { %v119_v11 = vpop.f32.mrf.mxu0 }
  0xd1   :  { %v120_v12 = vadd.f32 %v5291_v10, %v119_v11  ;;  %v143_v21 = vsel %vm136_vm1, %v128_v17, 0.0 }
  0xd2   :  { %v5710_v13 = vpop.f32.mrf.mxu0 }
  0xd3   :  { %v131_v14 = vadd.f32 %v5710_v13, %v5291_v10  ;;  %v137_v15 = vsel %vm136_vm1, %v120_v12, 0.0 }
  0xd4   :  { %v122_v16 = vpop.f32.mrf.mxu0  ;;  %138 = vadd.xlane.f32.xlu0 %v137_v15  ;;  %v8833_v15 = vmov 3  }
  0xd5   :  { %v123_v18 = vadd.f32 %v5291_v10, %v122_v16  ;;  %v146_v19 = vsel %vm136_vm1, %v131_v14, 0.0  ;;  %6199 = vset.pattern.permute.xlu0 %v8833_v15 }
  0xd6   :  { %147 = vadd.xlane.f32.xlu1 %v146_v19 }
  0xd7   :  { %v140_v20 = vsel %vm136_vm1, %v123_v18, 0.0 }
  0xd8   :  { %141 = vadd.xlane.f32.xlu0 %v140_v20 }
  0xda   :  { %144 = vadd.xlane.f32.xlu1 %v143_v21 }
 0x15d   :  { %v139_v22 = vpop.xlane.xlu0 %138 }
 0x15e   :  { %v150_v23 = vmul.f32 0.03125, %v139_v22 }
 0x15f   :  { %v148_v24 = vpop.xlane.xlu1 %147 }
 0x160   :  { %v154_v25 = vsub.f32 %v120_v12, %v150_v23  ;;  %v153_v26 = vmul.f32 0.03125, %v148_v24  ;;  %v226_v12 = vsel %vm225_vm2, %v5299_v9, 0.0 }
 0x161   :  { %v142_v27 = vpop.xlane.xlu0 %141 }
 0x162   :  { %v157_v28 = vsub.f32 %v131_v14, %v153_v26  ;;  %v151_v29 = vmul.f32 0.03125, %v142_v27  ;;  %v158_v30 = vmul.f32 %v154_v25, %v154_v25  ;;  %v8839_v14 = vmov 0  }
 0x163   :  { %v145_v31 = vpop.xlane.xlu1 %144  ;;  %6196 = vset.pattern.permute.xlu1 %v8839_v14 }
 0x164   :  { %v155_v32 = vsub.f32 %v123_v18, %v151_v29  ;;  %v152_v33 = vmul.f32 0.03125, %v145_v31  ;;  %v162_v34 = vsel %vm136_vm1, %v158_v30, 0.0  ;;  %v161_v35 = vmul.f32 %v157_v28, %v157_v28 }
 0x165   :  { %163 = vadd.xlane.f32.xlu0 %v162_v34 }
 0x166   :  { %v156_v36 = vsub.f32 %v128_v17, %v152_v33  ;;  %v159_v37 = vmul.f32 %v155_v32, %v155_v32  ;;  %v171_v38 = vsel %vm136_vm1, %v161_v35, 0.0 }
 0x168   :  { %v165_v39 = vsel %vm136_vm1, %v159_v37, 0.0  ;;  %v160_v40 = vmul.f32 %v156_v36, %v156_v36 }
 0x169   :  { %172 = vadd.xlane.f32.xlu0 %v171_v38  ;;  %166 = vadd.xlane.f32.xlu1 %v165_v39 }
 0x16a   :  { %v168_v41 = vsel %vm136_vm1, %v160_v40, 0.0 }
 0x16d   :  { %169 = vadd.xlane.f32.xlu1 %v168_v41  ;;  %v354_v41 = vld [vmem:[%s8813_s1] sm:$0xff] }
 0x1ee   :  { %v164_v42 = vpop.xlane.xlu0 %163 }
 0x1ef   :  { %v174_v43 = vmul.f32 0.03125, %v164_v42  ;;  %v8837_v42 = vmov 1  }
 0x1f1   :  { %v178_v44 = vadd.f32 1e-05, %v174_v43  ;;  %v6858_v43 = vld [vmem:[%s8813_s1 + $0x8] sm:$0xff] }
 0x1f2   :  { %v167_v45 = vpop.xlane.xlu1 %166  ;;  %v173_v46 = vpop.xlane.xlu0 %172 }
 0x1f3   :  { %6363 = vrsqrt.f32 %v178_v44  ;;  %v175_v47 = vmul.f32 0.03125, %v167_v45  ;;  %v177_v48 = vmul.f32 0.03125, %v173_v46  ;;  %v8835_v44 = vmov 2   ;;  %v6866_v45 = vld [vmem:[%s8813_s1 + $0x10] sm:$0xff]  ;;  %v6877_v46 = vld [vmem:[%s8813_s1 + $0x18] sm:$0xff] }
 0x1f5   :  { %v179_v49 = vadd.f32 1e-05, %v175_v47  ;;  %v181_v50 = vadd.f32 1e-05, %v177_v48  ;;  %v8831_v47 = vmov 5   ;;  %v8827_v48 = vmov 8  }
 0x1f6   :  { %v170_v51 = vpop.xlane.xlu1 %169 }
 0x1f7   :  { %6365 = vrsqrt.f32 %v179_v49  ;;  %v176_v52 = vmul.f32 0.03125, %v170_v51  ;;  %v8829_v49 = vmov 6  }
 0x1f8   :  { %6367 = vrsqrt.f32 %v181_v50  ;;  %v8825_v50 = vmov 7  }
 0x1f9   :  { %v180_v53 = vadd.f32 1e-05, %v176_v52 }
 0x1fb   :  { %6369 = vrsqrt.f32 %v180_v53 }
 0x200   :  { %v6364_v54 = vpop.eup %6363 }
 0x201   :  { %v186_v56 = vmul.f32 %v6364_v54, %v154_v25 }
 0x203   :  { %v194_v58 = vmul.f32 %v5297_v55, %v186_v56 }
 0x204   :  { %v6366_v59 = vpop.eup %6365 }
 0x205   :  { %v6368_v60 = vpop.eup %6367  ;;  %v6800_v61 = vadd.f32 %v5298_v57, %v194_v58  ;;  %v187_v62 = vmul.f32 %v6366_v59, %v155_v32 }
 0x206   :  { %v189_v63 = vmul.f32 %v6368_v60, %v157_v28 }
 0x207   :  { %v213_v0 = vsel %vm136_vm1, %v6800_v61, 0.0  ;;  %v195_v1 = vmul.f32 %v5297_v55, %v187_v62 }
 0x208   :  { %v6370_v2 = vpop.eup %6369  ;;  %214 = vadd.xlane.f32.xlu0 %v213_v0  ;;  %v197_v3 = vmul.f32 %v5297_v55, %v189_v63  ;;  %v6902_v0 = vld [vmem:[%s8821_s9] ss:$0 sm:$0xff] }
 0x209   :  { %v6804_v4 = vadd.f32 %v5298_v57, %v195_v1  ;;  %v188_v5 = vmul.f32 %v6370_v2, %v156_v36 }
 0x20a   :  { %v6806_v6 = vadd.f32 %v5298_v57, %v197_v3  ;;  %v6908_v3 = vld [vmem:[%s8821_s9 + $0x1] ss:$0 sm:$0xff] }
 0x20b   :  { %v216_v7 = vsel %vm136_vm1, %v6804_v4, 0.0  ;;  %v196_v8 = vmul.f32 %v5297_v55, %v188_v5 }
 0x20c   :  { %8859 = vst [vmem:[#allocation8_spill] sm:$0xff] %v6806_v6  ;;  %217 = vadd.xlane.f32.xlu1 %v216_v7  ;;  %v222_v10 = vsel %vm136_vm1, %v6806_v6, 0.0 }
 0x20d   :  { %223 = vadd.xlane.f32.xlu0 %v222_v10  ;;  %v6815_v11 = vadd.f32 %v5298_v57, %v196_v8 }
 0x20f   :  { %v219_v13 = vsel %vm136_vm1, %v6815_v11, 0.0 }
 0x210   :  { %220 = vadd.xlane.f32.xlu1 %v219_v13 }
 0x211   :  { %227 = vadd.xlane.f32.xlu0 %v226_v12 }
 0x291   :  { %v215_v16 = vpop.xlane.xlu0 %214 }
 0x292   :  { %v229_v17 = vmul.f32 0.03125, %v215_v16 }
 0x294   :  { %v6823_v18 = vsub.f32 %v6800_v61, %v229_v17 }
 0x295   :  { %v218_v19 = vpop.xlane.xlu1 %217 }
 0x296   :  { %v230_v20 = vmul.f32 0.03125, %v218_v19  ;;  %v224_v21 = vpop.xlane.xlu0 %223  ;;  %v239_v22 = vmul.f32 %v6823_v18, %v6823_v18 }
 0x297   :  { %v232_v23 = vmul.f32 0.03125, %v224_v21 }
 0x298   :  { %v6828_v24 = vsub.f32 %v6804_v4, %v230_v20  ;;  %v244_v25 = vsel %vm136_vm1, %v239_v22, 0.0 }
 0x299   :  { %v6832_v26 = vsub.f32 %v6806_v6, %v232_v23  ;;  %v221_v27 = vpop.xlane.xlu1 %220  ;;  %245 = vadd.xlane.f32.xlu1 %v244_v25  ;;  %v8841_v25 = vmov 0.0  }
 0x29a   :  { %v231_v28 = vmul.f32 0.03125, %v221_v27  ;;  %v228_v29 = vpop.xlane.xlu0 %227  ;;  %v240_v30 = vmul.f32 %v6828_v24, %v6828_v24  ;;  %5711 = vmatprep.subr.bf16.mxu1 %v8841_v25  ;;  %5723 = vmatprep.mubr.msk.bf16.mxu1 %vm6679_vm3, %v8841_v25 }
 0x29b   :  { %v233_v31 = vmul.f32 0.03125, %v228_v29  ;;  %v242_v32 = vmul.f32 %v6832_v26, %v6832_v26  ;;  %v6329_v29 = vld [vmem:[%s8817_s5 + $0x18] sm:$0xff]  }
 0x29c   :  { %v6839_v33 = vsub.f32 %v6815_v11, %v231_v28  ;;  %v247_v34 = vsel %vm136_vm1, %v240_v30, 0.0 }
 0x29d   :  { %v6842_v35 = vsub.f32 %v5299_v9, %v233_v31  ;;  %248 = vadd.xlane.f32.xlu0 %v247_v34  ;;  %v253_v36 = vsel %vm136_vm1, %v242_v32, 0.0  ;;  %v6330_v31 = vld [vmem:[%s8817_s5 + $0x10] sm:$0xff]   ;;  %v6331_v32 = vld [vmem:[%s8817_s5 + $0x8] sm:$0xff]   ;;  %v6332_v34 = vld [vmem:[%s8817_s5] sm:$0xff]  }
 0x29e   :  { %254 = vadd.xlane.f32.xlu1 %v253_v36  ;;  %v241_v37 = vmul.f32 %v6839_v33, %v6839_v33 }
 0x29f   :  { %v243_v38 = vmul.f32 %v6842_v35, %v6842_v35 }
 0x2a0   :  { %v250_v39 = vsel %vm136_vm1, %v241_v37, 0.0 }
 0x2a1   :  { %251 = vadd.xlane.f32.xlu0 %v250_v39  ;;  %v256_v40 = vsel %vm225_vm2, %v243_v38, 0.0 }
 0x2a2   :  { %257 = vadd.xlane.f32.xlu1 %v256_v40 }
 0x2b3   :  { %360 = vperm.xlu1 %6196, %v354_v41  }
 0x2b7   :  { %6197 = vset.pattern.permute.xlu1 %v8837_v42  ;;  %489 = vperm.xlu0 %6199, %v354_v41  }
 0x2b8   :  { %405 = vperm.xlu1 %6197, %v354_v41  }
 0x2bb   :  { %6200 = vset.pattern.permute.xlu0 %v8839_v14 }
 0x2bc   :  { %6198 = vset.pattern.permute.xlu1 %v8835_v44  ;;  %365 = vperm.xlu0 %6200, %v6858_v43  }
 0x2bd   :  { %447 = vperm.xlu1 %6198, %v354_v41  }
 0x2c0   :  { %370 = vperm.xlu0 %6200, %v6866_v45  }
 0x2c1   :  { %451 = vperm.xlu1 %6198, %v6858_v43  }
 0x2c4   :  { %6202 = vset.pattern.permute.xlu0 %v8837_v42 }
 0x2c5   :  { %6201 = vset.pattern.permute.xlu1 %v8833_v15  ;;  %409 = vperm.xlu0 %6202, %v6858_v43  }
 0x2c6   :  { %493 = vperm.xlu1 %6201, %v6858_v43  }
 0x2c9   :  { %417 = vperm.xlu0 %6202, %v6877_v46  }
 0x2ca   :  { %6203 = vset.pattern.permute.xlu1 %v8839_v14 }
 0x2cb   :  { %375 = vperm.xlu1 %6203, %v6877_v46  }
 0x2cd   :  { %6207 = vset.pattern.permute.xlu0 %v8835_v44 }
 0x2ce   :  { %455 = vperm.xlu0 %6207, %v6866_v45  }
 0x2cf   :  { %6204 = vset.pattern.permute.xlu1 %v8831_v47 }
 0x2d0   :  { %531 = vperm.xlu1 %6204, %v354_v41  }
 0x2d2   :  { %6211 = vset.pattern.permute.xlu0 %v8827_v48 }
 0x2d3   :  { %630 = vperm.xlu0 %6211, %v354_v41  }
 0x2d4   :  { %6205 = vset.pattern.permute.xlu1 %v8837_v42 }
 0x2d5   :  { %413 = vperm.xlu1 %6205, %v6866_v45  }
 0x2d7   :  { %6212 = vset.pattern.permute.xlu0 %v8831_v47 }
 0x2d8   :  { %535 = vperm.xlu0 %6212, %v6858_v43  }
 0x2d9   :  { %6206 = vset.pattern.permute.xlu1 %v8829_v49 }
 0x2da   :  { %564 = vperm.xlu1 %6206, %v354_v41  }
 0x2de   :  { %568 = vperm.xlu1 %6206, %v6858_v43  }
 0x2e2   :  { %6208 = vset.pattern.permute.xlu1 %v8835_v44 }
 0x2e3   :  { %459 = vperm.xlu1 %6208, %v6877_v46  }
 0x2e7   :  { %6209 = vset.pattern.permute.xlu1 %v8825_v50 }
 0x2e8   :  { %597 = vperm.xlu1 %6209, %v354_v41  }
 0x2ec   :  { %6210 = vset.pattern.permute.xlu1 %v8833_v15 }
 0x2ed   :  { %497 = vperm.xlu1 %6210, %v6866_v45  }
 0x2f1   :  { %501 = vperm.xlu1 %6210, %v6877_v46  }
 0x2f5   :  { %6213 = vset.pattern.permute.xlu1 %v8827_v48 }
 0x322   :  { %v246_v51 = vpop.xlane.xlu1 %245 }
 0x323   :  { %v259_v52 = vmul.f32 0.03125, %v246_v51 }
 0x325   :  { %v264_v53 = vadd.f32 1e-05, %v259_v52 }
 0x326   :  { %v249_v54 = vpop.xlane.xlu0 %248 }
 0x327   :  { %6371 = vrsqrt.f32 %v264_v53  ;;  %v255_v55 = vpop.xlane.xlu1 %254  ;;  %v260_v62 = vmul.f32 0.03125, %v249_v54 }
 0x328   :  { %v262_v56 = vmul.f32 0.03125, %v255_v55 }
 0x329   :  { %v265_v1 = vadd.f32 1e-05, %v260_v62 }
 0x32a   :  { %v267_v57 = vadd.f32 1e-05, %v262_v56  ;;  %v252_v58 = vpop.xlane.xlu0 %251 }
 0x32b   :  { %v261_v59 = vmul.f32 0.03125, %v252_v58  ;;  %v258_v23 = vpop.xlane.xlu1 %257 }
 0x32c   :  { %6373 = vrsqrt.f32 %v267_v57  ;;  %v263_v27 = vmul.f32 0.03125, %v258_v23 }
 0x32d   :  { %v266_v60 = vadd.f32 1e-05, %v261_v59 }
 0x32e   :  { %v268_v28 = vadd.f32 1e-05, %v263_v27 }
 0x32f   :  { %6375 = vrsqrt.f32 %v266_v60  ;;  %v6968_v30 = vpop.permute.xlu1 %360 }
 0x330   :  { %6377 = vrsqrt.f32 %v265_v1 }
 0x331   :  { %6379 = vrsqrt.f32 %v268_v28  ;;  %v5304_v28 = vld [vmem:[%s8816_s4 + $0x1] ss:$0 sm:$0xff] }
 0x332   :  { %v7014_v51 = vpop.permute.xlu0 %489 }
 0x334   :  { %v6372_v63 = vpop.eup %6371 }
 0x335   :  { %v274_v2 = vmul.f32 %v6372_v63, %v6823_v18 }
 0x337   :  { %v283_v5 = vmul.f32 %v6902_v0, %v274_v2  ;;  %v366_v53 = vpop.permute.xlu0 %365 }
 0x339   :  { %v6374_v7 = vpop.eup %6373  ;;  %v6912_v8 = vadd.f32 %v6908_v3, %v283_v5 }
 0x33a   :  { %v277_v9 = vmul.f32 %v6374_v7, %v6832_v26  ;;  %v6328_v26 = vld [vmem:[%s8817_s5 + $0x20] sm:$0xff]  }
 0x33b   :  { %301 = vrot.lane.b32.xlu0 %v6912_v8, %s6676_s17  ;;  %v7020_v55 = vpop.permute.xlu0 %370 }
 0x33c   :  { %v6376_v10 = vpop.eup %6375  ;;  %v286_v12 = vmul.f32 %v6902_v0, %v277_v9  ;;  %v347_v9 = vlaneseq }
 0x33d   :  { %v276_v13 = vmul.f32 %v6376_v10, %v6839_v33  ;;  %v6378_v19 = vpop.eup %6377  ;;  %v6982_v33 = vpop.permute.xlu1 %405 }
 0x33e   :  { %v6920_v16 = vadd.f32 %v6908_v3, %v286_v12  ;;  %v275_v20 = vmul.f32 %v6378_v19, %v6828_v24  ;;  %v6327_v24 = vld [vmem:[%s8817_s5 + $0x28] sm:$0xff]   ;;  %v6380_v36 = vpop.eup %6379  ;;  %v7036_v12 = vshrl.u32 %v347_v9, 7 }
 0x33f   :  { %v285_v17 = vmul.f32 %v6902_v0, %v276_v13  ;;  %5712 = vmatpush3.bf16.msra.mxu1 %v6327_v24  ;;  %v278_v37 = vmul.f32 %v6380_v36, %v6842_v35 }
 0x340   :  { %319 = vrot.lane.b32.xlu0 %v6920_v16, %s6677_s18  ;;  %v284_v21 = vmul.f32 %v6902_v0, %v275_v20  ;;  %5713 = vmatprep.subr.bf16.mxu1 %v8841_v25  ;;  %v410_v57 = vpop.permute.xlu0 %409  ;;  %v7045_v20 = vld [vmem:[%s8816_s4 + $0x4] ss:$0 sm:$0xff]  ;;  %vm399_vm5 = vcmp.lt.s32.totalorder %v7036_v12, 4  ;;  %vm349_vm6 = vcmp.lt.s32.totalorder %v7036_v12, 5  ;;  %vm483_vm7 = vcmp.lt.s32.totalorder %v7036_v12, 1 }
 0x341   :  { %v6926_v18 = vadd.f32 %v6908_v3, %v285_v17  ;;  %v6991_v38 = vpop.permute.xlu1 %447  ;;  %v287_v39 = vmul.f32 %v6902_v0, %v278_v37  ;;  %vm441_vm8 = vcmp.lt.s32.totalorder %v7036_v12, 3  ;;  %vm525_vm9 = vcmp.lt.s32.totalorder %v7036_v12, 7 }
 0x342   :  { %v6944_v22 = vadd.f32 %v6908_v3, %v284_v21 }
 0x343   :  { %305 = vrot.lane.b32.xlu1 %v6926_v18, %s6676_s17  ;;  %5714 = vmatpush3.bf16.msra.mxu1 %v6328_v26  ;;  %v6997_v40 = vadd.f32 %v6908_v3, %v287_v39 }
 0x344   :  { %543 = vperm.xlu0 %6212, %v6877_v46   ;;  %5715 = vmatprep.subr.bf16.mxu1 %v8841_v25  ;;  %v418_v59 = vpop.permute.xlu0 %417 }
 0x345   :  { %v6999_v41 = vpop.permute.xlu1 %451 }
 0x347   :  { %317 = vrot.lane.b32.xlu1 %v6926_v18, %s6677_s18  ;;  %5716 = vmatpush3.bf16.msra.mxu1 %v6329_v29 }
 0x348   :  { %6215 = vset.pattern.permute.xlu0 %v8825_v50  ;;  %5717 = vmatprep.subr.bf16.mxu1 %v8841_v25 }
 0x349   :  { %601 = vperm.xlu0 %6215, %v6858_v43   ;;  %v7004_v35 = vpop.permute.xlu1 %493  ;;  %v7028_v62 = vpop.permute.xlu0 %455 }
 0x34b   :  { %313 = vrot.lane.b32.xlu1 %v6912_v8, %s6677_s18  ;;  %5718 = vmatpush3.bf16.msra.mxu1 %v6330_v31 }
 0x34c   :  { %5719 = vmatprep.subr.bf16.mxu1 %v8841_v25 }
 0x34d   :  { %605 = vperm.xlu0 %6215, %v6866_v45  }
 0x34e   :  { %v7032_v0 = vpop.permute.xlu0 %630 }
 0x34f   :  { %307 = vrot.lane.b32.xlu1 %v6920_v16, %s6676_s17  ;;  %5720 = vmatpush3.bf16.msra.mxu1 %v6331_v32 }
 0x350   :  { %5721 = vmatprep.subr.bf16.mxu1 %v8841_v25 }
 0x351   :  { %6219 = vset.pattern.permute.xlu0 %v8827_v48 }
 0x352   :  { %642 = vperm.xlu0 %6219, %v6877_v46  }
 0x353   :  { %303 = vrot.lane.b32.xlu1 %v6944_v22, %s6676_s17  ;;  %5722 = vmatpush3.bf16.msra.mxu1 %v6332_v34  ;;  %v7034_v2 = vpop.permute.xlu0 %535 }
 0x356   :  { %6263 = vset.pattern.permute.xlu0 %v8833_v15 }
 0x357   :  { %315 = vrot.lane.b32.xlu1 %v6944_v22, %s6677_s18 }
 0x35b   :  { %634 = vperm.xlu1 %6213, %v6858_v43   ;;  %v7008_v43 = vpop.permute.xlu1 %375 }
 0x35f   :  { %6214 = vset.pattern.permute.xlu1 %v8831_v47 }
 0x360   :  { %539 = vperm.xlu1 %6214, %v6866_v45  }
 0x364   :  { %6216 = vset.pattern.permute.xlu1 %v8829_v49 }
 0x365   :  { %572 = vperm.xlu1 %6216, %v6866_v45  }
 0x369   :  { %576 = vperm.xlu1 %6216, %v6877_v46  }
 0x36d   :  { %6217 = vset.pattern.permute.xlu1 %v8825_v50 }
 0x36e   :  { %609 = vperm.xlu1 %6217, %v6877_v46   ;;  %v7010_v46 = vpop.permute.xlu1 %531 }
 0x372   :  { %6218 = vset.pattern.permute.xlu1 %v8827_v48 }
 0x373   :  { %638 = vperm.xlu1 %6218, %v6866_v45   ;;  %v7012_v45 = vpop.permute.xlu1 %413 }
 0x377   :  { %681 = vrot.lane.b32.xlu1 %v6997_v40, %s6676_s17  ;;  %v7016_v52 = vpop.permute.xlu1 %564 }
 0x378   :  { %6260 = vset.pattern.permute.xlu1 %v8839_v14 }
 0x37b   :  { %684 = vrot.lane.b32.xlu1 %v6997_v40, %s6677_s18  ;;  %v7018_v54 = vpop.permute.xlu1 %568 }
 0x37f   :  { %v7022_v56 = vpop.permute.xlu1 %459 }
 0x383   :  { %v7024_v58 = vpop.permute.xlu1 %597 }
 0x387   :  { %v7026_v60 = vpop.permute.xlu1 %497 }
 0x38b   :  { %v7030_v63 = vpop.permute.xlu1 %501 }
 0x3ad   :  { %v302_v7 = vpop.permute.xlu0 %301 }
 0x3ae   :  { %v325_v26 = vsel %vm136_vm1, %v6912_v8, %v302_v7 }
 0x3b2   :  { %v320_v19 = vpop.permute.xlu0 %319 }
 0x3b5   :  { %v306_v1 = vpop.permute.xlu1 %305 }
 0x3b6   :  { %v327_v17 = vsel %vm136_vm1, %v6926_v18, %v306_v1 }
 0x3b9   :  { %v318_v3 = vpop.permute.xlu1 %317 }
 0x3ba   :  { %v7048_v21 = vsel %vm329_vm4, %v327_v17, %v318_v3 }
 0x3bb   :  { %v345_v18 = vrot.slane %v7048_v21, 3  ;;  %v8846_v8 = vrot.slane %v7048_v21, 1  ;;  %v397_v34 = vrot.slane %v7048_v21, 4 }
 0x3bd   :  { %v314_v5 = vpop.permute.xlu1 %313 }
 0x3be   :  { %v7063_v27 = vsel %vm329_vm4, %v325_v26, %v314_v5 }
 0x3bf   :  { %v343_v1 = vrot.slane %v7063_v27, 3  ;;  %v395_v3 = vrot.slane %v7063_v27, 4  ;;  %v437_v7 = vrot.slane %v7063_v27, 5  ;;  %v521_v9 = vrot.slane %v7063_v27, 1 }
 0x3c1   :  { %v308_v10 = vpop.permute.xlu1 %307 }
 0x3c2   :  { %v328_v13 = vsel %vm136_vm1, %v6920_v16, %v308_v10  ;;  %v7059_v16 = vmul.f32 %v7045_v20, %v7048_v21 }
 0x3c3   :  { %v7051_v23 = vsel %vm329_vm4, %v328_v13, %v320_v19 }
 0x3c4   :  { %v398_v29 = vrot.slane %v7051_v23, 4  ;;  %v8844_v31 = vrot.slane %v7051_v23, 5  ;;  %v346_v39 = vrot.slane %v7051_v23, 3 }
 0x3c5   :  { %v304_v24 = vpop.permute.xlu1 %303 }
 0x3c6   :  { %v326_v32 = vsel %vm136_vm1, %v6944_v22, %v304_v24  ;;  %v479_v22 = vrot.slane %v7063_v27, 7  ;;  %v7089_v17 = vsel %vm399_vm5, %v397_v34, %v398_v29  ;;  %v7093_v19 = vsel %vm399_vm5, %v398_v29, %v395_v3 }
 0x3c7   :  { %v7100_v26 = vsel %vm441_vm8, %v8844_v31, %v437_v7  ;;  %v7108_v50 = vsel %vm349_vm6, %v345_v18, %v346_v39  ;;  %v7112_v29 = vsel %vm349_vm6, %v346_v39, %v343_v1  ;;  %v423_v42 = vmul.f32 %v418_v59, %v7089_v17  ;;  %v7148_v31 = vpop.permute.xlu0 %543 }
 0x3c8   :  { %v339_v39 = vmul.f32 %v7045_v20, %v7063_v27  ;;  %v462_v59 = vmul.f32 %v6991_v38, %v7100_v26  ;;  %v420_v25 = vmul.f32 %v6982_v33, %v7093_v19  ;;  %v7140_v27 = vld [vmem:[%s8816_s4 + $0x2] ss:$0 sm:$0xff]  ;;  %v378_v38 = vmul.f32 %v6968_v30, %v7112_v29 }
 0x3c9   :  { %v316_v36 = vpop.permute.xlu1 %315 }
 0x3ca   :  { %v7080_v5 = vsel %vm329_vm4, %v326_v32, %v316_v36  ;;  %v471_v6 = vmul.f32 %v7140_v27, %v462_v59 }
 0x3cb   :  { %v344_v10 = vrot.slane %v7080_v5, 3  ;;  %v396_v13 = vrot.slane %v7080_v5, 4  ;;  %v8843_v24 = vrot.slane %v7080_v5, 7  ;;  %v522_v47 = vrot.slane %v7080_v5, 1 }
 0x3cc   :  { %v438_v15 = vrot.slane %v7080_v5, 5 }
 0x3cd   :  { %v352_v32 = vsel %vm349_vm6, %v343_v1, %v344_v10  ;;  %v402_v36 = vsel %vm399_vm5, %v395_v3, %v396_v13  ;;  %v5303_v3 = vld [vmem:[%s8816_s4] ss:$0 sm:$0xff]  ;;  %v486_v1 = vsel %vm483_vm7, %v479_v22, %v8843_v24  ;;  %v381_v24 = vmul.f32 %v7008_v43, %v7108_v50 }
 0x3ce   :  { %v379_v48 = vmul.f32 %v366_v53, %v352_v32  ;;  %v421_v49 = vmul.f32 %v410_v57, %v402_v36  ;;  %v340_v53 = vmul.f32 %v7045_v20, %v7080_v5  ;;  %v527_v14 = vsel %vm525_vm9, %v522_v47, %v8846_v8 }
 0x3cf   :  { %v444_v44 = vsel %vm441_vm8, %v437_v7, %v438_v15  ;;  %v8861_v8 = vrot.slane %v7051_v23, 1  ;;  %v387_v59 = vmul.f32 %v5303_v3, %v378_v38 }
 0x3d0   :  { %v388_v57 = vmul.f32 %v5303_v3, %v379_v48  ;;  %v351_v48 = vsel %vm349_vm6, %v344_v10, %v345_v18  ;;  %v430_v37 = vmul.f32 %v5304_v28, %v421_v49  ;;  %v8860_v18 = vrot.slane %v7051_v23, 7 }
 0x3d1   :  { %v505_v10 = vmul.f32 %v7004_v35, %v486_v1  ;;  %v463_v30 = vmul.f32 %v6999_v41, %v444_v44  ;;  %v342_v49 = vmul.f32 %v7045_v20, %v7051_v23  ;;  %v7169_v7 = vsel %vm525_vm9, %v8861_v8, %v521_v9  ;;  %v7181_v20 = vld [vmem:[%s8816_s4 + $0x3] ss:$0 sm:$0xff] }
 0x3d2   :  { %v392_v33 = vadd.f32 %v388_v57, %v340_v53  ;;  %v487_v43 = vsel %vm483_vm7, %v8860_v18, %v479_v22  ;;  %v432_v53 = vmul.f32 %v5304_v28, %v423_v42  ;;  %v528_v22 = vsel %vm525_vm9, %v521_v9, %v522_v47 }
 0x3d3   :  { %v380_v35 = vmul.f32 %v7020_v55, %v351_v48  ;;  %v472_v41 = vmul.f32 %v7140_v27, %v463_v30  ;;  %v547_v1 = vmul.f32 %v7034_v2, %v527_v14  ;;  %v401_v42 = vsel %vm399_vm5, %v396_v13, %v397_v34  ;;  %v602_v14 = vpop.permute.xlu0 %601  ;;  %v7191_v13 = vld [vmem:[%s8816_s4 + $0x5] ss:$0 sm:$0xff] }
 0x3d4   :  { %v434_v57 = vadd.f32 %v430_v37, %v392_v33  ;;  %v390_v8 = vmul.f32 %v5303_v3, %v381_v24  ;;  %v429_v33 = vmul.f32 %v5304_v28, %v420_v25  ;;  %v579_v47 = vmul.f32 %v7016_v52, %v352_v32  ;;  %v7196_v25 = vld [vmem:[%s8816_s4 + $0x6] ss:$0 sm:$0xff] }
 0x3d5   :  { %v580_v55 = vmul.f32 %v7018_v54, %v351_v48  ;;  %v514_v18 = vmul.f32 %v7181_v20, %v505_v10  ;;  %v546_v2 = vmul.f32 %v7010_v46, %v528_v22  ;;  %v612_v34 = vmul.f32 %v7024_v58, %v402_v36 }
 0x3d6   :  { %v635_v37 = vpop.permute.xlu1 %634  ;;  %v476_v9 = vadd.f32 %v472_v41, %v434_v57  ;;  %v391_v52 = vadd.f32 %v387_v59, %v339_v39  ;;  %v504_v54 = vmul.f32 %v7014_v51, %v487_v43  ;;  %v389_v24 = vmul.f32 %v5303_v3, %v380_v35 }
 0x3d7   :  { %v556_v48 = vmul.f32 %v7191_v13, %v547_v1  ;;  %v613_v46 = vmul.f32 %v602_v14, %v401_v42  ;;  %v422_v58 = vmul.f32 %v7012_v45, %v401_v42  ;;  %v8862_v36 = vrot.slane %v7048_v21, 5  ;;  %v7217_v45 = vld [vmem:[%s8816_s4 + $0x7] ss:$0 sm:$0xff] }
 0x3d8   :  { %v518_v32 = vadd.f32 %v514_v18, %v476_v9  ;;  %v394_v10 = vadd.f32 %v390_v8, %v342_v49  ;;  %v433_v30 = vadd.f32 %v429_v33, %v391_v52  ;;  %v589_v57 = vmul.f32 %v7196_v25, %v580_v55 }
 0x3d9   :  { %v443_v38 = vsel %vm441_vm8, %v438_v15, %v8862_v36  ;;  %v8863_v51 = vrot.slane %v7051_v23, 5  ;;  %v8864_v3 = vmov %v8862_v36  ;;  %v513_v49 = vmul.f32 %v7181_v20, %v504_v54 }
 0x3da   :  { %v560_v22 = vadd.f32 %v556_v48, %v518_v32  ;;  %v646_v39 = vmul.f32 %v635_v37, %v443_v38  ;;  %v475_v15 = vadd.f32 %v471_v6, %v433_v30  ;;  %v555_v35 = vmul.f32 %v7191_v13, %v546_v2  ;;  %v7234_v6 = vld [vmem:[%s8816_s4 + $0x8] ss:$0 sm:$0xff] }
 0x3db   :  { %v540_v41 = vpop.permute.xlu1 %539  ;;  %v7212_v43 = vsel %vm441_vm8, %v8864_v3, %v8863_v51  ;;  %v393_v42 = vadd.f32 %v389_v24, %v7059_v16  ;;  %v622_v8 = vmul.f32 %v7217_v45, %v613_v46  ;;  %v8865_v59 = vrot.slane %v7051_v23, 7 }
 0x3dc   :  { %v465_v1 = vmul.f32 %v7022_v56, %v7212_v43  ;;  %v593_v37 = vadd.f32 %v589_v57, %v560_v22  ;;  %v8866_v33 = vrot.slane %v7048_v21, 7  ;;  %v431_v9 = vmul.f32 %v5304_v28, %v422_v58  ;;  %v606_v58 = vpop.permute.xlu0 %605 }
 0x3dd   :  { %v464_v56 = vmul.f32 %v7028_v62, %v443_v38  ;;  %v517_v18 = vadd.f32 %v513_v49, %v475_v15  ;;  %v436_v16 = vadd.f32 %v432_v53, %v394_v10  ;;  %v645_v2 = vmul.f32 %v7032_v0, %v444_v44 }
 0x3de   :  { %v484_v55 = vsel %vm483_vm7, %v8866_v33, %v8865_v59  ;;  %v626_v14 = vadd.f32 %v622_v8, %v593_v37  ;;  %v655_v52 = vmul.f32 %v7234_v6, %v646_v39  ;;  %v8867_v54 = vmov %v8866_v33 }
 0x3df   :  { %v8868_v24 = vrot.slane %v7080_v5, 7  ;;  %v559_v46 = vadd.f32 %v555_v35, %v517_v18  ;;  %v588_v28 = vmul.f32 %v7196_v25, %v579_v47  ;;  %v474_v62 = vmul.f32 %v7140_v27, %v465_v1  ;;  %v5311_v47 = vld [vmem:[%s8816_s4 + $0x9] ss:$0 sm:$0xff] }
 0x3e0   :  { %v573_v48 = vpop.permute.xlu1 %572  ;;  %v507_v53 = vmul.f32 %v7030_v63, %v484_v55  ;;  %v435_v36 = vadd.f32 %v431_v9, %v393_v42  ;;  %v659_v44 = vadd.f32 %v655_v52, %v626_v14  ;;  %v8869_v0 = vrot.slane %v7051_v23, 1  ;;  %v643_v37 = vpop.permute.xlu0 %642 }
 0x3e1   :  { %v485_v32 = vsel %vm483_vm7, %v8868_v24, %v8867_v54  ;;  %v8870_v38 = vrot.slane %v7048_v21, 1  ;;  %v592_v10 = vadd.f32 %v588_v28, %v559_v46  ;;  %v621_v30 = vmul.f32 %v7217_v45, %v612_v34 }
 0x3e2   :  { %v478_v57 = vadd.f32 %v474_v62, %v436_v16  ;;  %v473_v63 = vmul.f32 %v7140_v27, %v464_v56  ;;  %v506_v22 = vmul.f32 %v7026_v60, %v485_v32  ;;  %v549_v23 = vmul.f32 %v7148_v31, %v7169_v7  ;;  %v5312_v31 = vld [vmem:[%s8816_s4 + $0xa] ss:$0 sm:$0xff] }
 0x3e3   :  { %v526_v5 = vsel %vm525_vm9, %v8870_v38, %v8869_v0  ;;  %v654_v21 = vmul.f32 %v7234_v6, %v645_v2  ;;  %v668_v51 = vmul.f32 %v5311_v47, %v659_v44  ;;  %v625_v15 = vadd.f32 %v621_v30, %v592_v10 }
 0x3e4   :  { %v548_v39 = vmul.f32 %v540_v41, %v526_v5  ;;  %v577_v3 = vpop.permute.xlu1 %576  ;;  %v516_v34 = vmul.f32 %v7181_v20, %v507_v53  ;;  %v477_v49 = vadd.f32 %v473_v63, %v435_v36  ;;  %v581_v35 = vmul.f32 %v573_v48, %v7108_v50 }
 0x3e5   :  { %v582_v1 = vmul.f32 %v577_v3, %v7112_v29  ;;  %v658_v42 = vadd.f32 %v654_v21, %v625_v15  ;;  %v515_v60 = vmul.f32 %v7181_v20, %v506_v22  ;;  %v677_v59 = vadd.f32 %v5312_v31, %v668_v51 }
 0x3e6   :  { %v520_v27 = vadd.f32 %v516_v34, %v478_v57  ;;  %v557_v41 = vmul.f32 %v7191_v13, %v548_v39  ;;  %v558_v33 = vmul.f32 %v7191_v13, %v549_v23  ;;  %v590_v29 = vmul.f32 %v7196_v25, %v581_v35 }
 0x3e7   :  { %v591_v7 = vmul.f32 %v7196_v25, %v582_v1  ;;  %v667_v8 = vmul.f32 %v5311_v47, %v658_v42  ;;  %v519_v50 = vadd.f32 %v515_v60, %v477_v49  ;;  %v648_v9 = vmul.f32 %v643_v37, %v7100_v26 }
 0x3e8   :  { %v562_v18 = vadd.f32 %v558_v33, %v520_v27  ;;  %v614_v16 = vmul.f32 %v606_v58, %v7089_v17  ;;  %v8871_v48 = vmov 0.0   ;;  %v6681_v39 = vmov 1966171168  }
 0x3e9   :  { %v610_v55 = vpop.permute.xlu1 %609  ;;  %v676_v56 = vadd.f32 %v5312_v31, %v667_v8  ;;  %v561_v14 = vadd.f32 %v557_v41, %v519_v50  ;;  %v657_v13 = vmul.f32 %v7234_v6, %v648_v9  ;;  %v808_v23 = vunpack.c.l.s4 %v6681_v39 }
 0x3ea   :  { %v615_v20 = vmul.f32 %v610_v55, %v7093_v19  ;;  %v595_v54 = vadd.f32 %v591_v7, %v562_v18  ;;  %v623_v26 = vmul.f32 %v7217_v45, %v614_v16 }
 0x3eb   :  { %v689_v2 = vpack.c.bf16 %v677_v59, %v676_v56  ;;  %v594_v24 = vadd.f32 %v590_v29, %v561_v14 }
 0x3ec   :  { %v624_v52 = vmul.f32 %v7217_v45, %v615_v20 }
 0x3ed   :  { %5724 = vmatmul.mubr.msk.bf16.vlgmr.msra.gmra.mxu1 %vm740_vm10, %v689_v2  ;;  %v627_v46 = vadd.f32 %v623_v26, %v594_v24 }
 0x3ee   :  { %v639_v25 = vpop.permute.xlu1 %638  ;;  %v628_v32 = vadd.f32 %v624_v52, %v595_v54  ;;  %5727 = vmatprep.mubr.msk.bf16.mxu1 %vm6679_vm3, %v8871_v48 }
 0x3ef   :  { %v647_v19 = vmul.f32 %v639_v25, %v7212_v43 }
 0x3f0   :  { %v661_v17 = vadd.f32 %v657_v13, %v628_v32 }
 0x3f1   :  { %v656_v28 = vmul.f32 %v7234_v6, %v647_v19 }
 0x3f2   :  { %v670_v53 = vmul.f32 %v5311_v47, %v661_v17  ;;  %v682_v36 = vpop.permute.xlu1 %681 }
 0x3f3   :  { %v660_v62 = vadd.f32 %v656_v28, %v627_v46  ;;  %v687_v43 = vsel %vm136_vm1, %v6997_v40, %v682_v36  ;;  %v809_v40 = vunpack.c.0.s8 %v808_v23 }
 0x3f4   :  { %v679_v0 = vadd.f32 %v5312_v31, %v670_v53 }
 0x3f5   :  { %v669_v58 = vmul.f32 %v5311_v47, %v660_v62  ;;  %v7297_v34 = vsub.s32 %v809_v40, %v7036_v12 }
 0x3f6   :  { %v685_v5 = vpop.permute.xlu1 %684 }
 0x3f7   :  { %v678_v44 = vadd.f32 %v5312_v31, %v669_v58  ;;  %v688_v45 = vsel %vm329_vm4, %v687_v43, %v685_v5 }
 0x3f8   :  { %v691_v10 = vpack.c.bf16 %v688_v45, %v688_v45 }
 0x3f9   :  { %v690_v38 = vpack.c.bf16 %v679_v0, %v678_v44 }
 0x3fb   :  { %5728 = vmatmul.mubr.msk.bf16.gmra.mxu1 %vm740_vm10, %v690_v38 }
 0x3fc   :  { %5731 = vmatprep.mubr.msk.bf16.mxu1 %vm6679_vm3, %v8871_v48 }
 0x403   :  { %5732 = vmatmul.mubr.msk.bf16.gmra.mxu1 %vm740_vm10, %v691_v10 }
 0x4ad   :  { %v784_v6 = vpop.f32.mrf.mxu1 }
 0x4ae   :  { %v836_v37 = vrot.slane %v784_v6, 7 }
 0x4af   :  { %v5725_v30 = vpop.f32.mrf.mxu1 }
 0x4b1   :  { %v787_v57 = vpop.f32.mrf.mxu1 }
 0x4b2   :  { %v837_v47 = vrot.slane %v787_v57, 7 }
 0x4b3   :  { %v5726_v63 = vpop.f32.mrf.mxu1 }
 0x4b4   :  { %v7292_v22 = vpack.c.bf16 %v837_v47, %v837_v47  ;;  %v838_v7 = vsel %vm835_vm11, %v836_v37, %v837_v47 }
 0x4b6   :  { %858 = vrot.lane.b32.xlu0 %v7292_v22, %s6680_s15 }
 0x4bb   :  { %v792_v21 = vpop.f32.mrf.mxu1 }
 0x4bc   :  { %v839_v8 = vrot.slane %v792_v21, 7 }
 0x4bd   :  { %v5729_v51 = vpop.f32.mrf.mxu1 }
 0x4bf   :  { %v795_v3 = vpop.f32.mrf.mxu1 }
 0x4c0   :  { %v840_v15 = vrot.slane %v795_v3, 7 }
 0x4c1   :  { %v5730_v49 = vpop.f32.mrf.mxu1 }
 0x4c2   :  { %v7299_v35 = vpack.c.bf16 %v840_v15, %v840_v15  ;;  %v841_v55 = vsel %vm835_vm11, %v839_v8, %v840_v15  ;;  %v8872_v15 = vmov 0  }
 0x4c3   :  { %v800_v1 = vpop.f32.mrf.mxu1  ;;  %v7348_v49 = vsel %vm835_vm11, 65535, %v8872_v15 }
 0x4c4   :  { %v813_v42 = vrot.slane %v800_v1, %v7297_v34  ;;  %925 = vrot.lane.b32.xlu0 %v7299_v35, %s6680_s15 }
 0x4c5   :  { %v5733_v27 = vpop.f32.mrf.mxu1 }
 0x4c6   :  { %v814_v60 = vcombine.high %v813_v42, %v813_v42  ;;  %v821_v41 = vrot.slane %v813_v42, %v7297_v34 }
 0x4c7   :  { %v803_v31 = vpop.f32.mrf.mxu1 }
 0x4c8   :  { %v828_v59 = vrot.slane %v814_v60, %v7297_v34  ;;  %v848_v33 = vsel %vm835_vm11, %v821_v41, %v836_v37 }
 0x4c9   :  { %v7308_v50 = vpack.c.bf16 %v838_v7, %v848_v33  ;;  %v5734_v29 = vpop.f32.mrf.mxu1 }
 0x4ca   :  { %v849_v9 = vsel %vm835_vm11, %v828_v59, %v839_v8 }
 0x4cb   :  { %v7312_v56 = vpack.c.bf16 %v841_v55, %v849_v9  ;;  %856 = vrot.lane.b32.xlu1 %v7308_v50, %s6680_s15  ;;  %5739 = vmatprep.mubr.msk.bf16.mxu1 %vm860_vm12, %v7308_v50 }
 0x4cd   :  { %5747 = vmatprep.mubr.msk.bf16.mxu0 %vm860_vm12, %v7312_v56 }
 0x4cf   :  { %923 = vrot.lane.b32.xlu1 %v7312_v56, %s6680_s15 }
 0x528   :  { %v859_v20 = vpop.permute.xlu0 %858 }
 0x529   :  { %6135 = vmatprep.subr.msk.bf16.mxu1 %vm860_vm12, %v859_v20  ;;  %v871_v18 = vsel %vm860_vm12, %v859_v20, 0 }
 0x52a   :  { %5736 = vmatpush3.bf16.xpose.msra.mxu1 %v871_v18 }
 0x536   :  { %v926_v16 = vpop.permute.xlu0 %925 }
 0x537   :  { %6137 = vmatprep.subr.msk.bf16.mxu0 %vm860_vm12, %v926_v16  ;;  %v937_v14 = vsel %vm860_vm12, %v926_v16, 0 }
 0x538   :  { %5744 = vmatpush3.bf16.xpose.msra.mxu0 %v937_v14 }
 0x53d   :  { %v857_v2 = vpop.permute.xlu1 %856 }
 0x53e   :  { %6136 = vmatprep.subr.msk.bf16.mxu1 %vm860_vm12, %v857_v2  ;;  %v868_v52 = vsel %vm860_vm12, %v857_v2, 0 }
 0x53f   :  { %5738 = vmatpush3.bf16.xpose.msra.mxu1 %v868_v52 }
 0x541   :  { %v924_v54 = vpop.permute.xlu1 %923 }
 0x542   :  { %6138 = vmatprep.subr.msk.bf16.mxu0 %vm860_vm12, %v924_v54  ;;  %v934_v24 = vsel %vm860_vm12, %v924_v54, 0 }
 0x543   :  { %5746 = vmatpush3.bf16.xpose.msra.mxu0 %v934_v24 }
 0x546   :  { %5740 = vmatmul.mubr.msk.bf16.vlgmr.msra.gmra.mxu1 %vm860_vm12, %v7292_v22 }
 0x54a   :  { %5748 = vmatmul.mubr.msk.bf16.vlgmr.msra.gmra.mxu0 %vm860_vm12, %v7299_v35 }
 0x606   :  { %v5741_v13 = vpop.f32.mrf.mxu1 }
 0x607   :  { %v995_v28 = vsel %vm8847_vm14, %v5741_v13, -inf }
 0x608   :  { %v907_v25 = vpop.f32.mrf.mxu1 }
 0x609   :  { %v988_v32 = vsel %vm8848_vm13, %v907_v25, -inf }
 0x60a   :  { %989 = vmax.xlane.f32.xlu0 %v988_v32  ;;  %v5742_v26 = vpop.f32.mrf.mxu1  ;;  %v5749_v19 = vpop.f32.mrf.mxu0 }
 0x60b   :  { %v1004_v58 = vsel %vm8847_vm14, %v5749_v19, -inf }
 0x60c   :  { %v910_v17 = vpop.f32.mrf.mxu1  ;;  %v973_v46 = vpop.f32.mrf.mxu0 }
 0x60d   :  { %v991_v62 = vsel %vm8848_vm13, %v910_v17, -inf  ;;  %v998_v36 = vsel %vm8848_vm13, %v973_v46, -inf }
 0x60e   :  { %996 = vmax.xlane.f32.xlu0 %v995_v28  ;;  %992 = vmax.xlane.f32.xlu1 %v991_v62  ;;  %v5750_v53 = vpop.f32.mrf.mxu0 }
 0x610   :  { %v976_v44 = vpop.f32.mrf.mxu0 }
 0x611   :  { %v1001_v0 = vsel %vm8848_vm13, %v976_v44, -inf }
 0x612   :  { %1005 = vmax.xlane.f32.xlu1 %v1004_v58  ;;  %999 = vmax.xlane.f32.xlu0 %v998_v36 }
 0x616   :  { %1002 = vmax.xlane.f32.xlu0 %v1001_v0 }
 0x623   :  { %1059 = vrot.lane.b32.xlu1 %v7308_v50, %s6677_s18 }
 0x627   :  { %1125 = vrot.lane.b32.xlu1 %v7299_v35, %s6677_s18 }
 0x62c   :  { %1061 = vrot.lane.b32.xlu0 %v7292_v22, %s6677_s18 }
 0x693   :  { %v990_v38 = vpop.xlane.xlu0 %989 }
 0x694   :  { %v1007_v5 = vsub.f32 %v907_v25, %v990_v38 }
 0x696   :  { %v1013_v30 = vmul.f32 1.442695, %v1007_v5 }
 0x697   :  { %v993_v43 = vpop.xlane.xlu1 %992  ;;  %v997_v45 = vpop.xlane.xlu0 %996 }
 0x698   :  { %v1009_v10 = vsub.f32 %v5741_v13, %v997_v45  ;;  %v1008_v23 = vsub.f32 %v910_v17, %v993_v43 }
 0x69a   :  { %v1017_v6 = vmul.f32 1.442695, %v1009_v10  ;;  %v1015_v1 = vmul.f32 1.442695, %v1008_v23 }
 0x69b   :  { %v1006_v57 = vpop.xlane.xlu1 %1005  ;;  %v1000_v47 = vpop.xlane.xlu0 %999 }
 0x69c   :  { %v1012_v63 = vsub.f32 %v5749_v19, %v1006_v57  ;;  %v1010_v39 = vsub.f32 %v973_v46, %v1000_v47  ;;  %6381 = vpow2.f32 %v1017_v6 }
 0x69d   :  { %6383 = vpow2.f32 %v1013_v30 }
 0x69e   :  { %v1023_v21 = vmul.f32 1.442695, %v1012_v63  ;;  %v1019_v40 = vmul.f32 1.442695, %v1010_v39 }
 0x69f   :  { %v1060_v51 = vpop.permute.xlu1 %1059  ;;  %v1003_v3 = vpop.xlane.xlu0 %1002 }
 0x6a0   :  { %6385 = vpow2.f32 %v1023_v21  ;;  %v1011_v18 = vsub.f32 %v976_v44, %v1003_v3 }
 0x6a1   :  { %6387 = vpow2.f32 %v1019_v40 }
 0x6a2   :  { %6389 = vpow2.f32 %v1015_v1  ;;  %v1021_v16 = vmul.f32 1.442695, %v1011_v18 }
 0x6a3   :  { %v1126_v42 = vpop.permute.xlu1 %1125  ;;  %v1062_v27 = vpop.permute.xlu0 %1061 }
 0x6a4   :  { %v1135_v37 = vand.u32 %v1126_v42, %v7348_v49  ;;  %v1073_v60 = vand.u32 %v7348_v49, %v1062_v27  ;;  %6391 = vpow2.f32 %v1021_v16 }
 0x6a6   :  { %5751 = vmatprep.subr.bf16.mxu1 %v1073_v60  ;;  %5759 = vmatprep.subr.bf16.mxu0 %v1135_v37 }
 0x6a7   :  { %5752 = vmatpush3.bf16.msra.mxu1 %v1073_v60  ;;  %5760 = vmatpush3.bf16.msra.mxu0 %v1135_v37 }
 0x6a8   :  { %5753 = vmatprep.subr.bf16.mxu1 %v1060_v51 }
 0x6a9   :  { %v6382_v41 = vpop.eup %6381 }
 0x6aa   :  { %v1031_v31 = vsel %vm8847_vm14, %v6382_v41, 0.0  ;;  %v6384_v7 = vpop.eup %6383 }
 0x6ab   :  { %5754 = vmatpush3.bf16.msra.mxu1 %v1060_v51  ;;  %1032 = vadd.xlane.f32.xlu0 %v1031_v31  ;;  %v1025_v29 = vsel %vm8848_vm13, %v6384_v7, 0.0 }
 0x6ad   :  { %v7353_v8 = vpop.eup %6385 }
 0x6ae   :  { %v1040_v59 = vsel %vm8847_vm14, %v7353_v8, 0.0  ;;  %v7357_v33 = vpop.eup %6387 }
 0x6af   :  { %1041 = vadd.xlane.f32.xlu1 %v1040_v59  ;;  %1026 = vadd.xlane.f32.xlu0 %v1025_v29  ;;  %v1034_v55 = vsel %vm8848_vm13, %v7357_v33, 0.0  ;;  %v6390_v9 = vpop.eup %6389 }
 0x6b0   :  { %v1028_v20 = vsel %vm8848_vm13, %v6390_v9, 0.0 }
 0x6b1   :  { %v6392_v14 = vpop.eup %6391 }
 0x6b2   :  { %v1037_v2 = vsel %vm8848_vm13, %v6392_v14, 0.0 }
 0x6b3   :  { %1035 = vadd.xlane.f32.xlu1 %v1034_v55 }
 0x6b7   :  { %1029 = vadd.xlane.f32.xlu1 %v1028_v20 }
 0x6c5   :  { %1123 = vrot.lane.b32.xlu0 %v7312_v56, %s6677_s18 }
 0x6c8   :  { %1191 = vrot.lane.b32.xlu1 %v7292_v22, %s6682_s16 }
 0x6cc   :  { %1189 = vrot.lane.b32.xlu1 %v7308_v50, %s6682_s16 }
 0x6d0   :  { %1185 = vrot.lane.b32.xlu1 %v7308_v50, %s6683_s0 }
 0x6d4   :  { %1257 = vrot.lane.b32.xlu1 %v7312_v56, %s6682_s16 }
 0x6d8   :  { %1255 = vrot.lane.b32.xlu1 %v7299_v35, %s6683_s0 }
 0x6e4   :  { %1038 = vadd.xlane.f32.xlu0 %v1037_v2 }
 0x6fa   :  { %1259 = vrot.lane.b32.xlu0 %v7299_v35, %s6682_s16 }
 0x6fe   :  { %1187 = vrot.lane.b32.xlu0 %v7292_v22, %s6683_s0 }
 0x702   :  { %1253 = vrot.lane.b32.xlu0 %v7312_v56, %s6683_s0 }
 0x734   :  { %v1033_v52 = vpop.xlane.xlu0 %1032 }
 0x735   :  { %6393 = vrcp.f32 %v1033_v52 }
 0x738   :  { %v1042_v54 = vpop.xlane.xlu1 %1041  ;;  %v1027_v24 = vpop.xlane.xlu0 %1026 }
 0x739   :  { %6395 = vrcp.f32 %v1027_v24 }
 0x73c   :  { %v1036_v13 = vpop.xlane.xlu1 %1035  ;;  %v1124_v25 = vpop.permute.xlu0 %1123 }
 0x73d   :  { %5761 = vmatprep.subr.bf16.mxu0 %v1124_v25 }
 0x73e   :  { %5762 = vmatpush3.bf16.msra.mxu0 %v1124_v25 }
 0x740   :  { %v1030_v32 = vpop.xlane.xlu1 %1029 }
 0x741   :  { %6397 = vrcp.f32 %v1030_v32 }
 0x742   :  { %v6394_v19 = vpop.eup %6393  ;;  %6399 = vrcp.f32 %v1042_v54 }
 0x743   :  { %v1048_v62 = vmul.f32 %v6394_v19, %v6382_v41  ;;  %6401 = vrcp.f32 %v1036_v13 }
 0x744   :  { %v1192_v26 = vpop.permute.xlu1 %1191 }
 0x745   :  { %6139 = vmatprep.subr.msk.bf16.mxu1 %vm860_vm12, %v1192_v26  ;;  %v1056_v44 = vpack.c.bf16 %v1048_v62, %v1048_v62  ;;  %v1203_v38 = vsel %vm860_vm12, %v1192_v26, 0 }
 0x746   :  { %v6396_v17 = vpop.eup %6395 }
 0x747   :  { %v1044_v53 = vmul.f32 %v6396_v17, %v6384_v7 }
 0x748   :  { %v1190_v28 = vpop.permute.xlu1 %1189 }
 0x749   :  { %v1200_v5 = vsel %vm860_vm12, %v1190_v28, 0 }
 0x74c   :  { %v1186_v0 = vpop.permute.xlu1 %1185 }
 0x74e   :  { %v6398_v46 = vpop.eup %6397 }
 0x74f   :  { %v1046_v58 = vmul.f32 %v6398_v46, %v6390_v9  ;;  %v6400_v6 = vpop.eup %6399 }
 0x750   :  { %v6402_v30 = vpop.eup %6401  ;;  %v1054_v47 = vmul.f32 %v6400_v6, %v7353_v8  ;;  %v1258_v3 = vpop.permute.xlu1 %1257 }
 0x751   :  { %v1055_v36 = vpack.c.bf16 %v1046_v58, %v1044_v53  ;;  %v1050_v63 = vmul.f32 %v6402_v30, %v7357_v33  ;;  %v1268_v1 = vsel %vm860_vm12, %v1258_v3, 0 }
 0x752   :  { %v1058_v21 = vpack.c.bf16 %v1054_v47, %v1054_v47 }
 0x753   :  { %5755 = vmatprep.mubr.msk.bf16.mxu1 %vm8848_vm13, %v1055_v36 }
 0x754   :  { %5756 = vmatmul.mubr.msk.bf16.vlgmr.msra.gmra.mxu1 %vm8848_vm13, %v1056_v44  ;;  %v1256_v42 = vpop.permute.xlu1 %1255 }
 0x755   :  { %5768 = vmatpush3.bf16.xpose.msra.mxu1 %v1203_v38  ;;  %5771 = vmatprep.mubr.msk.bf16.mxu1 %vm860_vm12, %v1186_v0 }
 0x756   :  { %6140 = vmatprep.subr.msk.bf16.mxu1 %vm860_vm12, %v1190_v28 }
 0x75d   :  { %5770 = vmatpush3.bf16.xpose.msra.mxu1 %v1200_v5 }
 0x76d   :  { %v1039_v43 = vpop.xlane.xlu0 %1038 }
 0x76e   :  { %6403 = vrcp.f32 %v1039_v43 }
 0x771   :  { %v1260_v45 = vpop.permute.xlu0 %1259 }
 0x772   :  { %6141 = vmatprep.subr.msk.bf16.mxu0 %vm860_vm12, %v1260_v45  ;;  %v1271_v51 = vsel %vm860_vm12, %v1260_v45, 0 }
 0x775   :  { %v1188_v10 = vpop.permute.xlu0 %1187 }
 0x776   :  { %5772 = vmatmul.mubr.msk.bf16.vlgmr.msra.gmra.mxu1 %vm860_vm12, %v1188_v10 }
 0x779   :  { %v1254_v40 = vpop.permute.xlu0 %1253 }
 0x77b   :  { %v6404_v57 = vpop.eup %6403 }
 0x77c   :  { %v1052_v39 = vmul.f32 %v6404_v57, %v6392_v14 }
 0x77e   :  { %v1057_v23 = vpack.c.bf16 %v1052_v39, %v1050_v63 }
 0x780   :  { %5763 = vmatprep.mubr.msk.bf16.mxu0 %vm8848_vm13, %v1057_v23 }
 0x781   :  { %5764 = vmatmul.mubr.msk.bf16.vlgmr.msra.gmra.mxu0 %vm8848_vm13, %v1058_v21 }
 0x782   :  { %5776 = vmatpush3.bf16.xpose.msra.mxu0 %v1271_v51  ;;  %5779 = vmatprep.mubr.msk.bf16.mxu0 %vm860_vm12, %v1254_v40 }
 0x783   :  { %6142 = vmatprep.subr.msk.bf16.mxu0 %vm860_vm12, %v1258_v3 }
 0x78a   :  { %5778 = vmatpush3.bf16.xpose.msra.mxu0 %v1268_v1 }
 0x791   :  { %5780 = vmatmul.mubr.msk.bf16.vlgmr.msra.gmra.mxu0 %vm860_vm12, %v1256_v42 }
 0x814   :  { %v7400_v27 = vpop.f32.mrf.mxu1 }
 0x816   :  { %v7402_v37 = vpop.f32.mrf.mxu1 }
 0x818   :  { %v5758_v60 = vpop.f32.mrf.mxu1 }
 0x81a   :  { %v7404_v41 = vpop.f32.mrf.mxu1 }
 0x836   :  { %v5773_v31 = vpop.f32.mrf.mxu1 }
 0x837   :  { %v1327_v29 = vsel %vm8847_vm14, %v5773_v31, -inf }
 0x838   :  { %v1239_v7 = vpop.f32.mrf.mxu1 }
 0x839   :  { %v1321_v8 = vsel %vm8848_vm13, %v1239_v7, -inf }
 0x83a   :  { %1322 = vmax.xlane.f32.xlu0 %v1321_v8  ;;  %v5774_v59 = vpop.f32.mrf.mxu1 }
 0x83c   :  { %v1242_v33 = vpop.f32.mrf.mxu1 }
 0x83d   :  { %v1324_v55 = vsel %vm8848_vm13, %v1242_v33, -inf }
 0x83e   :  { %1328 = vmax.xlane.f32.xlu0 %v1327_v29  ;;  %1325 = vmax.xlane.f32.xlu1 %v1324_v55 }
 0x841   :  { %v7409_v9 = vpop.f32.mrf.mxu0 }
 0x843   :  { %v7411_v20 = vpop.f32.mrf.mxu0 }
 0x845   :  { %v5766_v18 = vpop.f32.mrf.mxu0 }
 0x847   :  { %v7413_v16 = vpop.f32.mrf.mxu0 }
 0x851   :  { %v5781_v14 = vpop.f32.mrf.mxu0 }
 0x852   :  { %v1336_v2 = vsel %vm8847_vm14, %v5781_v14, -inf }
 0x853   :  { %1337 = vmax.xlane.f32.xlu1 %v1336_v2  ;;  %v1307_v52 = vpop.f32.mrf.mxu0 }
 0x854   :  { %v1330_v54 = vsel %vm8848_vm13, %v1307_v52, -inf }
 0x855   :  { %1331 = vmax.xlane.f32.xlu0 %v1330_v54  ;;  %v5782_v24 = vpop.f32.mrf.mxu0 }
 0x857   :  { %v1310_v13 = vpop.f32.mrf.mxu0 }
 0x858   :  { %v1333_v25 = vsel %vm8848_vm13, %v1310_v13, -inf }
 0x859   :  { %1334 = vmax.xlane.f32.xlu0 %v1333_v25 }
 0x864   :  { %1391 = vrot.lane.b32.xlu1 %v7308_v50, %s6684_s2 }
 0x868   :  { %1455 = vrot.lane.b32.xlu1 %v7299_v35, %s6684_s2 }
 0x86f   :  { %1393 = vrot.lane.b32.xlu0 %v7292_v22, %s6684_s2 }
 0x8c3   :  { %v1323_v32 = vpop.xlane.xlu0 %1322 }
 0x8c4   :  { %v1339_v26 = vsub.f32 %v1239_v7, %v1323_v32 }
 0x8c6   :  { %v1345_v28 = vmul.f32 1.442695, %v1339_v26 }
 0x8c7   :  { %v1329_v19 = vpop.xlane.xlu0 %1328  ;;  %v1326_v62 = vpop.xlane.xlu1 %1325 }
 0x8c8   :  { %v1341_v17 = vsub.f32 %v5773_v31, %v1329_v19  ;;  %v1340_v5 = vsub.f32 %v1242_v33, %v1326_v62 }
 0x8ca   :  { %v1349_v46 = vmul.f32 1.442695, %v1341_v17  ;;  %v1347_v47 = vmul.f32 1.442695, %v1340_v5 }
 0x8cc   :  { %6405 = vpow2.f32 %v1349_v46 }
 0x8cd   :  { %6407 = vpow2.f32 %v1345_v28 }
 0x8d9   :  { %v7424_v53 = vpop.eup %6405 }
 0x8da   :  { %v1363_v58 = vsel %vm8847_vm14, %v7424_v53, 0.0  ;;  %v7428_v36 = vpop.eup %6407 }
 0x8db   :  { %1364 = vadd.xlane.f32.xlu0 %v1363_v58  ;;  %v1357_v10 = vsel %vm8848_vm13, %v7428_v36, 0.0 }
 0x8dc   :  { %v1338_v44 = vpop.xlane.xlu1 %1337 }
 0x8dd   :  { %v1344_v0 = vsub.f32 %v5781_v14, %v1338_v44 }
 0x8de   :  { %v1332_v38 = vpop.xlane.xlu0 %1331 }
 0x8df   :  { %v1355_v43 = vmul.f32 1.442695, %v1344_v0  ;;  %v1342_v45 = vsub.f32 %v1307_v52, %v1332_v38  ;;  %1358 = vadd.xlane.f32.xlu0 %v1357_v10 }
 0x8e0   :  { %v1392_v6 = vpop.permute.xlu1 %1391 }
 0x8e1   :  { %6409 = vpow2.f32 %v1355_v43  ;;  %v1351_v30 = vmul.f32 1.442695, %v1342_v45 }
 0x8e2   :  { %v1335_v57 = vpop.xlane.xlu0 %1334 }
 0x8e3   :  { %6411 = vpow2.f32 %v1351_v30  ;;  %v1343_v31 = vsub.f32 %v1310_v13, %v1335_v57 }
 0x8e4   :  { %v1456_v63 = vpop.permute.xlu1 %1455  ;;  %6413 = vpow2.f32 %v1347_v47 }
 0x8e5   :  { %v1465_v39 = vand.u32 %v1456_v63, %v7348_v49  ;;  %v1353_v7 = vmul.f32 1.442695, %v1343_v31 }
 0x8e6   :  { %v1394_v23 = vpop.permute.xlu0 %1393 }
 0x8e7   :  { %v1403_v21 = vand.u32 %v1394_v23, %v7348_v49  ;;  %5791 = vmatprep.subr.bf16.mxu0 %v1465_v39  ;;  %6415 = vpow2.f32 %v1353_v7 }
 0x8e8   :  { %5792 = vmatpush3.bf16.msra.mxu0 %v1465_v39 }
 0x8e9   :  { %5783 = vmatprep.subr.bf16.mxu1 %v1403_v21 }
 0x8ea   :  { %5784 = vmatpush3.bf16.msra.mxu1 %v1403_v21 }
 0x8eb   :  { %5785 = vmatprep.subr.bf16.mxu1 %v1392_v6 }
 0x8ee   :  { %v7434_v40 = vpop.eup %6409  ;;  %5786 = vmatpush3.bf16.msra.mxu1 %v1392_v6 }
 0x8ef   :  { %v1372_v51 = vsel %vm8847_vm14, %v7434_v40, 0.0 }
 0x8f0   :  { %v7438_v3 = vpop.eup %6411  ;;  %1373 = vadd.xlane.f32.xlu1 %v1372_v51 }
 0x8f1   :  { %v1366_v1 = vsel %vm8848_vm13, %v7438_v3, 0.0  ;;  %v6414_v42 = vpop.eup %6413 }
 0x8f2   :  { %v1360_v60 = vsel %vm8848_vm13, %v6414_v42, 0.0 }
 0x8f4   :  { %1367 = vadd.xlane.f32.xlu1 %v1366_v1  ;;  %v6416_v8 = vpop.eup %6415 }
 0x8f5   :  { %1453 = vrot.lane.b32.xlu0 %v7312_v56, %s6684_s2  ;;  %v1369_v59 = vsel %vm8848_vm13, %v6416_v8, 0.0 }
 0x8f8   :  { %1361 = vadd.xlane.f32.xlu1 %v1360_v60 }
 0x909   :  { %1521 = vrot.lane.b32.xlu1 %v7292_v22, %s6685_s19 }
 0x90d   :  { %1519 = vrot.lane.b32.xlu1 %v7308_v50, %s6685_s19 }
 0x911   :  { %1515 = vrot.lane.b32.xlu1 %v7308_v50, %s6686_s20 }
 0x914   :  { %1370 = vadd.xlane.f32.xlu0 %v1369_v59 }
 0x915   :  { %1587 = vrot.lane.b32.xlu1 %v7312_v56, %s6685_s19 }
 0x919   :  { %1585 = vrot.lane.b32.xlu1 %v7299_v35, %s6686_s20 }
 0x92a   :  { %1589 = vrot.lane.b32.xlu0 %v7299_v35, %s6685_s19 }
 0x92e   :  { %1517 = vrot.lane.b32.xlu0 %v7292_v22, %s6686_s20 }
 0x932   :  { %1583 = vrot.lane.b32.xlu0 %v7312_v56, %s6686_s20 }
 0x964   :  { %v1365_v33 = vpop.xlane.xlu0 %1364 }
 0x965   :  { %6417 = vrcp.f32 %v1365_v33 }
 0x968   :  { %v1359_v29 = vpop.xlane.xlu0 %1358 }
 0x969   :  { %6419 = vrcp.f32 %v1359_v29 }
 0x96c   :  { %v1454_v55 = vpop.permute.xlu0 %1453 }
 0x96d   :  { %5793 = vmatprep.subr.bf16.mxu0 %v1454_v55 }
 0x96e   :  { %5794 = vmatpush3.bf16.msra.mxu0 %v1454_v55 }
 0x972   :  { %v6418_v54 = vpop.eup %6417 }
 0x973   :  { %v1380_v32 = vmul.f32 %v6418_v54, %v7424_v53 }
 0x975   :  { %v1388_v46 = vpack.c.bf16 %v1380_v32, %v1380_v32 }
 0x976   :  { %v6420_v24 = vpop.eup %6419 }
 0x977   :  { %v1376_v26 = vmul.f32 %v6420_v24, %v7428_v36 }
 0x979   :  { %v1374_v18 = vpop.xlane.xlu1 %1373 }
 0x97d   :  { %v1368_v14 = vpop.xlane.xlu1 %1367 }
 0x981   :  { %v1362_v2 = vpop.xlane.xlu1 %1361 }
 0x982   :  { %6421 = vrcp.f32 %v1362_v2 }
 0x983   :  { %6423 = vrcp.f32 %v1374_v18 }
 0x984   :  { %6425 = vrcp.f32 %v1368_v14 }
 0x985   :  { %v1522_v52 = vpop.permute.xlu1 %1521 }
 0x986   :  { %6143 = vmatprep.subr.msk.bf16.mxu1 %vm860_vm12, %v1522_v52  ;;  %v1533_v62 = vsel %vm860_vm12, %v1522_v52, 0 }
 0x989   :  { %v1520_v25 = vpop.permute.xlu1 %1519 }
 0x98a   :  { %v1530_v53 = vsel %vm860_vm12, %v1520_v25, 0 }
 0x98d   :  { %v1516_v28 = vpop.permute.xlu1 %1515 }
 0x98f   :  { %v6422_v13 = vpop.eup %6421 }
 0x990   :  { %v1378_v19 = vmul.f32 %v6422_v13, %v6414_v42  ;;  %v6424_v0 = vpop.eup %6423 }
 0x991   :  { %v6426_v38 = vpop.eup %6425  ;;  %v1386_v43 = vmul.f32 %v6424_v0, %v7434_v40  ;;  %v1588_v63 = vpop.permute.xlu1 %1587 }
 0x992   :  { %v1387_v17 = vpack.c.bf16 %v1378_v19, %v1376_v26  ;;  %v1382_v45 = vmul.f32 %v6426_v38, %v7438_v3  ;;  %v1598_v39 = vsel %vm860_vm12, %v1588_v63, 0 }
 0x993   :  { %v1390_v30 = vpack.c.bf16 %v1386_v43, %v1386_v43 }
 0x994   :  { %5787 = vmatprep.mubr.msk.bf16.mxu1 %vm8848_vm13, %v1387_v17 }
 0x995   :  { %5788 = vmatmul.mubr.msk.bf16.vlgmr.msra.gmra.mxu1 %vm8848_vm13, %v1388_v46  ;;  %v1586_v23 = vpop.permute.xlu1 %1585 }
 0x996   :  { %5800 = vmatpush3.bf16.xpose.msra.mxu1 %v1533_v62  ;;  %5803 = vmatprep.mubr.msk.bf16.mxu1 %vm860_vm12, %v1516_v28 }
 0x997   :  { %6144 = vmatprep.subr.msk.bf16.mxu1 %vm860_vm12, %v1520_v25 }
 0x99d   :  { %v1371_v58 = vpop.xlane.xlu0 %1370 }
 0x99e   :  { %5802 = vmatpush3.bf16.xpose.msra.mxu1 %v1530_v53  ;;  %6427 = vrcp.f32 %v1371_v58 }
 0x9a1   :  { %v1590_v36 = vpop.permute.xlu0 %1589 }
 0x9a2   :  { %6145 = vmatprep.subr.msk.bf16.mxu0 %vm860_vm12, %v1590_v36  ;;  %v1601_v47 = vsel %vm860_vm12, %v1590_v36, 0 }
 0x9a5   :  { %v1518_v44 = vpop.permute.xlu0 %1517 }
 0x9a6   :  { %5804 = vmatmul.mubr.msk.bf16.vlgmr.msra.gmra.mxu1 %vm860_vm12, %v1518_v44 }
 0x9a9   :  { %v1584_v57 = vpop.permute.xlu0 %1583 }
 0x9ab   :  { %v6428_v5 = vpop.eup %6427 }
 0x9ac   :  { %v1384_v10 = vmul.f32 %v6428_v5, %v6416_v8 }
 0x9ae   :  { %v1389_v6 = vpack.c.bf16 %v1384_v10, %v1382_v45 }
 0x9b0   :  { %5795 = vmatprep.mubr.msk.bf16.mxu0 %vm8848_vm13, %v1389_v6 }
 0x9b1   :  { %5796 = vmatmul.mubr.msk.bf16.vlgmr.msra.gmra.mxu0 %vm8848_vm13, %v1390_v30 }
 0x9b2   :  { %5808 = vmatpush3.bf16.xpose.msra.mxu0 %v1601_v47  ;;  %5811 = vmatprep.mubr.msk.bf16.mxu0 %vm860_vm12, %v1584_v57 }
 0x9b3   :  { %6146 = vmatprep.subr.msk.bf16.mxu0 %vm860_vm12, %v1588_v63 }
 0x9ba   :  { %5810 = vmatpush3.bf16.xpose.msra.mxu0 %v1598_v39 }
 0x9c1   :  { %5812 = vmatmul.mubr.msk.bf16.vlgmr.msra.gmra.mxu0 %vm860_vm12, %v1586_v23 }
 0xa55   :  { %v7482_v21 = vpop.f32.mrf.mxu1 }
 0xa57   :  { %v7484_v40 = vpop.f32.mrf.mxu1 }
 0xa59   :  { %v5790_v51 = vpop.f32.mrf.mxu1 }
 0xa5b   :  { %v7486_v3 = vpop.f32.mrf.mxu1 }
 0xa5c   :  { %v6220_v1 = vpack.i.bf16 %v7486_v3, %v7484_v40 }
 0xa66   :  { %v5805_v42 = vpop.f32.mrf.mxu1 }
 0xa67   :  { %v1657_v59 = vsel %vm8847_vm14, %v5805_v42, -inf }
 0xa68   :  { %v1569_v60 = vpop.f32.mrf.mxu1 }
 0xa69   :  { %v1651_v31 = vsel %vm8848_vm13, %v1569_v60, -inf }
 0xa6a   :  { %1652 = vmax.xlane.f32.xlu0 %v1651_v31  ;;  %v5806_v7 = vpop.f32.mrf.mxu1 }
 0xa6c   :  { %v1572_v8 = vpop.f32.mrf.mxu1 }
 0xa6d   :  { %v1654_v33 = vsel %vm8848_vm13, %v1572_v8, -inf }
 0xa6e   :  { %1658 = vmax.xlane.f32.xlu0 %v1657_v59  ;;  %1655 = vmax.xlane.f32.xlu1 %v1654_v33 }
 0xa71   :  { %v7493_v29 = vpop.f32.mrf.mxu0 }
 0xa73   :  { %v7495_v55 = vpop.f32.mrf.mxu0 }
 0xa74   :  { %v6225_v18 = vpack.i.bf16 %v7495_v55, %v7482_v21 }
 0xa75   :  { %v5798_v14 = vpop.f32.mrf.mxu0 }
 0xa77   :  { %v7499_v2 = vpop.f32.mrf.mxu0 }
 0xa78   :  { %v6245_v52 = vpack.i.bf16 %v7493_v29, %v7499_v2 }
 0xa81   :  { %v5813_v54 = vpop.f32.mrf.mxu0 }
 0xa82   :  { %v1666_v24 = vsel %vm8847_vm14, %v5813_v54, -inf }
 0xa83   :  { %1667 = vmax.xlane.f32.xlu1 %v1666_v24  ;;  %v1637_v13 = vpop.f32.mrf.mxu0 }
 0xa84   :  { %v1660_v25 = vsel %vm8848_vm13, %v1637_v13, -inf }
 0xa85   :  { %1661 = vmax.xlane.f32.xlu0 %v1660_v25  ;;  %v5814_v32 = vpop.f32.mrf.mxu0 }
 0xa87   :  { %v1640_v26 = vpop.f32.mrf.mxu0 }
 0xa88   :  { %v1663_v19 = vsel %vm8848_vm13, %v1640_v26, -inf }
 0xa89   :  { %1664 = vmax.xlane.f32.xlu0 %v1663_v19 }
 0xa94   :  { %1721 = vrot.lane.b32.xlu1 %v7308_v50, %s6687_s21 }
 0xa98   :  { %1785 = vrot.lane.b32.xlu1 %v7299_v35, %s6687_s21 }
 0xa9f   :  { %1723 = vrot.lane.b32.xlu0 %v7292_v22, %s6687_s21 }
 0xaf3   :  { %v1653_v17 = vpop.xlane.xlu0 %1652 }
 0xaf4   :  { %v1669_v46 = vsub.f32 %v1569_v60, %v1653_v17 }
 0xaf6   :  { %v1675_v58 = vmul.f32 1.442695, %v1669_v46 }
 0xaf7   :  { %v1659_v28 = vpop.xlane.xlu0 %1658  ;;  %v1656_v36 = vpop.xlane.xlu1 %1655 }
 0xaf8   :  { %v1671_v62 = vsub.f32 %v5805_v42, %v1659_v28  ;;  %v1670_v10 = vsub.f32 %v1572_v8, %v1656_v36 }
 0xafa   :  { %v1679_v53 = vmul.f32 1.442695, %v1671_v62  ;;  %v1677_v23 = vmul.f32 1.442695, %v1670_v10 }
 0xafc   :  { %6429 = vpow2.f32 %v1679_v53 }
 0xafd   :  { %6431 = vpow2.f32 %v1675_v58 }
 0xb09   :  { %v7512_v44 = vpop.eup %6429 }
 0xb0a   :  { %v1693_v0 = vsel %vm8847_vm14, %v7512_v44, 0.0  ;;  %v7516_v38 = vpop.eup %6431 }
 0xb0b   :  { %1694 = vadd.xlane.f32.xlu0 %v1693_v0  ;;  %v1687_v57 = vsel %vm8848_vm13, %v7516_v38, 0.0 }
 0xb0c   :  { %v1668_v5 = vpop.xlane.xlu1 %1667 }
 0xb0d   :  { %v1674_v43 = vsub.f32 %v5813_v54, %v1668_v5 }
 0xb0e   :  { %v1662_v45 = vpop.xlane.xlu0 %1661 }
 0xb0f   :  { %v1685_v6 = vmul.f32 1.442695, %v1674_v43  ;;  %v1672_v30 = vsub.f32 %v1637_v13, %v1662_v45  ;;  %1688 = vadd.xlane.f32.xlu0 %v1687_v57 }
 0xb10   :  { %v1722_v47 = vpop.permute.xlu1 %1721 }
 0xb11   :  { %6433 = vpow2.f32 %v1685_v6  ;;  %v1681_v63 = vmul.f32 1.442695, %v1672_v30 }
 0xb12   :  { %v1665_v39 = vpop.xlane.xlu0 %1664 }
 0xb13   :  { %6435 = vpow2.f32 %v1681_v63  ;;  %v1673_v24 = vsub.f32 %v1640_v26, %v1665_v39 }
 0xb14   :  { %v1786_v51 = vpop.permute.xlu1 %1785  ;;  %6437 = vpow2.f32 %v1677_v23 }
 0xb15   :  { %v1795_v42 = vand.u32 %v1786_v51, %v7348_v49  ;;  %v1683_v13 = vmul.f32 1.442695, %v1673_v24 }
 0xb16   :  { %v1724_v60 = vpop.permute.xlu0 %1723 }
 0xb17   :  { %v1733_v31 = vand.u32 %v1724_v60, %v7348_v49  ;;  %5823 = vmatprep.subr.bf16.mxu0 %v1795_v42  ;;  %6439 = vpow2.f32 %v1683_v13 }
 0xb18   :  { %5824 = vmatpush3.bf16.msra.mxu0 %v1795_v42 }
 0xb19   :  { %5815 = vmatprep.subr.bf16.mxu1 %v1733_v31 }
 0xb1a   :  { %5816 = vmatpush3.bf16.msra.mxu1 %v1733_v31 }
 0xb1b   :  { %5817 = vmatprep.subr.bf16.mxu1 %v1722_v47 }
 0xb1e   :  { %v7522_v7 = vpop.eup %6433  ;;  %5818 = vmatpush3.bf16.msra.mxu1 %v1722_v47 }
 0xb1f   :  { %v1702_v8 = vsel %vm8847_vm14, %v7522_v7, 0.0 }
 0xb20   :  { %v7526_v59 = vpop.eup %6435  ;;  %1703 = vadd.xlane.f32.xlu1 %v1702_v8 }
 0xb21   :  { %v1696_v33 = vsel %vm8848_vm13, %v7526_v59, 0.0  ;;  %v6438_v14 = vpop.eup %6437 }
 0xb22   :  { %v1690_v54 = vsel %vm8848_vm13, %v6438_v14, 0.0 }
 0xb24   :  { %1697 = vadd.xlane.f32.xlu1 %v1696_v33  ;;  %v6440_v25 = vpop.eup %6439 }
 0xb25   :  { %1783 = vrot.lane.b32.xlu0 %v7312_v56, %s6687_s21  ;;  %v1699_v32 = vsel %vm8848_vm13, %v6440_v25, 0.0 }
 0xb28   :  { %1691 = vadd.xlane.f32.xlu1 %v1690_v54 }
 0xb39   :  { %1851 = vrot.lane.b32.xlu1 %v7292_v22, %s6688_s22 }
 0xb3d   :  { %1849 = vrot.lane.b32.xlu1 %v7308_v50, %s6688_s22 }
 0xb41   :  { %1845 = vrot.lane.b32.xlu1 %v7308_v50, %s6689_s23 }
 0xb44   :  { %1700 = vadd.xlane.f32.xlu0 %v1699_v32 }
 0xb45   :  { %1917 = vrot.lane.b32.xlu1 %v7312_v56, %s6688_s22 }
 0xb49   :  { %1915 = vrot.lane.b32.xlu1 %v7299_v35, %s6689_s23 }
 0xb5a   :  { %1919 = vrot.lane.b32.xlu0 %v7299_v35, %s6688_s22 }
 0xb5e   :  { %1847 = vrot.lane.b32.xlu0 %v7292_v22, %s6689_s23 }
 0xb62   :  { %1913 = vrot.lane.b32.xlu0 %v7312_v56, %s6689_s23 }
 0xb94   :  { %v1695_v26 = vpop.xlane.xlu0 %1694 }
 0xb95   :  { %6441 = vrcp.f32 %v1695_v26 }
 0xb98   :  { %v1689_v19 = vpop.xlane.xlu0 %1688 }
 0xb99   :  { %6443 = vrcp.f32 %v1689_v19 }
 0xb9c   :  { %v1784_v17 = vpop.permute.xlu0 %1783 }
 0xb9d   :  { %5825 = vmatprep.subr.bf16.mxu0 %v1784_v17 }
 0xb9e   :  { %5826 = vmatpush3.bf16.msra.mxu0 %v1784_v17 }
 0xba2   :  { %v6442_v58 = vpop.eup %6441 }
 0xba3   :  { %v1710_v43 = vmul.f32 %v6442_v58, %v7512_v44 }
 0xba5   :  { %v1718_v30 = vpack.c.bf16 %v1710_v43, %v1710_v43 }
 0xba6   :  { %v6444_v36 = vpop.eup %6443 }
 0xba7   :  { %v1706_v45 = vmul.f32 %v6444_v36, %v7516_v38 }
 0xba9   :  { %v1704_v46 = vpop.xlane.xlu1 %1703 }
 0xbad   :  { %v1698_v28 = vpop.xlane.xlu1 %1697 }
 0xbb1   :  { %v1692_v62 = vpop.xlane.xlu1 %1691 }
 0xbb2   :  { %6445 = vrcp.f32 %v1692_v62 }
 0xbb3   :  { %6447 = vrcp.f32 %v1704_v46 }
 0xbb4   :  { %6449 = vrcp.f32 %v1698_v28 }
 0xbb5   :  { %v1852_v53 = vpop.permute.xlu1 %1851 }
 0xbb6   :  { %6147 = vmatprep.subr.msk.bf16.mxu1 %vm860_vm12, %v1852_v53  ;;  %v1863_v47 = vsel %vm860_vm12, %v1852_v53, 0 }
 0xbb9   :  { %v1850_v5 = vpop.permute.xlu1 %1849 }
 0xbba   :  { %v1860_v44 = vsel %vm860_vm12, %v1850_v5, 0 }
 0xbbd   :  { %v1846_v57 = vpop.permute.xlu1 %1845 }
 0xbbf   :  { %v6446_v0 = vpop.eup %6445 }
 0xbc0   :  { %v1708_v10 = vmul.f32 %v6446_v0, %v6438_v14  ;;  %v6448_v23 = vpop.eup %6447 }
 0xbc1   :  { %v6450_v51 = vpop.eup %6449  ;;  %v1716_v60 = vmul.f32 %v6448_v23, %v7522_v7  ;;  %v1918_v13 = vpop.permute.xlu1 %1917 }
 0xbc2   :  { %v1717_v6 = vpack.c.bf16 %v1708_v10, %v1706_v45  ;;  %v1712_v31 = vmul.f32 %v6450_v51, %v7526_v59  ;;  %v1928_v7 = vsel %vm860_vm12, %v1918_v13, 0 }
 0xbc3   :  { %v1720_v14 = vpack.c.bf16 %v1716_v60, %v1716_v60 }
 0xbc4   :  { %5819 = vmatprep.mubr.msk.bf16.mxu1 %vm8848_vm13, %v1717_v6 }
 0xbc5   :  { %5820 = vmatmul.mubr.msk.bf16.vlgmr.msra.gmra.mxu1 %vm8848_vm13, %v1718_v30  ;;  %v1916_v59 = vpop.permute.xlu1 %1915 }
 0xbc6   :  { %5832 = vmatpush3.bf16.xpose.msra.mxu1 %v1863_v47  ;;  %5835 = vmatprep.mubr.msk.bf16.mxu1 %vm860_vm12, %v1846_v57 }
 0xbc7   :  { %6148 = vmatprep.subr.msk.bf16.mxu1 %vm860_vm12, %v1850_v5 }
 0xbcd   :  { %v1701_v38 = vpop.xlane.xlu0 %1700 }
 0xbce   :  { %5834 = vmatpush3.bf16.xpose.msra.mxu1 %v1860_v44  ;;  %6451 = vrcp.f32 %v1701_v38 }
 0xbd1   :  { %v1920_v63 = vpop.permute.xlu0 %1919 }
 0xbd2   :  { %6149 = vmatprep.subr.msk.bf16.mxu0 %vm860_vm12, %v1920_v63  ;;  %v1931_v24 = vsel %vm860_vm12, %v1920_v63, 0 }
 0xbd5   :  { %v1848_v39 = vpop.permute.xlu0 %1847 }
 0xbd6   :  { %5836 = vmatmul.mubr.msk.bf16.vlgmr.msra.gmra.mxu1 %vm860_vm12, %v1848_v39 }
 0xbd9   :  { %v1914_v54 = vpop.permute.xlu0 %1913 }
 0xbdb   :  { %v6452_v42 = vpop.eup %6451 }
 0xbdc   :  { %v1714_v8 = vmul.f32 %v6452_v42, %v6440_v25 }
 0xbde   :  { %v1719_v33 = vpack.c.bf16 %v1714_v8, %v1712_v31 }
 0xbe0   :  { %5827 = vmatprep.mubr.msk.bf16.mxu0 %vm8848_vm13, %v1719_v33 }
 0xbe1   :  { %5828 = vmatmul.mubr.msk.bf16.vlgmr.msra.gmra.mxu0 %vm8848_vm13, %v1720_v14 }
 0xbe2   :  { %5840 = vmatpush3.bf16.xpose.msra.mxu0 %v1931_v24  ;;  %5843 = vmatprep.mubr.msk.bf16.mxu0 %vm860_vm12, %v1914_v54 }
 0xbe3   :  { %6150 = vmatprep.subr.msk.bf16.mxu0 %vm860_vm12, %v1918_v13 }
 0xbea   :  { %5842 = vmatpush3.bf16.xpose.msra.mxu0 %v1928_v7 }
 0xbf1   :  { %5844 = vmatmul.mubr.msk.bf16.vlgmr.msra.gmra.mxu0 %vm860_vm12, %v1916_v59 }
 0xc85   :  { %v7570_v25 = vpop.f32.mrf.mxu1 }
 0xc87   :  { %v7572_v32 = vpop.f32.mrf.mxu1 }
 0xc89   :  { %v5822_v26 = vpop.f32.mrf.mxu1 }
 0xc8b   :  { %v7574_v19 = vpop.f32.mrf.mxu1 }
 0xc8c   :  { %v6230_v17 = vpack.i.bf16 %v7574_v19, %v7572_v32 }
 0xc96   :  { %v5837_v46 = vpop.f32.mrf.mxu1 }
 0xc97   :  { %v1987_v36 = vsel %vm8847_vm14, %v5837_v46, -inf }
 0xc98   :  { %v1899_v28 = vpop.f32.mrf.mxu1 }
 0xc99   :  { %v1981_v62 = vsel %vm8848_vm13, %v1899_v28, -inf }
 0xc9a   :  { %1982 = vmax.xlane.f32.xlu0 %v1981_v62  ;;  %v5838_v53 = vpop.f32.mrf.mxu1 }
 0xc9c   :  { %v1902_v58 = vpop.f32.mrf.mxu1 }
 0xc9d   :  { %v1984_v0 = vsel %vm8848_vm13, %v1902_v58, -inf }
 0xc9e   :  { %1988 = vmax.xlane.f32.xlu0 %v1987_v36  ;;  %1985 = vmax.xlane.f32.xlu1 %v1984_v0 }
 0xca1   :  { %v7581_v5 = vpop.f32.mrf.mxu0 }
 0xca3   :  { %v7583_v43 = vpop.f32.mrf.mxu0 }
 0xca4   :  { %v6235_v45 = vpack.i.bf16 %v7583_v43, %v7570_v25 }
 0xca5   :  { %v5830_v10 = vpop.f32.mrf.mxu0 }
 0xca7   :  { %v7587_v6 = vpop.f32.mrf.mxu0 }
 0xca8   :  { %v6250_v30 = vpack.i.bf16 %v7581_v5, %v7587_v6 }
 0xcb1   :  { %v5845_v57 = vpop.f32.mrf.mxu0 }
 0xcb2   :  { %v1996_v47 = vsel %vm8847_vm14, %v5845_v57, -inf }
 0xcb3   :  { %1997 = vmax.xlane.f32.xlu1 %v1996_v47  ;;  %v1967_v44 = vpop.f32.mrf.mxu0 }
 0xcb4   :  { %v1990_v38 = vsel %vm8848_vm13, %v1967_v44, -inf }
 0xcb5   :  { %1991 = vmax.xlane.f32.xlu0 %v1990_v38  ;;  %v5846_v63 = vpop.f32.mrf.mxu0 }
 0xcb7   :  { %v1970_v39 = vpop.f32.mrf.mxu0 }
 0xcb8   :  { %v1993_v23 = vsel %vm8848_vm13, %v1970_v39, -inf }
 0xcb9   :  { %1994 = vmax.xlane.f32.xlu0 %v1993_v23 }
 0xd23   :  { %v1983_v51 = vpop.xlane.xlu0 %1982 }
 0xd24   :  { %v1999_v42 = vsub.f32 %v1899_v28, %v1983_v51 }
 0xd26   :  { %v2005_v33 = vmul.f32 1.442695, %v1999_v42 }
 0xd27   :  { %v1989_v60 = vpop.xlane.xlu0 %1988  ;;  %v1986_v14 = vpop.xlane.xlu1 %1985 }
 0xd28   :  { %v2001_v31 = vsub.f32 %v5837_v46, %v1989_v60  ;;  %v2000_v26 = vsub.f32 %v1902_v58, %v1986_v14 }
 0xd2a   :  { %v2009_v8 = vmul.f32 1.442695, %v2001_v31  ;;  %v2007_v0 = vmul.f32 1.442695, %v2000_v26 }
 0xd2c   :  { %6453 = vpow2.f32 %v2009_v8 }
 0xd2d   :  { %6455 = vpow2.f32 %v2005_v33 }
 0xd39   :  { %v7594_v54 = vpop.eup %6453 }
 0xd3a   :  { %v2023_v24 = vsel %vm8847_vm14, %v7594_v54, 0.0  ;;  %v7598_v13 = vpop.eup %6455 }
 0xd3b   :  { %2024 = vadd.xlane.f32.xlu0 %v2023_v24  ;;  %v2017_v46 = vsel %vm8848_vm13, %v7598_v13, 0.0 }
 0xd3c   :  { %v1998_v7 = vpop.xlane.xlu1 %1997 }
 0xd3d   :  { %v2004_v59 = vsub.f32 %v5845_v57, %v1998_v7 }
 0xd3e   :  { %v1992_v62 = vpop.xlane.xlu0 %1991 }
 0xd3f   :  { %v2015_v28 = vmul.f32 1.442695, %v2004_v59  ;;  %v2002_v53 = vsub.f32 %v1967_v44, %v1992_v62  ;;  %2018 = vadd.xlane.f32.xlu0 %v2017_v46 }
 0xd41   :  { %6457 = vpow2.f32 %v2015_v28  ;;  %v2011_v36 = vmul.f32 1.442695, %v2002_v53 }
 0xd42   :  { %v1995_v10 = vpop.xlane.xlu0 %1994 }
 0xd43   :  { %6459 = vpow2.f32 %v2011_v36  ;;  %v2003_v47 = vsub.f32 %v1970_v39, %v1995_v10  ;;  %v6333_v36 = vld [vmem:[%s8818_s6 + $0x8] sm:$0xff]  }
 0xd44   :  { %6461 = vpow2.f32 %v2007_v0 }
 0xd45   :  { %v2013_v38 = vmul.f32 1.442695, %v2003_v47 }
 0xd47   :  { %6463 = vpow2.f32 %v2013_v38  ;;  %v6334_v38 = vld [vmem:[%s8818_s6] sm:$0xff]  }
 0xd4e   :  { %v6458_v63 = vpop.eup %6457 }
 0xd4f   :  { %v2032_v57 = vsel %vm8847_vm14, %v6458_v63, 0.0  ;;  %vm2273_vm14 = vcmask 1046528  }
 0xd50   :  { %v6460_v58 = vpop.eup %6459  ;;  %2033 = vadd.xlane.f32.xlu1 %v2032_v57 }
 0xd51   :  { %v6462_v23 = vpop.eup %6461  ;;  %v2026_v44 = vsel %vm8848_vm13, %v6460_v58, 0.0 }
 0xd52   :  { %v2020_v60 = vsel %vm8848_vm13, %v6462_v23, 0.0 }
 0xd54   :  { %v6464_v51 = vpop.eup %6463  ;;  %2027 = vadd.xlane.f32.xlu1 %v2026_v44 }
 0xd55   :  { %v2029_v42 = vsel %vm8848_vm13, %v6464_v51, 0.0 }
 0xd56   :  { %2030 = vadd.xlane.f32.xlu0 %v2029_v42 }
 0xd58   :  { %2021 = vadd.xlane.f32.xlu1 %v2020_v60 }
 0xd69   :  { %2051 = vrot.lane.b32.xlu1 %v7308_v50, %s6690_s24 }
 0xd6c   :  { %2053 = vrot.lane.b32.xlu0 %v7292_v22, %s6690_s24 }
 0xd6d   :  { %2115 = vrot.lane.b32.xlu1 %v7299_v35, %s6690_s24 }
 0xd70   :  { %6221 = vrot.lane.b32.xlu0 %v6220_v1, %s6691_s25 }
 0xd71   :  { %2113 = vrot.lane.b32.xlu1 %v7312_v56, %s6690_s24 }
 0xd74   :  { %6231 = vrot.lane.b32.xlu0 %v6230_v17, %s8851_s26 }
 0xd75   :  { %6226 = vrot.lane.b32.xlu1 %v6225_v18, %s6691_s25 }
 0xd79   :  { %6236 = vrot.lane.b32.xlu1 %v6235_v45, %s8851_s26 }
 0xdc4   :  { %v2025_v22 = vpop.xlane.xlu0 %2024 }
 0xdc5   :  { %6465 = vrcp.f32 %v2025_v22 }
 0xdc8   :  { %v2019_v50 = vpop.xlane.xlu0 %2018 }
 0xdd2   :  { %v6466_v18 = vpop.eup %6465 }
 0xdd3   :  { %v2040_v24 = vmul.f32 %v6466_v18, %v7594_v54 }
 0xdd5   :  { %v2048_v53 = vpack.c.bf16 %v2040_v24, %v2040_v24 }
 0xdd9   :  { %v2034_v35 = vpop.xlane.xlu1 %2033 }
 0xdda   :  { %6467 = vrcp.f32 %v2034_v35 }
 0xddd   :  { %v2028_v56 = vpop.xlane.xlu1 %2027 }
 0xdde   :  { %6469 = vrcp.f32 %v2028_v56 }
 0xddf   :  { %6471 = vrcp.f32 %v2019_v50  ;;  %v2031_v40 = vpop.xlane.xlu0 %2030 }
 0xde0   :  { %6473 = vrcp.f32 %v2031_v40 }
 0xde1   :  { %v2022_v3 = vpop.xlane.xlu1 %2021 }
 0xde2   :  { %6475 = vrcp.f32 %v2022_v3 }
 0xde3   :  { %v2054_v1 = vpop.permute.xlu0 %2053 }
 0xde4   :  { %v2063_v21 = vand.u32 %v2054_v1, %v7348_v49 }
 0xde5   :  { %v2052_v55 = vpop.permute.xlu1 %2051 }
 0xde6   :  { %5847 = vmatprep.subr.bf16.mxu1 %v2063_v21 }
 0xde7   :  { %5848 = vmatpush3.bf16.msra.mxu1 %v2063_v21  ;;  %v6468_v32 = vpop.eup %6467 }
 0xde8   :  { %5849 = vmatprep.subr.bf16.mxu1 %v2052_v55  ;;  %v2046_v33 = vmul.f32 %v6468_v32, %v6458_v63 }
 0xde9   :  { %v2116_v25 = vpop.permute.xlu1 %2115 }
 0xdea   :  { %v2125_v19 = vand.u32 %v2116_v25, %v7348_v49  ;;  %v2050_v28 = vpack.c.bf16 %v2046_v33, %v2046_v33 }
 0xdeb   :  { %v6470_v17 = vpop.eup %6469  ;;  %5850 = vmatpush3.bf16.msra.mxu1 %v2052_v55 }
 0xdec   :  { %v6472_v43 = vpop.eup %6471  ;;  %5855 = vmatprep.subr.bf16.mxu0 %v2125_v19  ;;  %5863 = vmatprep.subr.bf16.mxu1 %v8871_v48  ;;  %v2042_v31 = vmul.f32 %v6470_v17, %v6460_v58 }
 0xded   :  { %v6474_v45 = vpop.eup %6473  ;;  %5856 = vmatpush3.bf16.msra.mxu0 %v2125_v19  ;;  %v2114_v39 = vpop.permute.xlu1 %2113  ;;  %v2036_v59 = vmul.f32 %v6472_v43, %v7598_v13 }
 0xdee   :  { %5857 = vmatprep.subr.bf16.mxu0 %v2114_v39  ;;  %v2044_v8 = vmul.f32 %v6474_v45, %v6464_v51 }
 0xdef   :  { %v6476_v14 = vpop.eup %6475 }
 0xdf0   :  { %v2049_v7 = vpack.c.bf16 %v2044_v8, %v2042_v31  ;;  %v2038_v26 = vmul.f32 %v6476_v14, %v6462_v23 }
 0xdf1   :  { %5858 = vmatpush3.bf16.msra.mxu0 %v2114_v39  ;;  %v6227_v6 = vpop.permute.xlu1 %6226 }
 0xdf2   :  { %5859 = vmatprep.mubr.msk.bf16.mxu0 %vm8848_vm13, %v2049_v7  ;;  %v2047_v62 = vpack.c.bf16 %v2038_v26, %v2036_v59  ;;  %5879 = vmatprep.subr.bf16.mxu0 %v8871_v48  ;;  %v6228_v51 = vunpack.i.l.bf16 %v6227_v6  ;;  %v6229_v39 = vunpack.i.h.bf16 %v6227_v6 }
 0xdf4   :  { %5851 = vmatprep.mubr.msk.bf16.mxu1 %vm8848_vm13, %v2047_v62  ;;  %5860 = vmatmul.mubr.msk.bf16.vlgmr.msra.gmra.mxu0 %vm8848_vm13, %v2050_v28  ;;  %v2249_v29 = vsel %vm860_vm12, %v7400_v27, %v6228_v51 }
 0xdf5   :  { %5852 = vmatmul.mubr.msk.bf16.vlgmr.msra.gmra.mxu1 %vm8848_vm13, %v2048_v53  ;;  %5883 = vmatprep.mubr.msk.bf16.mxu0 %vm6679_vm3, %v8871_v48  ;;  %v6237_v23 = vpop.permute.xlu1 %6236  ;;  %vm2289_vm13 = vcmask 1041409  }
 0xdf6   :  { %5867 = vmatprep.mubr.msk.bf16.mxu1 %vm6679_vm3, %v8871_v48  ;;  %5864 = vmatpush3.bf16.msra.mxu1 %v6333_v36  ;;  %v6238_v60 = vunpack.i.l.bf16 %v6237_v23  ;;  %v6239_v8 = vunpack.i.h.bf16 %v6237_v23 }
 0xdf7   :  { %5865 = vmatprep.subr.bf16.mxu1 %v8871_v48 }
 0xdfa   :  { %5866 = vmatpush3.bf16.msra.mxu1 %v6334_v38 }
 0xdfb   :  { %5895 = vmatprep.subr.bf16.mxu1 %v8871_v48 }
 0xeb4   :  { %v5861_v54 = vpop.f32.mrf.mxu0 }
 0xeb5   :  { %v5853_v13 = vpop.f32.mrf.mxu1 }
 0xeb6   :  { %v2161_v46 = vpop.f32.mrf.mxu0  ;;  %2233 = vrot.lane.b32.xlu1 %v5853_v13, %s8849_s27  ;;  %v2250_v13 = vsel %vm860_vm12, %v7411_v20, %v6229_v39 }
 0xeb7   :  { %v2099_v0 = vpop.f32.mrf.mxu1 }
 0xeb8   :  { %v5862_v10 = vpop.f32.mrf.mxu0 }
 0xeb9   :  { %v5854_v47 = vpop.f32.mrf.mxu1 }
 0xeba   :  { %6251 = vrot.lane.b32.xlu1 %v6250_v30, %s8851_s26  ;;  %v2164_v58 = vpop.f32.mrf.mxu0  ;;  %v6222_v30 = vpop.permute.xlu0 %6221 }
 0xebb   :  { %v2102_v63 = vpop.f32.mrf.mxu1  ;;  %v6255_v5 = vpack.i.bf16 %v2164_v58, %v2161_v46  ;;  %v6224_v42 = vunpack.i.h.bf16 %v6222_v30  ;;  %v6223_v35 = vunpack.i.l.bf16 %v6222_v30 }
 0xebc   :  { %v6240_v57 = vpack.i.bf16 %v2102_v63, %v2099_v0 }
 0xebd   :  { %v2248_v2 = vsel %vm860_vm12, %v7404_v41, %v6224_v42  ;;  %v2247_v3 = vsel %vm860_vm12, %v7402_v37, %v6223_v35 }
 0xebe   :  { %2239 = vrot.lane.b32.xlu1 %v5861_v54, %s8849_s27  ;;  %6241 = vrot.lane.b32.xlu0 %v6240_v57, %s8849_s27  ;;  %v6232_v44 = vpop.permute.xlu0 %6231 }
 0xebf   :  { %v6234_v50 = vunpack.i.h.bf16 %v6232_v44  ;;  %v6233_v56 = vunpack.i.l.bf16 %v6232_v44  ;;  %v5354_v44 = vld [vmem:[%s8821_s9 + $0x4] ss:$0 sm:$0xff] }
 0xec1   :  { %v2254_v18 = vsel %vm2253_vm0, %v2247_v3, %v6233_v56  ;;  %v2255_v25 = vsel %vm2253_vm0, %v2248_v2, %v6234_v50 }
 0xec2   :  { %6246 = vrot.lane.b32.xlu0 %v6245_v52, %s6691_s25  ;;  %v2256_v52 = vsel %vm2253_vm0, %v2249_v29, %v6238_v60 }
 0xec6   :  { %6256 = vrot.lane.b32.xlu0 %v6255_v5, %s8849_s27 }
 0xf28   :  { %v2234_v22 = vpop.permute.xlu1 %2233 }
 0xf29   :  { %v2263_v1 = vsel %vm2260_vm15, %v2256_v52, %v2234_v22 }
 0xf2a   :  { %v2277_v19 = vrot.slane %v2263_v1, 1 }
 0xf2c   :  { %v6252_v32 = vpop.permute.xlu1 %6251 }
 0xf2d   :  { %v6254_v33 = vunpack.i.h.bf16 %v6252_v32  ;;  %v6253_v62 = vunpack.i.l.bf16 %v6252_v32  ;;  %v8873_v32 = vld [vmem:[#allocation8_spill] sm:$0xff] }
 0xf30   :  { %v6242_v40 = vpop.permute.xlu0 %6241  ;;  %v2240_v28 = vpop.permute.xlu1 %2239 }
 0xf31   :  { %v6244_v21 = vunpack.i.h.bf16 %v6242_v40  ;;  %v6243_v55 = vunpack.i.l.bf16 %v6242_v40 }
 0xf33   :  { %v2261_v27 = vsel %vm2260_vm15, %v2254_v18, %v6243_v55  ;;  %v2262_v41 = vsel %vm2260_vm15, %v2255_v25, %v6244_v21 }
 0xf34   :  { %v2274_v17 = vrot.slane %v2261_v27, 1  ;;  %v2275_v43 = vrot.slane %v2262_v41, 1  ;;  %v6247_v45 = vpop.permute.xlu0 %6246 }
 0xf35   :  { %v6249_v37 = vunpack.i.h.bf16 %v6247_v45  ;;  %v6248_v31 = vunpack.i.l.bf16 %v6247_v45 }
 0xf36   :  { %v2276_v14 = vsel %vm2273_vm14, %v2274_v17, %v2275_v43  ;;  %v2278_v24 = vsel %vm2273_vm14, %v2275_v43, %v2277_v19 }
 0xf37   :  { %v2252_v7 = vsel %vm860_vm12, %v7409_v9, %v6249_v37  ;;  %v2251_v59 = vsel %vm860_vm12, %v7413_v16, %v6248_v31  ;;  %v2292_v26 = vpack.c.bf16 %v2278_v24, %v2276_v14  ;;  %v2257_v9 = vsel %vm2253_vm0, %v2250_v13, %v6239_v8 }
 0xf38   :  { %v2259_v53 = vsel %vm2253_vm0, %v2252_v7, %v6254_v33  ;;  %v6257_v54 = vpop.permute.xlu0 %6256  ;;  %v2258_v10 = vsel %vm2253_vm0, %v2251_v59, %v6253_v62 }
 0xf39   :  { %v2266_v46 = vsel %vm2260_vm15, %v2259_v53, %v2240_v28  ;;  %v6259_v36 = vunpack.i.h.bf16 %v6257_v54  ;;  %v6258_v0 = vunpack.i.l.bf16 %v6257_v54  ;;  %5868 = vmatmul.mubr.msk.bf16.vlgmr.msra.gmra.mxu1 %vm136_vm1, %v2292_v26 }
 0xf3a   :  { %5871 = vmatprep.mubr.msk.bf16.mxu1 %vm6679_vm3, %v8871_v48  ;;  %v2282_v38 = vrot.slane %v2266_v46, 1 }
 0xf3b   :  { %v2264_v16 = vsel %vm2260_vm15, %v2257_v9, %v6258_v0  ;;  %v2265_v47 = vsel %vm2260_vm15, %v2258_v10, %v6259_v36 }
 0xf3c   :  { %v2279_v63 = vrot.slane %v2264_v16, 1  ;;  %v2280_v20 = vrot.slane %v2265_v47, 1  ;;  %v2288_v6 = vrot.slane %v2264_v16, 7 }
 0xf3e   :  { %v2281_v57 = vsel %vm2273_vm14, %v2279_v63, %v2280_v20  ;;  %v2283_v58 = vsel %vm2273_vm14, %v2280_v20, %v2282_v38  ;;  %v2290_v30 = vsel %vm2289_vm13, %v2288_v6, %v2261_v27  ;;  %v6336_v6 = vld [vmem:[%s8819_s7] sm:$0xff]  }
 0xf3f   :  { %v2293_v5 = vpack.c.bf16 %v2283_v58, %v2281_v57  ;;  %v2294_v23 = vpack.c.bf16 %v2290_v30, %v2290_v30 }
 0xf41   :  { %5872 = vmatmul.mubr.msk.bf16.gmra.mxu1 %vm136_vm1, %v2293_v5  ;;  %v6335_v5 = vld [vmem:[%s8819_s7 + $0x8] sm:$0xff]  }
 0xf42   :  { %5875 = vmatprep.mubr.msk.bf16.mxu1 %vm6679_vm3, %v8871_v48  ;;  %5880 = vmatpush3.bf16.msra.mxu0 %v6335_v5 }
 0xf43   :  { %5881 = vmatprep.subr.bf16.mxu0 %v8871_v48 }
 0xf46   :  { %5882 = vmatpush3.bf16.msra.mxu0 %v6336_v6 }
 0xf47   :  { %5923 = vmatprep.subr.bf16.mxu0 %v8871_v48 }
 0xf49   :  { %5876 = vmatmul.mubr.msk.bf16.gmra.mxu1 %vm136_vm1, %v2294_v23 }
 0xf4a   :  { %5911 = vmatprep.mubr.msk.bf16.mxu1 %vm6679_vm3, %v8871_v48 }
 0xff9   :  { %v2359_v51 = vpop.f32.mrf.mxu1 }
 0xffa   :  { %v2360_v42 = vadd.f32 %v5354_v44, %v2359_v51 }
 0xffb   :  { %v5869_v60 = vpop.f32.mrf.mxu1 }
 0xffc   :  { %v7706_v22 = vadd.f32 %v2360_v42, %v6800_v61 }
 0xffd   :  { %v2362_v35 = vpop.f32.mrf.mxu1 }
 0xffe   :  { %v2363_v50 = vadd.f32 %v5354_v44, %v2362_v35  ;;  %v2388_v56 = vsel %vm136_vm1, %v7706_v22, 0.0 }
 0xfff   :  { %2389 = vadd.xlane.f32.xlu0 %v2388_v56  ;;  %v5870_v29 = vpop.f32.mrf.mxu1 }
0x1000   :  { %v7711_v2 = vadd.f32 %v2363_v50, %v6804_v4 }
0x1001   :  { %v2367_v52 = vpop.f32.mrf.mxu1 }
0x1002   :  { %v2368_v40 = vadd.f32 %v5354_v44, %v2367_v52  ;;  %v2391_v3 = vsel %vm136_vm1, %v7711_v2, 0.0 }
0x1003   :  { %2392 = vadd.xlane.f32.xlu1 %v2391_v3  ;;  %v5873_v1 = vpop.f32.mrf.mxu1 }
0x1004   :  { %v7716_v61 = vadd.f32 %v2368_v40, %v6815_v11  ;;  %v6623_v11 = vld [vmem:[%s8815_s3 + $0x3] ss:$0 sm:$0xff] }
0x1005   :  { %v2370_v21 = vpop.f32.mrf.mxu1 }
0x1006   :  { %v2371_v55 = vadd.f32 %v5354_v44, %v2370_v21  ;;  %v2394_v18 = vsel %vm136_vm1, %v7716_v61, 0.0 }
0x1007   :  { %2395 = vadd.xlane.f32.xlu0 %v2394_v18  ;;  %v5874_v25 = vpop.f32.mrf.mxu1 }
0x1008   :  { %v7721_v4 = vadd.f32 %v2371_v55, %v8873_v32  ;;  %v5360_v25 = vld [vmem:[%s8821_s9 + $0x2] ss:$0 sm:$0xff] }
0x1009   :  { %v2375_v27 = vpop.f32.mrf.mxu1 }
0x100a   :  { %v2376_v41 = vadd.f32 %v5354_v44, %v2375_v27  ;;  %v2397_v19 = vsel %vm136_vm1, %v7721_v4, 0.0 }
0x100b   :  { %2398 = vadd.xlane.f32.xlu0 %v2397_v19  ;;  %v5877_v17 = vpop.f32.mrf.mxu1  ;;  %v5361_v19 = vld [vmem:[%s8821_s9 + $0x3] ss:$0 sm:$0xff] }
0x100c   :  { %v7728_v43 = vadd.f32 %v6623_v11, %v2376_v41 }
0x100d   :  { %v2378_v45 = vpop.f32.mrf.mxu1 }
0x100e   :  { %v2400_v39 = vsel %vm225_vm2, %v7728_v43, 0.0 }
0x100f   :  { %2401 = vadd.xlane.f32.xlu0 %v2400_v39  ;;  %v5878_v37 = vpop.f32.mrf.mxu1 }
0x1088   :  { %v2390_v31 = vpop.xlane.xlu0 %2389 }
0x1089   :  { %v2403_v8 = vmul.f32 0.03125, %v2390_v31 }
0x108b   :  { %v2408_v33 = vsub.f32 %v7706_v22, %v2403_v8 }
0x108c   :  { %v2393_v14 = vpop.xlane.xlu1 %2392 }
0x108d   :  { %v2404_v24 = vmul.f32 0.03125, %v2393_v14  ;;  %v2413_v7 = vmul.f32 %v2408_v33, %v2408_v33 }
0x108f   :  { %v2409_v59 = vsub.f32 %v7711_v2, %v2404_v24  ;;  %v2418_v26 = vsel %vm136_vm1, %v2413_v7, 0.0 }
0x1090   :  { %2419 = vadd.xlane.f32.xlu1 %v2418_v26  ;;  %v2396_v62 = vpop.xlane.xlu0 %2395 }
0x1091   :  { %v2405_v28 = vmul.f32 0.03125, %v2396_v62  ;;  %v2414_v53 = vmul.f32 %v2409_v59, %v2409_v59 }
0x1093   :  { %v2410_v54 = vsub.f32 %v7716_v61, %v2405_v28  ;;  %v2421_v13 = vsel %vm136_vm1, %v2414_v53, 0.0 }
0x1094   :  { %v2399_v46 = vpop.xlane.xlu0 %2398  ;;  %2422 = vadd.xlane.f32.xlu0 %v2421_v13 }
0x1095   :  { %v2406_v36 = vmul.f32 0.03125, %v2399_v46  ;;  %v2415_v0 = vmul.f32 %v2410_v54, %v2410_v54  ;;  %v6337_v46 = vld [vmem:[%s8820_s8 + $0x38] sm:$0xff]  }
0x1096   :  { %5896 = vmatpush3.bf16.msra.mxu1 %v6337_v46 }
0x1097   :  { %v2411_v9 = vsub.f32 %v7721_v4, %v2406_v36  ;;  %v2424_v10 = vsel %vm136_vm1, %v2415_v0, 0.0  ;;  %v6338_v36 = vld [vmem:[%s8820_s8 + $0x30] sm:$0xff]   ;;  %5897 = vmatprep.subr.bf16.mxu1 %v8871_v48  ;;  %v6339_v0 = vld [vmem:[%s8820_s8 + $0x28] sm:$0xff]  }
0x1098   :  { %2425 = vadd.xlane.f32.xlu1 %v2424_v10  ;;  %v2402_v16 = vpop.xlane.xlu0 %2401  ;;  %v6341_v10 = vld [vmem:[%s8820_s8 + $0x18] sm:$0xff]  }
0x1099   :  { %v2407_v47 = vmul.f32 0.03125, %v2402_v16  ;;  %v2416_v38 = vmul.f32 %v2411_v9, %v2411_v9  ;;  %v6342_v16 = vld [vmem:[%s8820_s8 + $0x10] sm:$0xff]  }
0x109a   :  { %5898 = vmatpush3.bf16.msra.mxu1 %v6338_v36 }
0x109b   :  { %v2412_v63 = vsub.f32 %v7728_v43, %v2407_v47  ;;  %v2427_v20 = vsel %vm136_vm1, %v2416_v38, 0.0  ;;  %5899 = vmatprep.subr.bf16.mxu1 %v8871_v48  ;;  %v6343_v47 = vld [vmem:[%s8820_s8 + $0x8] sm:$0xff]   ;;  %v6344_v38 = vld [vmem:[%s8820_s8] sm:$0xff]  }
0x109c   :  { %2428 = vadd.xlane.f32.xlu0 %v2427_v20 }
0x109d   :  { %v2417_v57 = vmul.f32 %v2412_v63, %v2412_v63 }
0x109e   :  { %5900 = vmatpush3.bf16.msra.mxu1 %v6339_v0 }
0x109f   :  { %v2430_v58 = vsel %vm225_vm2, %v2417_v57, 0.0  ;;  %5901 = vmatprep.subr.bf16.mxu1 %v8871_v48 }
0x10a0   :  { %2431 = vadd.xlane.f32.xlu1 %v2430_v58 }
0x1119   :  { %v2420_v30 = vpop.xlane.xlu1 %2419 }
0x111a   :  { %v2433_v23 = vmul.f32 0.03125, %v2420_v30 }
0x111c   :  { %v2438_v44 = vadd.f32 1e-05, %v2433_v23 }
0x111d   :  { %v2423_v51 = vpop.xlane.xlu0 %2422 }
0x111e   :  { %6477 = vrsqrt.f32 %v2438_v44  ;;  %v2434_v42 = vmul.f32 0.03125, %v2423_v51 }
0x1120   :  { %v2439_v60 = vadd.f32 1e-05, %v2434_v42 }
0x1121   :  { %v2426_v35 = vpop.xlane.xlu1 %2425 }
0x1122   :  { %6479 = vrsqrt.f32 %v2439_v60  ;;  %v2435_v50 = vmul.f32 0.03125, %v2426_v35 }
0x1124   :  { %v2440_v56 = vadd.f32 1e-05, %v2435_v50 }
0x1125   :  { %v2429_v29 = vpop.xlane.xlu0 %2428 }
0x1126   :  { %6481 = vrsqrt.f32 %v2440_v56  ;;  %v2436_v52 = vmul.f32 0.03125, %v2429_v29 }
0x1128   :  { %v2441_v40 = vadd.f32 1e-05, %v2436_v52 }
0x1129   :  { %v2432_v3 = vpop.xlane.xlu1 %2431 }
0x112a   :  { %6483 = vrsqrt.f32 %v2441_v40  ;;  %v2437_v1 = vmul.f32 0.03125, %v2432_v3 }
0x112b   :  { %v6478_v21 = vpop.eup %6477 }
0x112c   :  { %v2448_v55 = vmul.f32 %v6478_v21, %v2408_v33  ;;  %v2442_v18 = vadd.f32 1e-05, %v2437_v1 }
0x112e   :  { %6485 = vrsqrt.f32 %v2442_v18  ;;  %v2457_v41 = vmul.f32 %v5360_v25, %v2448_v55 }
0x112f   :  { %v6480_v32 = vpop.eup %6479 }
0x1130   :  { %v2449_v27 = vmul.f32 %v6480_v32, %v2409_v59  ;;  %v2466_v45 = vadd.f32 %v5361_v19, %v2457_v41 }
0x1132   :  { %v2458_v17 = vmul.f32 %v5360_v25, %v2449_v27 }
0x1133   :  { %v6482_v11 = vpop.eup %6481 }
0x1134   :  { %v2467_v39 = vadd.f32 %v5361_v19, %v2458_v17  ;;  %v2450_v37 = vmul.f32 %v6482_v11, %v2410_v54 }
0x1136   :  { %v2471_v31 = vpack.c.bf16 %v2467_v39, %v2466_v45  ;;  %v2459_v14 = vmul.f32 %v5360_v25, %v2450_v37 }
0x1137   :  { %v6484_v8 = vpop.eup %6483 }
0x1138   :  { %5884 = vmatmul.mubr.msk.bf16.vlgmr.msra.gmra.mxu0 %vm136_vm1, %v2471_v31  ;;  %v2451_v33 = vmul.f32 %v6484_v8, %v2411_v9  ;;  %v2468_v59 = vadd.f32 %v5361_v19, %v2459_v14  ;;  %v6340_v9 = vld [vmem:[%s8820_s8 + $0x20] sm:$0xff]  }
0x1139   :  { %5887 = vmatprep.mubr.msk.bf16.mxu0 %vm6679_vm3, %v8871_v48  ;;  %5902 = vmatpush3.bf16.msra.mxu1 %v6340_v9 }
0x113a   :  { %v2460_v24 = vmul.f32 %v5360_v25, %v2451_v33  ;;  %5903 = vmatprep.subr.bf16.mxu1 %v8871_v48 }
0x113b   :  { %v6486_v7 = vpop.eup %6485 }
0x113c   :  { %v2469_v26 = vadd.f32 %v5361_v19, %v2460_v24  ;;  %v2452_v62 = vmul.f32 %v6486_v7, %v2412_v63  ;;  %v5362_v63 = vld [vmem:[%s8822_s10] ss:$0 sm:$0xff] }
0x113d   :  { %5904 = vmatpush3.bf16.msra.mxu1 %v6341_v10 }
0x113e   :  { %v2472_v28 = vpack.c.bf16 %v2469_v26, %v2468_v59  ;;  %v2461_v53 = vmul.f32 %v5360_v25, %v2452_v62  ;;  %5905 = vmatprep.subr.bf16.mxu1 %v8871_v48 }
0x1140   :  { %5888 = vmatmul.mubr.msk.bf16.gmra.mxu0 %vm136_vm1, %v2472_v28  ;;  %v2470_v54 = vadd.f32 %v5361_v19, %v2461_v53 }
0x1141   :  { %5891 = vmatprep.mubr.msk.bf16.mxu0 %vm6679_vm3, %v8871_v48  ;;  %5906 = vmatpush3.bf16.msra.mxu1 %v6342_v16 }
0x1142   :  { %v2473_v13 = vpack.c.bf16 %v2470_v54, %v2470_v54  ;;  %5907 = vmatprep.subr.bf16.mxu1 %v8871_v48 }
0x1145   :  { %5908 = vmatpush3.bf16.msra.mxu1 %v6343_v47 }
0x1146   :  { %5909 = vmatprep.subr.bf16.mxu1 %v8871_v48 }
0x1148   :  { %5892 = vmatmul.mubr.msk.bf16.gmra.mxu0 %vm136_vm1, %v2473_v13 }
0x1149   :  { %5935 = vmatprep.mubr.msk.bf16.mxu0 %vm6679_vm3, %v8871_v48  ;;  %5910 = vmatpush3.bf16.msra.mxu1 %v6344_v38 }
0x11f8   :  { %v2540_v20 = vpop.f32.mrf.mxu0 }
0x11f9   :  { %v2541_v57 = vadd.f32 %v5362_v63, %v2540_v20 }
0x11fa   :  { %v5885_v58 = vpop.f32.mrf.mxu0 }
0x11fb   :  { %v2567_v5 = vmul.f32 0.044715, %v2541_v57  ;;  %v2562_v46 = vmul.f32 0.5, %v2541_v57 }
0x11fc   :  { %v2543_v6 = vpop.f32.mrf.mxu0 }
0x11fd   :  { %v2572_v30 = vmul.f32 %v2567_v5, %v2541_v57  ;;  %v2544_v23 = vadd.f32 %v5362_v63, %v2543_v6 }
0x11fe   :  { %v5886_v44 = vpop.f32.mrf.mxu0 }
0x11ff   :  { %v2577_v51 = vmul.f32 %v2572_v30, %v2541_v57  ;;  %v2568_v42 = vmul.f32 0.044715, %v2544_v23  ;;  %v2563_v36 = vmul.f32 0.5, %v2544_v23 }
0x1200   :  { %v2548_v60 = vpop.f32.mrf.mxu0 }
0x1201   :  { %v2582_v35 = vadd.f32 %v2577_v51, %v2541_v57  ;;  %v2573_v50 = vmul.f32 %v2568_v42, %v2544_v23  ;;  %v2549_v56 = vadd.f32 %v5362_v63, %v2548_v60 }
0x1202   :  { %v5889_v29 = vpop.f32.mrf.mxu0 }
0x1203   :  { %v2587_v52 = vmul.f32 0.7978846, %v2582_v35  ;;  %v2578_v40 = vmul.f32 %v2573_v50, %v2544_v23  ;;  %v2569_v3 = vmul.f32 0.044715, %v2549_v56  ;;  %v2564_v20 = vmul.f32 0.5, %v2549_v56 }
0x1204   :  { %v2551_v1 = vpop.f32.mrf.mxu0  ;;  %v5368_v35 = vld [vmem:[%s8821_s9 + $0x5] ss:$0 sm:$0xff] }
0x1205   :  { %6487 = vtanh.f32 %v2587_v52  ;;  %v2583_v21 = vadd.f32 %v2578_v40, %v2544_v23  ;;  %v2574_v55 = vmul.f32 %v2569_v3, %v2549_v56  ;;  %v2552_v18 = vadd.f32 %v5362_v63, %v2551_v1 }
0x1206   :  { %v5890_v25 = vpop.f32.mrf.mxu0 }
0x1207   :  { %v2588_v32 = vmul.f32 0.7978846, %v2583_v21  ;;  %v2579_v27 = vmul.f32 %v2574_v55, %v2549_v56  ;;  %v2570_v41 = vmul.f32 0.044715, %v2552_v18  ;;  %v2565_v58 = vmul.f32 0.5, %v2552_v18 }
0x1208   :  { %v2556_v19 = vpop.f32.mrf.mxu0 }
0x1209   :  { %6489 = vtanh.f32 %v2588_v32  ;;  %v2575_v17 = vmul.f32 %v2570_v41, %v2552_v18  ;;  %v2557_v11 = vadd.f32 %v5362_v63, %v2556_v19  ;;  %v2584_v45 = vadd.f32 %v2579_v27, %v2549_v56 }
0x120a   :  { %v5893_v39 = vpop.f32.mrf.mxu0 }
0x120b   :  { %v2580_v37 = vmul.f32 %v2575_v17, %v2552_v18  ;;  %v2571_v31 = vmul.f32 0.044715, %v2557_v11  ;;  %v2589_v8 = vmul.f32 0.7978846, %v2584_v45  ;;  %v2566_v23 = vmul.f32 0.5, %v2557_v11 }
0x120c   :  { %v2559_v33 = vpop.f32.mrf.mxu0 }
0x120d   :  { %v2576_v14 = vmul.f32 %v2571_v31, %v2557_v11  ;;  %v2585_v24 = vadd.f32 %v2580_v37, %v2552_v18  ;;  %6491 = vtanh.f32 %v2589_v8 }
0x120e   :  { %v5894_v7 = vpop.f32.mrf.mxu0 }
0x120f   :  { %v2590_v59 = vmul.f32 0.7978846, %v2585_v24  ;;  %v2581_v26 = vmul.f32 %v2576_v14, %v2557_v11 }
0x1211   :  { %6493 = vtanh.f32 %v2590_v59  ;;  %v2586_v62 = vadd.f32 %v2581_v26, %v2557_v11 }
0x1212   :  { %v6488_v28 = vpop.eup %6487 }
0x1213   :  { %v2591_v53 = vmul.f32 0.7978846, %v2586_v62  ;;  %v2597_v54 = vadd.f32 1.0, %v6488_v28 }
0x1215   :  { %6495 = vtanh.f32 %v2591_v53  ;;  %v2602_v9 = vmul.f32 %v2597_v54, %v2562_v46 }
0x1216   :  { %v6490_v13 = vpop.eup %6489 }
0x1217   :  { %v2598_v0 = vadd.f32 1.0, %v6490_v13 }
0x1219   :  { %v2603_v10 = vmul.f32 %v2598_v0, %v2563_v36 }
0x121a   :  { %v6492_v16 = vpop.eup %6491 }
0x121b   :  { %v2607_v47 = vpack.c.bf16 %v2603_v10, %v2602_v9  ;;  %v2599_v38 = vadd.f32 1.0, %v6492_v16  ;;  %v2880_v10 = vld [vmem:[%s8813_s1] sm:$0xff]  ;;  %v8874_v16 = vmov 1  }
0x121d   :  { %5912 = vmatmul.mubr.bf16.vlgmr.msra.gmra.mxu1 %v2607_v47  ;;  %v2604_v6 = vmul.f32 %v2599_v38, %v2564_v20  ;;  %v8875_v47 = vmov 2   ;;  %v7857_v38 = vld [vmem:[%s8813_s1 + $0x8] sm:$0xff]  ;;  %v7867_v20 = vld [vmem:[%s8813_s1 + $0x18] sm:$0xff] }
0x121e   :  { %v6494_v63 = vpop.eup %6493  ;;  %5915 = vmatprep.mubr.msk.bf16.mxu1 %vm6679_vm3, %v8871_v48 }
0x121f   :  { %v2600_v5 = vadd.f32 1.0, %v6494_v63  ;;  %v8876_v63 = vmov 3  }
0x1221   :  { %v2605_v30 = vmul.f32 %v2600_v5, %v2565_v58  ;;  %v7872_v58 = vld [vmem:[%s8813_s1 + $0x10] sm:$0xff]  ;;  %v8877_v5 = vmov 5  }
0x1222   :  { %v6496_v44 = vpop.eup %6495 }
0x1223   :  { %v2608_v51 = vpack.c.bf16 %v2605_v30, %v2604_v6  ;;  %v2601_v57 = vadd.f32 1.0, %v6496_v44  ;;  %v8879_v6 = vmov 8   ;;  %v8880_v30 = vmov 7  }
0x1225   :  { %5916 = vmatmul.mubr.bf16.gmra.mxu1 %v2608_v51  ;;  %v2606_v42 = vmul.f32 %v2601_v57, %v2566_v23 }
0x1226   :  { %5919 = vmatprep.mubr.msk.bf16.mxu1 %vm6679_vm3, %v8871_v48 }
0x1227   :  { %v2609_v60 = vpack.c.bf16 %v2606_v42, %v2606_v42 }
0x122d   :  { %5920 = vmatmul.mubr.bf16.gmra.mxu1 %v2609_v60 }
0x12dd   :  { %v2713_v50 = vpop.f32.mrf.mxu1 }
0x12de   :  { %v2714_v56 = vadd.f32 %v5368_v35, %v2713_v50 }
0x12df   :  { %v5913_v29 = vpop.f32.mrf.mxu1 }
0x12e0   :  { %v7807_v52 = vadd.f32 %v2714_v56, %v7706_v22 }
0x12e1   :  { %v2716_v40 = vpop.f32.mrf.mxu1 }
0x12e2   :  { %v2717_v3 = vadd.f32 %v5368_v35, %v2716_v40  ;;  %v2743_v1 = vsel %vm136_vm1, %v7807_v52, 0.0 }
0x12e3   :  { %2744 = vadd.xlane.f32.xlu0 %v2743_v1  ;;  %v5914_v21 = vpop.f32.mrf.mxu1 }
0x12e4   :  { %v7812_v55 = vadd.f32 %v2717_v3, %v7711_v2 }
0x12e5   :  { %v2721_v18 = vpop.f32.mrf.mxu1 }
0x12e6   :  { %v2722_v25 = vadd.f32 %v5368_v35, %v2721_v18  ;;  %v2746_v32 = vsel %vm136_vm1, %v7812_v55, 0.0 }
0x12e7   :  { %2747 = vadd.xlane.f32.xlu1 %v2746_v32  ;;  %v5917_v27 = vpop.f32.mrf.mxu1 }
0x12e8   :  { %v7817_v22 = vadd.f32 %v2722_v25, %v7716_v61  ;;  %v7909_v25 = vld [vmem:[%s8821_s9 + $0x8] ss:$0 sm:$0xff] }
0x12e9   :  { %v2724_v41 = vpop.f32.mrf.mxu1 }
0x12ea   :  { %v2725_v19 = vadd.f32 %v5368_v35, %v2724_v41  ;;  %v2749_v17 = vsel %vm136_vm1, %v7817_v22, 0.0  ;;  %v7915_v41 = vld [vmem:[%s8821_s9 + $0x9] ss:$0 sm:$0xff] }
0x12eb   :  { %2750 = vadd.xlane.f32.xlu1 %v2749_v17  ;;  %v5918_v11 = vpop.f32.mrf.mxu1 }
0x12ec   :  { %v7822_v2 = vadd.f32 %v2725_v19, %v7721_v4 }
0x12ed   :  { %v2729_v45 = vpop.f32.mrf.mxu1 }
0x12ee   :  { %v2730_v39 = vadd.f32 %v5368_v35, %v2729_v45  ;;  %v2752_v37 = vsel %vm136_vm1, %v7822_v2, 0.0 }
0x12ef   :  { %2753 = vadd.xlane.f32.xlu0 %v2752_v37  ;;  %v5921_v31 = vpop.f32.mrf.mxu1 }
0x12f0   :  { %v7827_v61 = vadd.f32 %v2730_v39, %v7728_v43 }
0x12f1   :  { %v2732_v8 = vpop.f32.mrf.mxu1 }
0x12f2   :  { %v2755_v33 = vsel %vm225_vm2, %v7827_v61, 0.0 }
0x12f3   :  { %2756 = vadd.xlane.f32.xlu0 %v2755_v33  ;;  %v5922_v14 = vpop.f32.mrf.mxu1 }
0x136c   :  { %v2745_v24 = vpop.xlane.xlu0 %2744 }
0x136d   :  { %v2758_v7 = vmul.f32 0.03125, %v2745_v24 }
0x136f   :  { %v7832_v4 = vsub.f32 %v7807_v52, %v2758_v7 }
0x1370   :  { %v2748_v59 = vpop.xlane.xlu1 %2747 }
0x1371   :  { %v2759_v26 = vmul.f32 0.03125, %v2748_v59  ;;  %v2768_v62 = vmul.f32 %v7832_v4, %v7832_v4 }
0x1373   :  { %v7837_v28 = vsub.f32 %v7812_v55, %v2759_v26  ;;  %v2773_v43 = vsel %vm136_vm1, %v2768_v62, 0.0 }
0x1374   :  { %2774 = vadd.xlane.f32.xlu1 %v2773_v43  ;;  %v2751_v53 = vpop.xlane.xlu1 %2750 }
0x1375   :  { %v2760_v54 = vmul.f32 0.03125, %v2751_v53  ;;  %v2769_v13 = vmul.f32 %v7837_v28, %v7837_v28 }
0x1377   :  { %v7843_v46 = vsub.f32 %v7817_v22, %v2760_v54  ;;  %v2776_v36 = vsel %vm136_vm1, %v2769_v13, 0.0 }
0x1378   :  { %2777 = vadd.xlane.f32.xlu0 %v2776_v36  ;;  %v2754_v44 = vpop.xlane.xlu0 %2753 }
0x1379   :  { %v2770_v0 = vmul.f32 %v7843_v46, %v7843_v46  ;;  %v2761_v51 = vmul.f32 0.03125, %v2754_v44 }
0x137b   :  { %v2779_v9 = vsel %vm136_vm1, %v2770_v0, 0.0  ;;  %v7896_v57 = vsub.f32 %v7822_v2, %v2761_v51  ;;  %v6345_v51 = vld [vmem:[%s8817_s5 + $0x58] sm:$0xff]  }
0x137c   :  { %2780 = vadd.xlane.f32.xlu0 %v2779_v9  ;;  %v2757_v56 = vpop.xlane.xlu0 %2756  ;;  %5924 = vmatpush3.bf16.msra.mxu0 %v6345_v51 }
0x137d   :  { %v2771_v23 = vmul.f32 %v7896_v57, %v7896_v57  ;;  %v2762_v40 = vmul.f32 0.03125, %v2757_v56  ;;  %5925 = vmatprep.subr.bf16.mxu0 %v8871_v48  ;;  %v6348_v56 = vld [vmem:[%s8817_s5 + $0x40] sm:$0xff]  }
0x137f   :  { %v2782_v42 = vsel %vm136_vm1, %v2771_v23, 0.0  ;;  %v7904_v21 = vsub.f32 %v7827_v61, %v2762_v40 }
0x1381   :  { %v2772_v11 = vmul.f32 %v7904_v21, %v7904_v21 }
0x1383   :  { %v2785_v37 = vsel %vm225_vm2, %v2772_v11, 0.0 }
0x1385   :  { %2886 = vperm.xlu1 %6260, %v2880_v10  }
0x1389   :  { %6261 = vset.pattern.permute.xlu1 %v8874_v16 }
0x138a   :  { %2930 = vperm.xlu1 %6261, %v2880_v10  }
0x138e   :  { %6262 = vset.pattern.permute.xlu1 %v8875_v47 }
0x138f   :  { %2971 = vperm.xlu1 %6262, %v2880_v10  }
0x1392   :  { %3012 = vperm.xlu0 %6263, %v2880_v10  }
0x1393   :  { %2975 = vperm.xlu1 %6262, %v7857_v38  }
0x1396   :  { %6264 = vset.pattern.permute.xlu0 %v8872_v15 }
0x1397   :  { %6265 = vset.pattern.permute.xlu1 %v8876_v63  ;;  %2891 = vperm.xlu0 %6264, %v7857_v38  }
0x1398   :  { %3016 = vperm.xlu1 %6265, %v7857_v38  }
0x139b   :  { %2896 = vperm.xlu0 %6264, %v7872_v58  }
0x139c   :  { %6267 = vset.pattern.permute.xlu1 %v8872_v15  ;;  %v8878_v15 = vmov 6  }
0x139d   :  { %2901 = vperm.xlu1 %6267, %v7867_v20  }
0x139f   :  { %6266 = vset.pattern.permute.xlu0 %v8874_v16 }
0x13a0   :  { %2934 = vperm.xlu0 %6266, %v7857_v38  }
0x13a1   :  { %6268 = vset.pattern.permute.xlu1 %v8877_v5 }
0x13a2   :  { %3053 = vperm.xlu1 %6268, %v2880_v10  }
0x13a4   :  { %2942 = vperm.xlu0 %6266, %v7867_v20  }
0x13a6   :  { %6269 = vset.pattern.permute.xlu1 %v8874_v16 }
0x13a7   :  { %2938 = vperm.xlu1 %6269, %v7872_v58  }
0x13a8   :  { %6271 = vset.pattern.permute.xlu0 %v8875_v47 }
0x13a9   :  { %2979 = vperm.xlu0 %6271, %v7872_v58  }
0x13ab   :  { %6270 = vset.pattern.permute.xlu1 %v8878_v15 }
0x13ac   :  { %3086 = vperm.xlu1 %6270, %v2880_v10  }
0x13ad   :  { %6275 = vset.pattern.permute.xlu0 %v8879_v6 }
0x13ae   :  { %3152 = vperm.xlu0 %6275, %v2880_v10  }
0x13b0   :  { %3090 = vperm.xlu1 %6270, %v7857_v38  }
0x13b2   :  { %6276 = vset.pattern.permute.xlu0 %v8877_v5 }
0x13b3   :  { %3057 = vperm.xlu0 %6276, %v7857_v38  }
0x13b4   :  { %6272 = vset.pattern.permute.xlu1 %v8875_v47 }
0x13b5   :  { %2983 = vperm.xlu1 %6272, %v7867_v20  }
0x13b9   :  { %6273 = vset.pattern.permute.xlu1 %v8880_v30 }
0x13ba   :  { %3119 = vperm.xlu1 %6273, %v2880_v10  }
0x13be   :  { %6274 = vset.pattern.permute.xlu1 %v8876_v63 }
0x13bf   :  { %3020 = vperm.xlu1 %6274, %v7872_v58  }
0x13e3   :  { %2783 = vadd.xlane.f32.xlu1 %v2782_v42 }
0x13f4   :  { %3024 = vperm.xlu1 %6274, %v7867_v20  }
0x13f8   :  { %6277 = vset.pattern.permute.xlu1 %v8879_v6 }
0x13fd   :  { %v2775_v60 = vpop.xlane.xlu1 %2774 }
0x13fe   :  { %v2788_v35 = vmul.f32 0.03125, %v2775_v60 }
0x1400   :  { %v2793_v50 = vadd.f32 1e-05, %v2788_v35 }
0x1401   :  { %v2778_v29 = vpop.xlane.xlu0 %2777  ;;  %v7926_v8 = vpop.permute.xlu1 %2886 }
0x1402   :  { %6497 = vrsqrt.f32 %v2793_v50  ;;  %v2789_v3 = vmul.f32 0.03125, %v2778_v29  ;;  %v6346_v50 = vld [vmem:[%s8817_s5 + $0x50] sm:$0xff]  }
0x1403   :  { %5926 = vmatpush3.bf16.msra.mxu0 %v6346_v50  ;;  %v8073_v50 = vld [vmem:[%s8816_s4 + $0x14] ss:$0 sm:$0xff] }
0x1404   :  { %v2794_v18 = vadd.f32 1e-05, %v2789_v3  ;;  %5927 = vmatprep.subr.bf16.mxu0 %v8871_v48 }
0x1405   :  { %v2781_v32 = vpop.xlane.xlu0 %2780  ;;  %v7929_v14 = vpop.permute.xlu1 %2930 }
0x1406   :  { %6499 = vrsqrt.f32 %v2794_v18  ;;  %v2790_v17 = vmul.f32 0.03125, %v2781_v32 }
0x1408   :  { %v2795_v39 = vadd.f32 1e-05, %v2790_v17 }
0x140a   :  { %6501 = vrsqrt.f32 %v2795_v39  ;;  %v7938_v26 = vpop.permute.xlu1 %2971 }
0x140d   :  { %v8022_v18 = vpop.permute.xlu0 %3012 }
0x140f   :  { %v6498_v1 = vpop.eup %6497 }
0x1410   :  { %v2803_v27 = vmul.f32 %v6498_v1, %v7832_v4 }
0x1412   :  { %v2812_v19 = vmul.f32 %v7909_v25, %v2803_v27  ;;  %v2892_v27 = vpop.permute.xlu0 %2891 }
0x1413   :  { %v6500_v31 = vpop.eup %6499 }
0x1414   :  { %v7921_v45 = vadd.f32 %v7915_v41, %v2812_v19  ;;  %v2804_v33 = vmul.f32 %v6500_v31, %v7837_v28  ;;  %v7945_v28 = vpop.permute.xlu1 %2975 }
0x1416   :  { %2830 = vrot.lane.b32.xlu0 %v7921_v45, %s6676_s17  ;;  %v2813_v24 = vmul.f32 %v7909_v25, %v2804_v33 }
0x1417   :  { %v6502_v7 = vpop.eup %6501 }
0x1418   :  { %2786 = vadd.xlane.f32.xlu1 %v2785_v37  ;;  %v7935_v4 = vadd.f32 %v7915_v41, %v2813_v24  ;;  %v2805_v59 = vmul.f32 %v6502_v7, %v7843_v46  ;;  %v7952_v53 = vpop.permute.xlu1 %3016 }
0x141a   :  { %v2814_v62 = vmul.f32 %v7909_v25, %v2805_v59 }
0x141c   :  { %v7948_v43 = vadd.f32 %v7915_v41, %v2814_v62  ;;  %v7956_v54 = vpop.permute.xlu1 %2901 }
0x1420   :  { %v7958_v13 = vpop.permute.xlu1 %3053 }
0x1424   :  { %v7960_v46 = vpop.permute.xlu1 %2938 }
0x1428   :  { %v7962_v36 = vpop.permute.xlu1 %3086 }
0x1429   :  { %2842 = vrot.lane.b32.xlu1 %v7921_v45, %s6677_s18 }
0x142c   :  { %v7964_v0 = vpop.permute.xlu1 %3090 }
0x142d   :  { %2832 = vrot.lane.b32.xlu1 %v7935_v4, %s6676_s17 }
0x1430   :  { %v7966_v9 = vpop.permute.xlu1 %2983 }
0x1431   :  { %2844 = vrot.lane.b32.xlu1 %v7935_v4, %s6677_s18 }
0x1435   :  { %2834 = vrot.lane.b32.xlu1 %v7948_v43, %s6676_s17  ;;  %v7968_v10 = vpop.permute.xlu1 %3119 }
0x1439   :  { %2846 = vrot.lane.b32.xlu1 %v7948_v43, %s6677_s18 }
0x143a   :  { %v7970_v16 = vpop.permute.xlu1 %3020 }
0x146c   :  { %v2784_v47 = vpop.xlane.xlu1 %2783 }
0x146d   :  { %v2791_v63 = vmul.f32 0.03125, %v2784_v47 }
0x146f   :  { %v2796_v44 = vadd.f32 1e-05, %v2791_v63 }
0x1471   :  { %6503 = vrsqrt.f32 %v2796_v44 }
0x147e   :  { %v6504_v23 = vpop.eup %6503 }
0x147f   :  { %v2806_v42 = vmul.f32 %v6504_v23, %v7896_v57  ;;  %v6347_v57 = vld [vmem:[%s8817_s5 + $0x48] sm:$0xff]  }
0x1480   :  { %5928 = vmatpush3.bf16.msra.mxu0 %v6347_v57 }
0x1481   :  { %v2815_v60 = vmul.f32 %v7909_v25, %v2806_v42  ;;  %5929 = vmatprep.subr.bf16.mxu0 %v8871_v48 }
0x1483   :  { %v7979_v35 = vadd.f32 %v7915_v41, %v2815_v60 }
0x1484   :  { %5930 = vmatpush3.bf16.msra.mxu0 %v6348_v56 }
0x1485   :  { %2848 = vrot.lane.b32.xlu0 %v7979_v35, %s6677_s18  ;;  %2836 = vrot.lane.b32.xlu1 %v7979_v35, %s6676_s17 }
0x1486   :  { %5931 = vmatprep.subr.bf16.mxu0 %v8871_v48 }
0x1489   :  { %3065 = vperm.xlu0 %6276, %v7867_v20   ;;  %3156 = vperm.xlu1 %6277, %v7857_v38  }
0x148d   :  { %6279 = vset.pattern.permute.xlu0 %v8880_v30  ;;  %6278 = vset.pattern.permute.xlu1 %v8877_v5  ;;  %v6350_v5 = vld [vmem:[%s8817_s5 + $0x30] sm:$0xff]  }
0x148e   :  { %3123 = vperm.xlu0 %6279, %v7857_v38   ;;  %3061 = vperm.xlu1 %6278, %v7872_v58   ;;  %v6349_v38 = vld [vmem:[%s8817_s5 + $0x38] sm:$0xff]  }
0x148f   :  { %5932 = vmatpush3.bf16.msra.mxu0 %v6349_v38 }
0x1490   :  { %5933 = vmatprep.subr.bf16.mxu0 %v8871_v48 }
0x1492   :  { %3127 = vperm.xlu0 %6279, %v7872_v58   ;;  %6280 = vset.pattern.permute.xlu1 %v8878_v15  ;;  %v8018_v15 = vpop.permute.xlu1 %3024 }
0x1493   :  { %3094 = vperm.xlu1 %6280, %v7872_v58   ;;  %5934 = vmatpush3.bf16.msra.mxu0 %v6350_v5 }
0x1496   :  { %6283 = vset.pattern.permute.xlu0 %v8879_v6 }
0x1497   :  { %3164 = vperm.xlu0 %6283, %v7867_v20   ;;  %3098 = vperm.xlu1 %6280, %v7867_v20  }
0x149b   :  { %6281 = vset.pattern.permute.xlu1 %v8880_v30 }
0x149c   :  { %3131 = vperm.xlu1 %6281, %v7867_v20  }
0x14a0   :  { %6282 = vset.pattern.permute.xlu1 %v8879_v6 }
0x14a1   :  { %v2787_v29 = vpop.xlane.xlu1 %2786  ;;  %3160 = vperm.xlu1 %6282, %v7872_v58   ;;  %v8033_v58 = vpop.permute.xlu0 %2896 }
0x14a2   :  { %v2792_v40 = vmul.f32 0.03125, %v2787_v29 }
0x14a4   :  { %v2797_v3 = vadd.f32 1e-05, %v2792_v40 }
0x14a5   :  { %v2935_v6 = vpop.permute.xlu0 %2934 }
0x14a6   :  { %6505 = vrsqrt.f32 %v2797_v3 }
0x14a9   :  { %v8035_v19 = vpop.permute.xlu0 %2942 }
0x14ad   :  { %v8037_v17 = vpop.permute.xlu0 %2979 }
0x14b1   :  { %v3153_v11 = vpop.permute.xlu0 %3152 }
0x14b3   :  { %v6506_v1 = vpop.eup %6505 }
0x14b4   :  { %v2807_v30 = vmul.f32 %v6506_v1, %v7904_v21  ;;  %v2843_v21 = vpop.permute.xlu1 %2842 }
0x14b5   :  { %v8039_v39 = vpop.permute.xlu0 %3057 }
0x14b6   :  { %v2816_v32 = vmul.f32 %v7909_v25, %v2807_v30  ;;  %v8092_v30 = vld [vmem:[%s8816_s4 + $0x11] ss:$0 sm:$0xff] }
0x14b8   :  { %v8027_v20 = vadd.f32 %v7915_v41, %v2816_v32  ;;  %v2833_v25 = vpop.permute.xlu1 %2832 }
0x14b9   :  { %v2831_v37 = vpop.permute.xlu0 %2830  ;;  %v2855_v31 = vsel %vm136_vm1, %v7935_v4, %v2833_v25 }
0x14ba   :  { %3203 = vrot.lane.b32.xlu1 %v8027_v20, %s6676_s17  ;;  %v2854_v24 = vsel %vm136_vm1, %v7921_v45, %v2831_v37  ;;  %v8060_v45 = vld [vmem:[%s8816_s4 + $0x10] ss:$0 sm:$0xff] }
0x14bb   :  { %v8049_v7 = vsel %vm329_vm4, %v2854_v24, %v2843_v21 }
0x14bc   :  { %v2845_v41 = vpop.permute.xlu1 %2844  ;;  %v2872_v62 = vrot.slane %v8049_v7, 3  ;;  %v2921_v51 = vrot.slane %v8049_v7, 4  ;;  %v2962_v60 = vrot.slane %v8049_v7, 5  ;;  %v3003_v32 = vrot.slane %v8049_v7, 7 }
0x14bd   :  { %v8044_v33 = vsel %vm329_vm4, %v2855_v31, %v2845_v41  ;;  %v8108_v31 = vld [vmem:[%s8816_s4 + $0x12] ss:$0 sm:$0xff] }
0x14be   :  { %3206 = vrot.lane.b32.xlu1 %v8027_v20, %s6677_s18  ;;  %v2873_v59 = vrot.slane %v8044_v33, 3  ;;  %v8858_v44 = vrot.slane %v8044_v33, 4  ;;  %v8855_v23 = vrot.slane %v8044_v33, 5  ;;  %v2869_v38 = vmul.f32 %v8073_v50, %v8044_v33 }
0x14bf   :  { %v8853_v5 = vrot.slane %v8044_v33, 7 }
0x14c0   :  { %v2878_v47 = vsel %vm349_vm6, %v2872_v62, %v2873_v59  ;;  %v2835_v63 = vpop.permute.xlu1 %2834  ;;  %v8067_v42 = vsel %vm399_vm5, %v2921_v51, %v8858_v44  ;;  %v2968_v40 = vsel %vm441_vm8, %v2962_v60, %v8855_v23 }
0x14c1   :  { %v2905_v4 = vmul.f32 %v2892_v27, %v2878_v47  ;;  %v2856_v29 = vsel %vm136_vm1, %v7948_v43, %v2835_v63  ;;  %v2946_v3 = vmul.f32 %v2935_v6, %v8067_v42  ;;  %v2987_v41 = vmul.f32 %v7945_v28, %v2968_v40 }
0x14c2   :  { %v3009_v6 = vsel %vm483_vm7, %v3003_v32, %v8853_v5 }
0x14c3   :  { %v2914_v57 = vmul.f32 %v8060_v45, %v2905_v4  ;;  %v2955_v63 = vmul.f32 %v8092_v30, %v2946_v3  ;;  %v2868_v3 = vmul.f32 %v8073_v50, %v8049_v7 }
0x14c4   :  { %v2847_v56 = vpop.permute.xlu1 %2846 }
0x14c5   :  { %v8087_v1 = vsel %vm329_vm4, %v2856_v29, %v2847_v56  ;;  %v2918_v27 = vadd.f32 %v2914_v57, %v2869_v38 }
0x14c6   :  { %v8854_v24 = vrot.slane %v8087_v1, 1  ;;  %v2874_v28 = vrot.slane %v8087_v1, 3 }
0x14c7   :  { %v2959_v56 = vadd.f32 %v2955_v63, %v2918_v27 }
0x14f7   :  { %v2837_v21 = vpop.permute.xlu1 %2836  ;;  %v2849_v43 = vpop.permute.xlu0 %2848 }
0x14f8   :  { %v2857_v25 = vsel %vm136_vm1, %v7979_v35, %v2837_v21  ;;  %v3045_v35 = vrot.slane %v8044_v33, 1  ;;  %v2996_v21 = vmul.f32 %v8108_v31, %v2987_v41 }
0x14f9   :  { %v8103_v37 = vsel %vm329_vm4, %v2857_v25, %v2849_v43  ;;  %v8856_v43 = vrot.slane %v8049_v7, 1  ;;  %v3028_v25 = vmul.f32 %v7952_v53, %v3009_v6  ;;  %v3167_v53 = vmul.f32 %v3153_v11, %v2968_v40 }
0x14fa   :  { %v2924_v4 = vrot.slane %v8103_v37, 4  ;;  %v8857_v57 = vrot.slane %v8103_v37, 7  ;;  %v2875_v38 = vrot.slane %v8103_v37, 3  ;;  %v2965_v29 = vrot.slane %v8103_v37, 5 }
0x14fb   :  { %v3049_v5 = vsel %vm525_vm9, %v3045_v35, %v8854_v24  ;;  %v3050_v6 = vsel %vm525_vm9, %v8856_v43, %v3045_v35  ;;  %v8146_v24 = vld [vmem:[%s8816_s4 + $0x13] ss:$0 sm:$0xff]  ;;  %v2877_v40 = vsel %vm349_vm6, %v2873_v59, %v2874_v28  ;;  %v3000_v35 = vadd.f32 %v2996_v21, %v2959_v56 }
0x14fc   :  { %v8129_v27 = vsel %vm349_vm6, %v2874_v28, %v2875_v38  ;;  %v8133_v63 = vsel %vm349_vm6, %v2875_v38, %v2872_v62  ;;  %v8137_v41 = vsel %vm441_vm8, %v2965_v29, %v2962_v60  ;;  %v8152_v62 = vsel %vm399_vm5, %v2924_v4, %v2921_v51  ;;  %v8161_v60 = vld [vmem:[%s8816_s4 + $0x18] ss:$0 sm:$0xff] }
0x14fd   :  { %v2904_v23 = vmul.f32 %v7926_v8, %v8133_v63  ;;  %v3010_v11 = vsel %vm483_vm7, %v8857_v57, %v3003_v32  ;;  %v2945_v8 = vmul.f32 %v7929_v14, %v8152_v62  ;;  %v3069_v51 = vmul.f32 %v8039_v39, %v3049_v5 }
0x14fe   :  { %v2907_v38 = vmul.f32 %v7956_v54, %v8129_v27  ;;  %v2986_v32 = vmul.f32 %v7938_v26, %v8137_v41  ;;  %v3101_v57 = vmul.f32 %v7962_v36, %v2878_v47  ;;  %v3068_v44 = vmul.f32 %v7958_v13, %v3050_v6  ;;  %v8183_v54 = vld [vmem:[%s8816_s4 + $0x15] ss:$0 sm:$0xff] }
0x14ff   :  { %v2913_v43 = vmul.f32 %v8060_v45, %v2904_v23  ;;  %v2923_v59 = vrot.slane %v8087_v1, 4  ;;  %v3037_v28 = vmul.f32 %v8146_v24, %v3028_v25  ;;  %v8178_v14 = vmul.f32 %v8161_v60, %v3167_v53 }
0x1500   :  { %v2954_v23 = vmul.f32 %v8092_v30, %v2945_v8  ;;  %v3027_v26 = vmul.f32 %v8022_v18, %v3010_v11  ;;  %v2964_v36 = vrot.slane %v8087_v1, 5  ;;  %v2906_v13 = vmul.f32 %v8033_v58, %v2877_v40 }
0x1501   :  { %v2917_v39 = vadd.f32 %v2913_v43, %v2868_v3  ;;  %v3041_v47 = vadd.f32 %v3037_v28, %v3000_v35  ;;  %v8191_v5 = vsel %vm399_vm5, %v2923_v59, %v2924_v4  ;;  %v3078_v25 = vmul.f32 %v8183_v54, %v3069_v51  ;;  %v8207_v35 = vld [vmem:[%s8816_s4 + $0x16] ss:$0 sm:$0xff] }
0x1502   :  { %v2916_v53 = vmul.f32 %v8060_v45, %v2907_v38  ;;  %v2995_v43 = vmul.f32 %v8108_v31, %v2986_v32  ;;  %v3077_v18 = vmul.f32 %v8183_v54, %v3068_v44  ;;  %v8881_v6 = vrot.slane %v8044_v33, 4 }
0x1503   :  { %v2958_v3 = vadd.f32 %v2954_v23, %v2917_v39  ;;  %v3102_v11 = vmul.f32 %v7964_v0, %v2877_v40  ;;  %v2871_v4 = vmul.f32 %v8073_v50, %v8103_v37  ;;  %v2948_v8 = vmul.f32 %v8035_v19, %v8191_v5 }
0x1504   :  { %v3157_v56 = vpop.permute.xlu1 %3156  ;;  %v3066_v21 = vpop.permute.xlu0 %3065  ;;  %v2926_v58 = vsel %vm399_vm5, %v8881_v6, %v2923_v59  ;;  %v3036_v44 = vmul.f32 %v8146_v24, %v3027_v26  ;;  %v8214_v38 = vsel %vm441_vm8, %v2964_v36, %v2965_v29  ;;  %v2870_v0 = vmul.f32 %v8073_v50, %v8087_v1  ;;  %v8229_v29 = vld [vmem:[%s8816_s4 + $0x17] ss:$0 sm:$0xff] }
0x1505   :  { %v2999_v51 = vadd.f32 %v2995_v43, %v2958_v3  ;;  %v3005_v40 = vrot.slane %v8087_v1, 7  ;;  %v2915_v32 = vmul.f32 %v8060_v45, %v2906_v13  ;;  %v3134_v59 = vmul.f32 %v7968_v10, %v8067_v42 }
0x1506   :  { %v8882_v28 = vrot.slane %v8044_v33, 5  ;;  %v3082_v39 = vadd.f32 %v3078_v25, %v3041_v47  ;;  %v2920_v23 = vadd.f32 %v2916_v53, %v2871_v4  ;;  %v2947_v43 = vmul.f32 %v7960_v46, %v2926_v58 }
0x1507   :  { %v3040_v50 = vadd.f32 %v3036_v44, %v2999_v51  ;;  %v3111_v45 = vmul.f32 %v8207_v35, %v3102_v11  ;;  %v3110_v10 = vmul.f32 %v8207_v35, %v3101_v57  ;;  %v2989_v42 = vmul.f32 %v7966_v9, %v8214_v38 }
0x1508   :  { %v2967_v19 = vsel %vm441_vm8, %v8882_v28, %v2964_v36  ;;  %v2957_v25 = vmul.f32 %v8092_v30, %v2948_v8  ;;  %v3047_v6 = vrot.slane %v8103_v37, 1  ;;  %v2919_v53 = vadd.f32 %v2915_v32, %v2870_v0 }
0x1509   :  { %v3062_v26 = vpop.permute.xlu1 %3061  ;;  %v3124_v13 = vpop.permute.xlu0 %3123  ;;  %v3168_v36 = vmul.f32 %v3157_v56, %v2967_v19  ;;  %v3081_v3 = vadd.f32 %v3077_v18, %v3040_v50  ;;  %v3143_v4 = vmul.f32 %v8229_v29, %v3134_v59  ;;  %v8883_v46 = vrot.slane %v8103_v37, 7 }
0x150a   :  { %v3135_v47 = vmul.f32 %v3124_v13, %v2926_v58  ;;  %v3115_v51 = vadd.f32 %v3111_v45, %v3082_v39  ;;  %v2961_v9 = vadd.f32 %v2957_v25, %v2920_v23  ;;  %v2988_v56 = vmul.f32 %v8037_v17, %v2967_v19  ;;  %v5400_v19 = vld [vmem:[%s8816_s4 + $0x19] ss:$0 sm:$0xff] }
0x150b   :  { %v3007_v11 = vsel %vm483_vm7, %v3005_v40, %v8883_v46  ;;  %v3114_v44 = vadd.f32 %v3110_v10, %v3081_v3  ;;  %v2956_v58 = vmul.f32 %v8092_v30, %v2947_v43  ;;  %v8884_v18 = vrot.slane %v8044_v33, 7 }
0x150c   :  { %v3144_v57 = vmul.f32 %v8229_v29, %v3135_v47  ;;  %v2998_v0 = vmul.f32 %v8108_v31, %v2989_v42  ;;  %v3177_v37 = vmul.f32 %v8161_v60, %v3168_v36  ;;  %v3030_v39 = vmul.f32 %v8018_v15, %v3007_v11 }
0x150d   :  { %v3008_v8 = vsel %vm483_vm7, %v8884_v18, %v3005_v40  ;;  %v3147_v28 = vadd.f32 %v3143_v4, %v3114_v44  ;;  %v8885_v23 = vrot.slane %v8049_v7, 1  ;;  %v8886_v30 = vrot.slane %v8087_v1, 1  ;;  %v3128_v50 = vpop.permute.xlu0 %3127  ;;  %v5402_v1 = vld [vmem:[%s8816_s4 + $0x1a] ss:$0 sm:$0xff]  ;;  %s8945_s4 = smov 16  }
0x150e   :  { %v3148_v32 = vadd.f32 %v3144_v57, %v3115_v51  ;;  %v3095_v59 = vpop.permute.xlu1 %3094  ;;  %v2960_v40 = vadd.f32 %v2956_v58, %v2919_v53  ;;  %v3002_v13 = vadd.f32 %v2998_v0, %v2961_v9  ;;  %v2997_v7 = vmul.f32 %v8108_v31, %v2988_v56 }
0x150f   :  { %v3051_v17 = vsel %vm525_vm9, %v3047_v6, %v8885_v23  ;;  %v3048_v33 = vsel %vm525_vm9, %v8886_v30, %v3047_v6  ;;  %v3180_v15 = vadd.f32 %v8178_v14, %v3147_v28  ;;  %v3029_v12 = vmul.f32 %v7970_v16, %v3008_v8 }
0x1510   :  { %v3071_v43 = vmul.f32 %v3066_v21, %v3051_v17  ;;  %v3181_v45 = vadd.f32 %v3177_v37, %v3148_v32  ;;  %v3070_v10 = vmul.f32 %v3062_v26, %v3048_v33  ;;  %v3039_v25 = vmul.f32 %v8146_v24, %v3030_v39 }
0x1511   :  { %v3189_v47 = vmul.f32 %v5400_v19, %v3180_v15  ;;  %v3001_v3 = vadd.f32 %v2997_v7, %v2960_v40  ;;  %v3103_v21 = vmul.f32 %v3095_v59, %v8129_v27  ;;  %v3038_v46 = vmul.f32 %v8146_v24, %v3029_v12 }
0x1512   :  { %v3190_v42 = vmul.f32 %v5400_v19, %v3181_v45  ;;  %v3099_v36 = vpop.permute.xlu1 %3098  ;;  %v3080_v6 = vmul.f32 %v8183_v54, %v3071_v43  ;;  %v3043_v53 = vadd.f32 %v3039_v25, %v3002_v13  ;;  %v3079_v4 = vmul.f32 %v8183_v54, %v3070_v10  ;;  %v3165_v16 = vpop.permute.xlu0 %3164 }
0x1513   :  { %v3104_v14 = vmul.f32 %v3099_v36, %v8133_v63  ;;  %v3198_v26 = vadd.f32 %v5402_v1, %v3189_v47  ;;  %v3042_v57 = vadd.f32 %v3038_v46, %v3001_v3  ;;  %v3112_v44 = vmul.f32 %v8207_v35, %v3103_v21 }
0x1514   :  { %v3199_v31 = vadd.f32 %v5402_v1, %v3190_v42  ;;  %v3170_v27 = vmul.f32 %v3165_v16, %v8137_v41  ;;  %v3084_v56 = vadd.f32 %v3080_v6, %v3043_v53  ;;  %v3136_v58 = vmul.f32 %v3128_v50, %v8191_v5 }
0x1515   :  { %v3113_v11 = vmul.f32 %v8207_v35, %v3104_v14  ;;  %v3083_v54 = vadd.f32 %v3079_v4, %v3042_v57  ;;  %vm8888_vm5 = vcmask 131072  }
0x1516   :  { %v3211_v51 = vpack.c.bf16 %v3199_v31, %v3198_v26  ;;  %v3179_v35 = vmul.f32 %v8161_v60, %v3170_v27  ;;  %v3145_v41 = vmul.f32 %v8229_v29, %v3136_v58  ;;  %vm8890_vm7 = vmmov %vm8888_vm5 }
0x1517   :  { %v3132_v9 = vpop.permute.xlu1 %3131  ;;  %v3117_v18 = vadd.f32 %v3113_v11, %v3084_v56  ;;  %v3116_v8 = vadd.f32 %v3112_v44, %v3083_v54 }
0x1518   :  { %v3137_v63 = vmul.f32 %v3132_v9, %v8152_v62  ;;  %5936 = vmatmul.mubr.msk.bf16.vlgmr.msra.gmra.mxu0 %vm740_vm10, %v3211_v51 }
0x1519   :  { %5939 = vmatprep.mubr.msk.bf16.mxu0 %vm6679_vm3, %v8871_v48  ;;  %v3149_v59 = vadd.f32 %v3145_v41, %v3116_v8 }
0x151a   :  { %v3146_v24 = vmul.f32 %v8229_v29, %v3137_v63 }
0x151c   :  { %v3161_v0 = vpop.permute.xlu1 %3160  ;;  %v3150_v37 = vadd.f32 %v3146_v24, %v3117_v18 }
0x151d   :  { %v3169_v62 = vmul.f32 %v3161_v0, %v8214_v38 }
0x151e   :  { %v3183_v32 = vadd.f32 %v3179_v35, %v3150_v37 }
0x151f   :  { %v3178_v5 = vmul.f32 %v8161_v60, %v3169_v62 }
0x1520   :  { %v3192_v39 = vmul.f32 %v5400_v19, %v3183_v32 }
0x1521   :  { %v3182_v28 = vadd.f32 %v3178_v5, %v3149_v59 }
0x1522   :  { %v3201_v30 = vadd.f32 %v5402_v1, %v3192_v39 }
0x1523   :  { %v3191_v23 = vmul.f32 %v5400_v19, %v3182_v28 }
0x1525   :  { %v3200_v17 = vadd.f32 %v5402_v1, %v3191_v23 }
0x1527   :  { %v3212_v33 = vpack.c.bf16 %v3201_v30, %v3200_v17 }
0x1529   :  { %5940 = vmatmul.mubr.msk.bf16.gmra.mxu0 %vm740_vm10, %v3212_v33 }
0x152a   :  { %5943 = vmatprep.mubr.msk.bf16.mxu0 %vm6679_vm3, %v8871_v48 }
0x152c   :  { %v3204_v40 = vpop.permute.xlu1 %3203 }
0x152d   :  { %v3209_v29 = vsel %vm136_vm1, %v8027_v20, %v3204_v40 }
0x1530   :  { %v3207_v38 = vpop.permute.xlu1 %3206 }
0x1531   :  { %v3210_v50 = vsel %vm329_vm4, %v3209_v29, %v3207_v38  ;;  %vm8887_vm4 = vcmask 138240  }
0x1532   :  { %v3213_v43 = vpack.c.bf16 %v3210_v50, %v3210_v50  ;;  %vm8889_vm6 = vmmov %vm8887_vm4 }
0x1533   :  { %vm8891_vm8 = vmmov %vm8887_vm4 }
0x1534   :  { %5944 = vmatmul.mubr.msk.bf16.gmra.mxu0 %vm740_vm10, %v3213_v43  ;;  %vm8892_vm9 = vmmov %vm8887_vm4 }
0x1535   :  { %vm8893_vm10 = vmmov %vm8888_vm5 }
0x15d8   :  { %v3306_v60 = vpop.f32.mrf.mxu0 }
0x15d9   :  { %v3357_v21 = vrot.slane %v3306_v60, 7 }
0x15da   :  { %v5937_v19 = vpop.f32.mrf.mxu0 }
0x15dc   :  { %v3309_v45 = vpop.f32.mrf.mxu0 }
0x15dd   :  { %v3358_v15 = vrot.slane %v3309_v45, 7 }
0x15de   :  { %v5938_v13 = vpop.f32.mrf.mxu0 }
0x15df   :  { %v8296_v7 = vpack.c.bf16 %v3358_v15, %v3358_v15  ;;  %v3359_v26 = vsel %vm835_vm11, %v3357_v21, %v3358_v15 }
0x15e1   :  { %3379 = vrot.lane.b32.xlu0 %v8296_v7, %s6680_s15 }
0x15e9   :  { %v3314_v10 = vpop.f32.mrf.mxu0 }
0x15ea   :  { %v3360_v53 = vrot.slane %v3314_v10, 7 }
0x15eb   :  { %v5941_v1 = vpop.f32.mrf.mxu0 }
0x15ed   :  { %v3317_v12 = vpop.f32.mrf.mxu0 }
0x15ee   :  { %v3361_v20 = vrot.slane %v3317_v12, 7 }
0x15ef   :  { %v5942_v42 = vpop.f32.mrf.mxu0 }
0x15f0   :  { %v8300_v36 = vpack.c.bf16 %v3361_v20, %v3361_v20  ;;  %v3362_v51 = vsel %vm835_vm11, %v3360_v53, %v3361_v20 }
0x15f2   :  { %3445 = vrot.lane.b32.xlu0 %v8300_v36, %s6680_s15 }
0x15f4   :  { %v3322_v47 = vpop.f32.mrf.mxu0 }
0x15f5   :  { %v3335_v25 = vrot.slane %v3322_v47, %v7297_v34 }
0x15f6   :  { %v5945_v3 = vpop.f32.mrf.mxu0 }
0x15f7   :  { %v3336_v14 = vcombine.high %v3335_v25, %v3335_v25  ;;  %v3343_v6 = vrot.slane %v3335_v25, %v7297_v34 }
0x15f8   :  { %v3325_v31 = vpop.f32.mrf.mxu0 }
0x15f9   :  { %v3350_v4 = vrot.slane %v3336_v14, %v7297_v34  ;;  %v3369_v46 = vsel %vm835_vm11, %v3343_v6, %v3357_v21 }
0x15fa   :  { %v8309_v16 = vpack.c.bf16 %v3359_v26, %v3369_v46  ;;  %v5946_v11 = vpop.f32.mrf.mxu0 }
0x15fb   :  { %v3370_v57 = vsel %vm835_vm11, %v3350_v4, %v3360_v53  ;;  %vm8894_vm11 = vmmov %vm8888_vm5 }
0x15fc   :  { %v8313_v44 = vpack.c.bf16 %v3362_v51, %v3370_v57  ;;  %3377 = vrot.lane.b32.xlu1 %v8309_v16, %s6680_s15  ;;  %5951 = vmatprep.mubr.msk.bf16.mxu0 %vm860_vm12, %v8309_v16 }
0x15fe   :  { %5959 = vmatprep.mubr.msk.bf16.mxu1 %vm860_vm12, %v8313_v44 }
0x1600   :  { %3443 = vrot.lane.b32.xlu1 %v8313_v44, %s6680_s15 }
0x1653   :  { %v3380_v34 = vpop.permute.xlu0 %3379 }
0x1654   :  { %6151 = vmatprep.subr.msk.bf16.mxu0 %vm860_vm12, %v3380_v34  ;;  %v3391_v9 = vsel %vm860_vm12, %v3380_v34, 0 }
0x1655   :  { %5948 = vmatpush3.bf16.xpose.msra.mxu0 %v3391_v9 }
0x1664   :  { %v3446_v27 = vpop.permute.xlu0 %3445 }
0x1665   :  { %6153 = vmatprep.subr.msk.bf16.mxu1 %vm860_vm12, %v3446_v27  ;;  %v3457_v63 = vsel %vm860_vm12, %v3446_v27, 0 }
0x1666   :  { %5956 = vmatpush3.bf16.xpose.msra.mxu1 %v3457_v63 }
0x166e   :  { %v3378_v56 = vpop.permute.xlu1 %3377 }
0x166f   :  { %6152 = vmatprep.subr.msk.bf16.mxu0 %vm860_vm12, %v3378_v56  ;;  %v3388_v58 = vsel %vm860_vm12, %v3378_v56, 0 }
0x1670   :  { %5950 = vmatpush3.bf16.xpose.msra.mxu0 %v3388_v58 }
0x1672   :  { %v3444_v54 = vpop.permute.xlu1 %3443 }
0x1673   :  { %6154 = vmatprep.subr.msk.bf16.mxu1 %vm860_vm12, %v3444_v54  ;;  %v3454_v24 = vsel %vm860_vm12, %v3444_v54, 0 }
0x1674   :  { %5958 = vmatpush3.bf16.xpose.msra.mxu1 %v3454_v24 }
0x1677   :  { %5952 = vmatmul.mubr.msk.bf16.vlgmr.msra.gmra.mxu0 %vm860_vm12, %v8296_v7 }
0x167b   :  { %5960 = vmatmul.mubr.msk.bf16.vlgmr.msra.gmra.mxu1 %vm860_vm12, %v8300_v36 }
0x1737   :  { %v5953_v18 = vpop.f32.mrf.mxu0 }
0x1738   :  { %v3513_v32 = vsel %vm8888_vm5, %v5953_v18, -inf  ;;  %vm8895_vm5 = vmmov %vm8887_vm4 }
0x1739   :  { %v3427_v8 = vpop.f32.mrf.mxu0 }
0x173a   :  { %v3507_v35 = vsel %vm8887_vm4, %v3427_v8, -inf }
0x173b   :  { %3508 = vmax.xlane.f32.xlu0 %v3507_v35  ;;  %v5954_v0 = vpop.f32.mrf.mxu0  ;;  %v5961_v37 = vpop.f32.mrf.mxu1 }
0x173c   :  { %v3522_v28 = vsel %vm8890_vm7, %v5961_v37, -inf  ;;  %vm8897_vm7 = vmmov %vm8887_vm4 }
0x173d   :  { %v3430_v41 = vpop.f32.mrf.mxu0  ;;  %v3493_v62 = vpop.f32.mrf.mxu1 }
0x173e   :  { %v3510_v59 = vsel %vm8889_vm6, %v3430_v41, -inf  ;;  %v3516_v39 = vsel %vm8891_vm8, %v3493_v62, -inf  ;;  %vm8896_vm6 = vmmov %vm8887_vm4 }
0x173f   :  { %3514 = vmax.xlane.f32.xlu0 %v3513_v32  ;;  %3511 = vmax.xlane.f32.xlu1 %v3510_v59  ;;  %v5962_v5 = vpop.f32.mrf.mxu1  ;;  %vm8898_vm8 = vmmov %vm8887_vm4 }
0x1741   :  { %v3496_v23 = vpop.f32.mrf.mxu1 }
0x1742   :  { %v3519_v17 = vsel %vm8892_vm9, %v3496_v23, -inf  ;;  %vm8899_vm9 = vmmov %vm8887_vm4 }
0x1743   :  { %3523 = vmax.xlane.f32.xlu1 %v3522_v28  ;;  %3517 = vmax.xlane.f32.xlu0 %v3516_v39 }
0x1747   :  { %3520 = vmax.xlane.f32.xlu0 %v3519_v17 }
0x1754   :  { %3577 = vrot.lane.b32.xlu1 %v8309_v16, %s6677_s18 }
0x1758   :  { %3641 = vrot.lane.b32.xlu1 %v8300_v36, %s6677_s18 }
0x175d   :  { %3579 = vrot.lane.b32.xlu0 %v8296_v7, %s6677_s18 }
0x17c4   :  { %v3509_v30 = vpop.xlane.xlu0 %3508 }
0x17c5   :  { %v3525_v33 = vsub.f32 %v3427_v8, %v3509_v30 }
0x17c7   :  { %v3531_v43 = vmul.f32 1.442695, %v3525_v33 }
0x17c8   :  { %v3512_v40 = vpop.xlane.xlu1 %3511  ;;  %v3515_v29 = vpop.xlane.xlu0 %3514 }
0x17c9   :  { %v3527_v38 = vsub.f32 %v5953_v18, %v3515_v29  ;;  %v3526_v13 = vsub.f32 %v3430_v41, %v3512_v40 }
0x17cb   :  { %v3535_v50 = vmul.f32 1.442695, %v3527_v38  ;;  %v3533_v42 = vmul.f32 1.442695, %v3526_v13 }
0x17cc   :  { %v3524_v60 = vpop.xlane.xlu1 %3523  ;;  %v3518_v19 = vpop.xlane.xlu0 %3517 }
0x17cd   :  { %v3530_v45 = vsub.f32 %v5961_v37, %v3524_v60  ;;  %v3528_v15 = vsub.f32 %v3493_v62, %v3518_v19  ;;  %6507 = vpow2.f32 %v3535_v50 }
0x17ce   :  { %6509 = vpow2.f32 %v3531_v43 }
0x17cf   :  { %v3541_v10 = vmul.f32 1.442695, %v3530_v45  ;;  %v3537_v1 = vmul.f32 1.442695, %v3528_v15 }
0x17d0   :  { %v3578_v12 = vpop.permute.xlu1 %3577  ;;  %v3521_v20 = vpop.xlane.xlu0 %3520 }
0x17d1   :  { %6511 = vpow2.f32 %v3541_v10  ;;  %v3529_v34 = vsub.f32 %v3496_v23, %v3521_v20 }
0x17d2   :  { %6513 = vpow2.f32 %v3537_v1 }
0x17d3   :  { %6515 = vpow2.f32 %v3533_v42  ;;  %v3539_v9 = vmul.f32 1.442695, %v3529_v34 }
0x17d4   :  { %v3642_v47 = vpop.permute.xlu1 %3641  ;;  %v3580_v25 = vpop.permute.xlu0 %3579 }
0x17d5   :  { %v3651_v3 = vand.u32 %v3642_v47, %v7348_v49  ;;  %v3589_v21 = vand.u32 %v3580_v25, %v7348_v49  ;;  %6517 = vpow2.f32 %v3539_v9 }
0x17d7   :  { %5963 = vmatprep.subr.bf16.mxu0 %v3589_v21  ;;  %5971 = vmatprep.subr.bf16.mxu1 %v3651_v3 }
0x17d8   :  { %5964 = vmatpush3.bf16.msra.mxu0 %v3589_v21  ;;  %5972 = vmatpush3.bf16.msra.mxu1 %v3651_v3 }
0x17d9   :  { %5965 = vmatprep.subr.bf16.mxu0 %v3578_v12 }
0x17da   :  { %v6508_v14 = vpop.eup %6507 }
0x17db   :  { %v3549_v6 = vsel %vm8893_vm10, %v6508_v14, 0.0  ;;  %v6510_v31 = vpop.eup %6509  ;;  %vm8900_vm10 = vmmov %vm8887_vm4 }
0x17dc   :  { %5966 = vmatpush3.bf16.msra.mxu0 %v3578_v12  ;;  %3550 = vadd.xlane.f32.xlu0 %v3549_v6  ;;  %v3543_v46 = vsel %vm8887_vm4, %v6510_v31, 0.0 }
0x17de   :  { %v8350_v26 = vpop.eup %6511 }
0x17df   :  { %v3558_v53 = vsel %vm8894_vm11, %v8350_v26, 0.0  ;;  %v8354_v4 = vpop.eup %6513  ;;  %vm8901_vm11 = vmmov %vm8887_vm4 }
0x17e0   :  { %3559 = vadd.xlane.f32.xlu1 %v3558_v53  ;;  %3544 = vadd.xlane.f32.xlu0 %v3543_v46  ;;  %v3552_v11 = vsel %vm8895_vm5, %v8354_v4, 0.0  ;;  %v6516_v51 = vpop.eup %6515  ;;  %vm8902_vm5 = vcmask 131072  }
0x17e1   :  { %v3546_v57 = vsel %vm8896_vm6, %v6516_v51, 0.0  ;;  %vm8903_vm6 = vmmov %vm8887_vm4 }
0x17e2   :  { %v6518_v27 = vpop.eup %6517 }
0x17e3   :  { %v3555_v63 = vsel %vm8897_vm7, %v6518_v27, 0.0  ;;  %vm8904_vm7 = vmmov %vm8902_vm5 }
0x17e4   :  { %3553 = vadd.xlane.f32.xlu1 %v3552_v11 }
0x17e8   :  { %3547 = vadd.xlane.f32.xlu1 %v3546_v57 }
0x17f6   :  { %3639 = vrot.lane.b32.xlu0 %v8313_v44, %s6677_s18  ;;  %s8950_s18 = smov 24  }
0x17f9   :  { %3707 = vrot.lane.b32.xlu1 %v8296_v7, %s6682_s16 }
0x17fd   :  { %3705 = vrot.lane.b32.xlu1 %v8309_v16, %s6682_s16 }
0x1801   :  { %3701 = vrot.lane.b32.xlu1 %v8309_v16, %s6683_s0 }
0x1805   :  { %3773 = vrot.lane.b32.xlu1 %v8313_v44, %s6682_s16 }
0x1809   :  { %3771 = vrot.lane.b32.xlu1 %v8300_v36, %s6683_s0 }
0x1815   :  { %3556 = vadd.xlane.f32.xlu0 %v3555_v63 }
0x182b   :  { %3775 = vrot.lane.b32.xlu0 %v8300_v36, %s6682_s16 }
0x182f   :  { %3703 = vrot.lane.b32.xlu0 %v8296_v7, %s6683_s0 }
0x1833   :  { %3769 = vrot.lane.b32.xlu0 %v8313_v44, %s6683_s0 }
0x1865   :  { %v3551_v56 = vpop.xlane.xlu0 %3550 }
0x1866   :  { %6519 = vrcp.f32 %v3551_v56 }
0x1869   :  { %v3560_v58 = vpop.xlane.xlu1 %3559  ;;  %v3545_v54 = vpop.xlane.xlu0 %3544 }
0x186a   :  { %6521 = vrcp.f32 %v3545_v54 }
0x186d   :  { %v3554_v24 = vpop.xlane.xlu1 %3553  ;;  %v3640_v18 = vpop.permute.xlu0 %3639 }
0x186e   :  { %5973 = vmatprep.subr.bf16.mxu1 %v3640_v18 }
0x186f   :  { %5974 = vmatpush3.bf16.msra.mxu1 %v3640_v18 }
0x1871   :  { %v3548_v8 = vpop.xlane.xlu1 %3547 }
0x1872   :  { %6523 = vrcp.f32 %v3548_v8 }
0x1873   :  { %v6520_v0 = vpop.eup %6519  ;;  %6525 = vrcp.f32 %v3560_v58 }
0x1874   :  { %v3566_v32 = vmul.f32 %v6520_v0, %v6508_v14  ;;  %6527 = vrcp.f32 %v3554_v24 }
0x1875   :  { %v3708_v35 = vpop.permute.xlu1 %3707 }
0x1876   :  { %6155 = vmatprep.subr.msk.bf16.mxu0 %vm860_vm12, %v3708_v35  ;;  %v3574_v39 = vpack.c.bf16 %v3566_v32, %v3566_v32  ;;  %v3719_v23 = vsel %vm860_vm12, %v3708_v35, 0 }
0x1877   :  { %v6522_v37 = vpop.eup %6521 }
0x1878   :  { %v3562_v59 = vmul.f32 %v6522_v37, %v6510_v31 }
0x1879   :  { %v3706_v62 = vpop.permute.xlu1 %3705 }
0x187a   :  { %v3716_v30 = vsel %vm860_vm12, %v3706_v62, 0 }
0x187d   :  { %v3702_v17 = vpop.permute.xlu1 %3701 }
0x187f   :  { %v6524_v41 = vpop.eup %6523 }
0x1880   :  { %v3564_v5 = vmul.f32 %v6524_v41, %v6516_v51  ;;  %v6526_v38 = vpop.eup %6525 }
0x1881   :  { %v6528_v50 = vpop.eup %6527  ;;  %v3572_v60 = vmul.f32 %v6526_v38, %v8350_v26  ;;  %v3774_v12 = vpop.permute.xlu1 %3773 }
0x1882   :  { %v3573_v28 = vpack.c.bf16 %v3564_v5, %v3562_v59  ;;  %v3568_v19 = vmul.f32 %v6528_v50, %v8354_v4  ;;  %v3784_v20 = vsel %vm860_vm12, %v3774_v12, 0 }
0x1883   :  { %v3576_v13 = vpack.c.bf16 %v3572_v60, %v3572_v60 }
0x1884   :  { %5967 = vmatprep.mubr.msk.bf16.mxu0 %vm8898_vm8, %v3573_v28  ;;  %vm8905_vm8 = vmmov %vm8887_vm4 }
0x1885   :  { %5968 = vmatmul.mubr.msk.bf16.vlgmr.msra.gmra.mxu0 %vm8899_vm9, %v3574_v39  ;;  %v3772_v42 = vpop.permute.xlu1 %3771  ;;  %vm8906_vm9 = vmmov %vm8887_vm4 }
0x1886   :  { %5980 = vmatpush3.bf16.xpose.msra.mxu0 %v3719_v23  ;;  %5983 = vmatprep.mubr.msk.bf16.mxu0 %vm860_vm12, %v3702_v17 }
0x1887   :  { %6156 = vmatprep.subr.msk.bf16.mxu0 %vm860_vm12, %v3706_v62 }
0x188e   :  { %5982 = vmatpush3.bf16.xpose.msra.mxu0 %v3716_v30 }
0x189e   :  { %v3557_v33 = vpop.xlane.xlu0 %3556 }
0x189f   :  { %6529 = vrcp.f32 %v3557_v33 }
0x18a2   :  { %v3776_v40 = vpop.permute.xlu0 %3775 }
0x18a3   :  { %6157 = vmatprep.subr.msk.bf16.mxu1 %vm860_vm12, %v3776_v40  ;;  %v3787_v10 = vsel %vm860_vm12, %v3776_v40, 0 }
0x18a6   :  { %v3704_v29 = vpop.permute.xlu0 %3703 }
0x18a7   :  { %5984 = vmatmul.mubr.msk.bf16.vlgmr.msra.gmra.mxu0 %vm860_vm12, %v3704_v29 }
0x18aa   :  { %v3770_v1 = vpop.permute.xlu0 %3769 }
0x18ac   :  { %v6530_v43 = vpop.eup %6529 }
0x18ad   :  { %v3570_v45 = vmul.f32 %v6530_v43, %v6518_v27 }
0x18af   :  { %v3575_v15 = vpack.c.bf16 %v3570_v45, %v3568_v19 }
0x18b1   :  { %5975 = vmatprep.mubr.msk.bf16.mxu1 %vm8900_vm10, %v3575_v15  ;;  %vm8907_vm10 = vmmov %vm8902_vm5 }
0x18b2   :  { %5976 = vmatmul.mubr.msk.bf16.vlgmr.msra.gmra.mxu1 %vm8901_vm11, %v3576_v13  ;;  %vm8908_vm11 = vmmov %vm8887_vm4 }
0x18b3   :  { %5988 = vmatpush3.bf16.xpose.msra.mxu1 %v3787_v10  ;;  %5991 = vmatprep.mubr.msk.bf16.mxu1 %vm860_vm12, %v3770_v1 }
0x18b4   :  { %6158 = vmatprep.subr.msk.bf16.mxu1 %vm860_vm12, %v3774_v12 }
0x18bb   :  { %5990 = vmatpush3.bf16.xpose.msra.mxu1 %v3784_v20 }
0x18c2   :  { %5992 = vmatmul.mubr.msk.bf16.vlgmr.msra.gmra.mxu1 %vm860_vm12, %v3772_v42 }
0x1945   :  { %v8397_v47 = vpop.f32.mrf.mxu0 }
0x1947   :  { %v8399_v25 = vpop.f32.mrf.mxu0 }
0x1949   :  { %v5970_v3 = vpop.f32.mrf.mxu0 }
0x194b   :  { %v8401_v21 = vpop.f32.mrf.mxu0 }
0x1967   :  { %v5985_v14 = vpop.f32.mrf.mxu0 }
0x1968   :  { %v3843_v4 = vsel %vm8902_vm5, %v5985_v14, -inf }
0x1969   :  { %v3755_v6 = vpop.f32.mrf.mxu0 }
0x196a   :  { %v3837_v31 = vsel %vm8887_vm4, %v3755_v6, -inf  ;;  %vm8909_vm4 = vmmov %vm8902_vm5 }
0x196b   :  { %3838 = vmax.xlane.f32.xlu0 %v3837_v31  ;;  %v5986_v26 = vpop.f32.mrf.mxu0  ;;  %vm8910_vm5 = vmmov %vm8903_vm6 }
0x196d   :  { %v3758_v53 = vpop.f32.mrf.mxu0 }
0x196e   :  { %v3840_v46 = vsel %vm8903_vm6, %v3758_v53, -inf  ;;  %vm8911_vm6 = vmmov %vm8910_vm5 }
0x196f   :  { %3844 = vmax.xlane.f32.xlu0 %v3843_v4  ;;  %3841 = vmax.xlane.f32.xlu1 %v3840_v46 }
0x1972   :  { %v8406_v11 = vpop.f32.mrf.mxu1 }
0x1974   :  { %v8408_v51 = vpop.f32.mrf.mxu1 }
0x1976   :  { %v5978_v57 = vpop.f32.mrf.mxu1 }
0x1978   :  { %v8410_v34 = vpop.f32.mrf.mxu1 }
0x1982   :  { %v5993_v9 = vpop.f32.mrf.mxu1 }
0x1983   :  { %v3852_v27 = vsel %vm8904_vm7, %v5993_v9, -inf  ;;  %vm8912_vm7 = vmmov %vm8910_vm5 }
0x1984   :  { %3853 = vmax.xlane.f32.xlu1 %v3852_v27  ;;  %v3823_v63 = vpop.f32.mrf.mxu1 }
0x1985   :  { %v3846_v56 = vsel %vm8905_vm8, %v3823_v63, -inf  ;;  %vm8913_vm8 = vmmov %vm8910_vm5 }
0x1986   :  { %3847 = vmax.xlane.f32.xlu0 %v3846_v56  ;;  %v5994_v58 = vpop.f32.mrf.mxu1 }
0x1988   :  { %v3826_v54 = vpop.f32.mrf.mxu1 }
0x1989   :  { %v3849_v24 = vsel %vm8906_vm9, %v3826_v54, -inf  ;;  %vm8914_vm9 = vmmov %vm8910_vm5 }
0x198a   :  { %3850 = vmax.xlane.f32.xlu0 %v3849_v24 }
0x1995   :  { %3907 = vrot.lane.b32.xlu1 %v8309_v16, %s6684_s2 }
0x1999   :  { %3971 = vrot.lane.b32.xlu1 %v8300_v36, %s6684_s2 }
0x19a0   :  { %3909 = vrot.lane.b32.xlu0 %v8296_v7, %s6684_s2 }
0x19f4   :  { %v3839_v18 = vpop.xlane.xlu0 %3838 }
0x19f5   :  { %v3855_v8 = vsub.f32 %v3755_v6, %v3839_v18 }
0x19f7   :  { %v3861_v41 = vmul.f32 1.442695, %v3855_v8 }
0x19f8   :  { %v3845_v35 = vpop.xlane.xlu0 %3844  ;;  %v3842_v62 = vpop.xlane.xlu1 %3841 }
0x19f9   :  { %v3857_v0 = vsub.f32 %v5985_v14, %v3845_v35  ;;  %v3856_v17 = vsub.f32 %v3758_v53, %v3842_v62 }
0x19fb   :  { %v3865_v37 = vmul.f32 1.442695, %v3857_v0  ;;  %v3863_v43 = vmul.f32 1.442695, %v3856_v17 }
0x19fd   :  { %6531 = vpow2.f32 %v3865_v37 }
0x19fe   :  { %6533 = vpow2.f32 %v3861_v41 }
0x1a0a   :  { %v8421_v32 = vpop.eup %6531 }
0x1a0b   :  { %v3879_v59 = vsel %vm8907_vm10, %v8421_v32, 0.0  ;;  %v8425_v5 = vpop.eup %6533  ;;  %vm8915_vm10 = vmmov %vm8910_vm5 }
0x1a0c   :  { %3880 = vadd.xlane.f32.xlu0 %v3879_v59  ;;  %v3873_v40 = vsel %vm8908_vm11, %v8425_v5, 0.0  ;;  %vm8916_vm11 = vmmov %vm8910_vm5 }
0x1a0d   :  { %v3854_v28 = vpop.xlane.xlu1 %3853 }
0x1a0e   :  { %v3860_v39 = vsub.f32 %v5993_v9, %v3854_v28 }
0x1a0f   :  { %v3848_v23 = vpop.xlane.xlu0 %3847 }
0x1a10   :  { %v3871_v30 = vmul.f32 1.442695, %v3860_v39  ;;  %v3858_v33 = vsub.f32 %v3823_v63, %v3848_v23  ;;  %3874 = vadd.xlane.f32.xlu0 %v3873_v40 }
0x1a11   :  { %v3908_v29 = vpop.permute.xlu1 %3907 }
0x1a12   :  { %6535 = vpow2.f32 %v3871_v30  ;;  %v3867_v38 = vmul.f32 1.442695, %v3858_v33 }
0x1a13   :  { %v3851_v50 = vpop.xlane.xlu0 %3850 }
0x1a14   :  { %6537 = vpow2.f32 %v3867_v38  ;;  %v3859_v3 = vsub.f32 %v3826_v54, %v3851_v50 }
0x1a15   :  { %v3972_v60 = vpop.permute.xlu1 %3971  ;;  %6539 = vpow2.f32 %v3863_v43 }
0x1a16   :  { %v3981_v19 = vand.u32 %v3972_v60, %v7348_v49  ;;  %v3869_v14 = vmul.f32 1.442695, %v3859_v3 }
0x1a17   :  { %v3910_v45 = vpop.permute.xlu0 %3909 }
0x1a18   :  { %v3919_v15 = vand.u32 %v3910_v45, %v7348_v49  ;;  %6003 = vmatprep.subr.bf16.mxu1 %v3981_v19  ;;  %6541 = vpow2.f32 %v3869_v14 }
0x1a19   :  { %6004 = vmatpush3.bf16.msra.mxu1 %v3981_v19 }
0x1a1a   :  { %5995 = vmatprep.subr.bf16.mxu0 %v3919_v15 }
0x1a1b   :  { %5996 = vmatpush3.bf16.msra.mxu0 %v3919_v15 }
0x1a1c   :  { %5997 = vmatprep.subr.bf16.mxu0 %v3908_v29 }
0x1a1f   :  { %v8431_v13 = vpop.eup %6535  ;;  %5998 = vmatpush3.bf16.msra.mxu0 %v3908_v29 }
0x1a20   :  { %v3888_v10 = vsel %vm8909_vm4, %v8431_v13, 0.0  ;;  %vm8917_vm4 = vmmov %vm8910_vm5 }
0x1a21   :  { %v8435_v1 = vpop.eup %6537  ;;  %3889 = vadd.xlane.f32.xlu1 %v3888_v10 }
0x1a22   :  { %v3882_v12 = vsel %vm8910_vm5, %v8435_v1, 0.0  ;;  %v6540_v20 = vpop.eup %6539  ;;  %vm8918_vm5 = vcmask 131072  }
0x1a23   :  { %v3876_v42 = vsel %vm8911_vm6, %v6540_v20, 0.0  ;;  %vm8919_vm6 = vmmov %vm8917_vm4 }
0x1a25   :  { %3883 = vadd.xlane.f32.xlu1 %v3882_v12  ;;  %v6542_v6 = vpop.eup %6541 }
0x1a26   :  { %3969 = vrot.lane.b32.xlu0 %v8313_v44, %s6684_s2  ;;  %v3885_v31 = vsel %vm8912_vm7, %v6542_v6, 0.0  ;;  %vm8920_vm7 = vmmov %vm8918_vm5 }
0x1a29   :  { %3877 = vadd.xlane.f32.xlu1 %v3876_v42 }
0x1a3a   :  { %4037 = vrot.lane.b32.xlu1 %v8296_v7, %s6685_s19 }
0x1a3e   :  { %4035 = vrot.lane.b32.xlu1 %v8309_v16, %s6685_s19 }
0x1a42   :  { %4031 = vrot.lane.b32.xlu1 %v8309_v16, %s6686_s20 }
0x1a45   :  { %3886 = vadd.xlane.f32.xlu0 %v3885_v31 }
0x1a46   :  { %4103 = vrot.lane.b32.xlu1 %v8313_v44, %s6685_s19 }
0x1a4a   :  { %4101 = vrot.lane.b32.xlu1 %v8300_v36, %s6686_s20 }
0x1a5b   :  { %4105 = vrot.lane.b32.xlu0 %v8300_v36, %s6685_s19 }
0x1a5f   :  { %4033 = vrot.lane.b32.xlu0 %v8296_v7, %s6686_s20 }
0x1a63   :  { %4099 = vrot.lane.b32.xlu0 %v8313_v44, %s6686_s20 }
0x1a95   :  { %v3881_v26 = vpop.xlane.xlu0 %3880 }
0x1a96   :  { %6543 = vrcp.f32 %v3881_v26 }
0x1a99   :  { %v3875_v53 = vpop.xlane.xlu0 %3874 }
0x1a9a   :  { %6545 = vrcp.f32 %v3875_v53 }
0x1a9d   :  { %v3970_v4 = vpop.permute.xlu0 %3969 }
0x1a9e   :  { %6005 = vmatprep.subr.bf16.mxu1 %v3970_v4 }
0x1a9f   :  { %6006 = vmatpush3.bf16.msra.mxu1 %v3970_v4 }
0x1aa3   :  { %v6544_v63 = vpop.eup %6543 }
0x1aa4   :  { %v3896_v24 = vmul.f32 %v6544_v63, %v8421_v32 }
0x1aa6   :  { %v3904_v0 = vpack.c.bf16 %v3896_v24, %v3896_v24 }
0x1aa7   :  { %v6546_v56 = vpop.eup %6545 }
0x1aa8   :  { %v3892_v18 = vmul.f32 %v6546_v56, %v8425_v5 }
0x1aaa   :  { %v3890_v46 = vpop.xlane.xlu1 %3889 }
0x1aae   :  { %v3884_v57 = vpop.xlane.xlu1 %3883 }
0x1ab2   :  { %v3878_v9 = vpop.xlane.xlu1 %3877 }
0x1ab3   :  { %6547 = vrcp.f32 %v3878_v9 }
0x1ab4   :  { %6549 = vrcp.f32 %v3890_v46 }
0x1ab5   :  { %6551 = vrcp.f32 %v3884_v57 }
0x1ab6   :  { %v4038_v27 = vpop.permute.xlu1 %4037 }
0x1ab7   :  { %6159 = vmatprep.subr.msk.bf16.mxu0 %vm860_vm12, %v4038_v27  ;;  %v4049_v37 = vsel %vm860_vm12, %v4038_v27, 0 }
0x1aba   :  { %v4036_v54 = vpop.permute.xlu1 %4035 }
0x1abb   :  { %v4046_v62 = vsel %vm860_vm12, %v4036_v54, 0 }
0x1abe   :  { %v4032_v41 = vpop.permute.xlu1 %4031 }
0x1ac0   :  { %v6548_v58 = vpop.eup %6547 }
0x1ac1   :  { %v3894_v8 = vmul.f32 %v6548_v58, %v6540_v20  ;;  %v6550_v28 = vpop.eup %6549 }
0x1ac2   :  { %v6552_v39 = vpop.eup %6551  ;;  %v3902_v17 = vmul.f32 %v6550_v28, %v8431_v13  ;;  %v4104_v43 = vpop.permute.xlu1 %4103 }
0x1ac3   :  { %v3903_v35 = vpack.c.bf16 %v3894_v8, %v3892_v18  ;;  %v3898_v30 = vmul.f32 %v6552_v39, %v8435_v1  ;;  %v4114_v60 = vsel %vm860_vm12, %v4104_v43, 0 }
0x1ac4   :  { %v3906_v29 = vpack.c.bf16 %v3902_v17, %v3902_v17 }
0x1ac5   :  { %5999 = vmatprep.mubr.msk.bf16.mxu0 %vm8913_vm8, %v3903_v35  ;;  %vm8921_vm8 = vmmov %vm8917_vm4 }
0x1ac6   :  { %6000 = vmatmul.mubr.msk.bf16.vlgmr.msra.gmra.mxu0 %vm8914_vm9, %v3904_v0  ;;  %v4102_v19 = vpop.permute.xlu1 %4101  ;;  %vm8922_vm9 = vmmov %vm8917_vm4 }
0x1ac7   :  { %6012 = vmatpush3.bf16.xpose.msra.mxu0 %v4049_v37  ;;  %6015 = vmatprep.mubr.msk.bf16.mxu0 %vm860_vm12, %v4032_v41 }
0x1ac8   :  { %6160 = vmatprep.subr.msk.bf16.mxu0 %vm860_vm12, %v4036_v54 }
0x1ace   :  { %v3887_v32 = vpop.xlane.xlu0 %3886 }
0x1acf   :  { %6014 = vmatpush3.bf16.xpose.msra.mxu0 %v4046_v62  ;;  %6553 = vrcp.f32 %v3887_v32 }
0x1ad2   :  { %v4106_v59 = vpop.permute.xlu0 %4105 }
0x1ad3   :  { %6161 = vmatprep.subr.msk.bf16.mxu1 %vm860_vm12, %v4106_v59  ;;  %v4117_v38 = vsel %vm860_vm12, %v4106_v59, 0 }
0x1ad6   :  { %v4034_v5 = vpop.permute.xlu0 %4033 }
0x1ad7   :  { %6016 = vmatmul.mubr.msk.bf16.vlgmr.msra.gmra.mxu0 %vm860_vm12, %v4034_v5 }
0x1ada   :  { %v4100_v50 = vpop.permute.xlu0 %4099 }
0x1adc   :  { %v6554_v23 = vpop.eup %6553 }
0x1add   :  { %v3900_v33 = vmul.f32 %v6554_v23, %v6542_v6 }
0x1adf   :  { %v3905_v40 = vpack.c.bf16 %v3900_v33, %v3898_v30 }
0x1ae1   :  { %6007 = vmatprep.mubr.msk.bf16.mxu1 %vm8915_vm10, %v3905_v40  ;;  %vm8923_vm10 = vmmov %vm8918_vm5 }
0x1ae2   :  { %6008 = vmatmul.mubr.msk.bf16.vlgmr.msra.gmra.mxu1 %vm8916_vm11, %v3906_v29  ;;  %vm8924_vm11 = vmmov %vm8917_vm4 }
0x1ae3   :  { %6020 = vmatpush3.bf16.xpose.msra.mxu1 %v4117_v38  ;;  %6023 = vmatprep.mubr.msk.bf16.mxu1 %vm860_vm12, %v4100_v50 }
0x1ae4   :  { %6162 = vmatprep.subr.msk.bf16.mxu1 %vm860_vm12, %v4104_v43 }
0x1aeb   :  { %6022 = vmatpush3.bf16.xpose.msra.mxu1 %v4114_v60 }
0x1af2   :  { %6024 = vmatmul.mubr.msk.bf16.vlgmr.msra.gmra.mxu1 %vm860_vm12, %v4102_v19 }
0x1b86   :  { %v8479_v45 = vpop.f32.mrf.mxu0 }
0x1b88   :  { %v8481_v15 = vpop.f32.mrf.mxu0 }
0x1b8a   :  { %v6002_v13 = vpop.f32.mrf.mxu0 }
0x1b8c   :  { %v8483_v10 = vpop.f32.mrf.mxu0 }
0x1b8d   :  { %v6284_v1 = vpack.i.bf16 %v8483_v10, %v8481_v15 }
0x1b97   :  { %v6017_v12 = vpop.f32.mrf.mxu0 }
0x1b98   :  { %v4173_v6 = vsel %vm8918_vm5, %v6017_v12, -inf }
0x1b99   :  { %v4085_v20 = vpop.f32.mrf.mxu0 }
0x1b9a   :  { %v4167_v42 = vsel %vm8917_vm4, %v4085_v20, -inf  ;;  %vm8925_vm4 = vmmov %vm8918_vm5 }
0x1b9b   :  { %4168 = vmax.xlane.f32.xlu0 %v4167_v42  ;;  %v6018_v3 = vpop.f32.mrf.mxu0  ;;  %vm8926_vm5 = vmmov %vm8919_vm6 }
0x1b9d   :  { %v4088_v14 = vpop.f32.mrf.mxu0 }
0x1b9e   :  { %v4170_v31 = vsel %vm8919_vm6, %v4088_v14, -inf  ;;  %vm8927_vm6 = vmmov %vm8926_vm5 }
0x1b9f   :  { %4174 = vmax.xlane.f32.xlu0 %v4173_v6  ;;  %4171 = vmax.xlane.f32.xlu1 %v4170_v31 }
0x1ba2   :  { %v8490_v26 = vpop.f32.mrf.mxu1 }
0x1ba4   :  { %v8492_v53 = vpop.f32.mrf.mxu1 }
0x1ba5   :  { %v6289_v4 = vpack.i.bf16 %v8492_v53, %v8479_v45 }
0x1ba6   :  { %v6010_v46 = vpop.f32.mrf.mxu1 }
0x1ba8   :  { %v8496_v57 = vpop.f32.mrf.mxu1 }
0x1ba9   :  { %v6309_v9 = vpack.i.bf16 %v8490_v26, %v8496_v57 }
0x1bb2   :  { %v6025_v27 = vpop.f32.mrf.mxu1 }
0x1bb3   :  { %v4182_v63 = vsel %vm8920_vm7, %v6025_v27, -inf  ;;  %vm8928_vm7 = vmmov %vm8926_vm5 }
0x1bb4   :  { %4183 = vmax.xlane.f32.xlu1 %v4182_v63  ;;  %v4153_v56 = vpop.f32.mrf.mxu1 }
0x1bb5   :  { %v4176_v58 = vsel %vm8921_vm8, %v4153_v56, -inf  ;;  %vm8929_vm8 = vmmov %vm8926_vm5 }
0x1bb6   :  { %4177 = vmax.xlane.f32.xlu0 %v4176_v58  ;;  %v6026_v54 = vpop.f32.mrf.mxu1 }
0x1bb8   :  { %v4156_v24 = vpop.f32.mrf.mxu1 }
0x1bb9   :  { %v4179_v18 = vsel %vm8922_vm9, %v4156_v24, -inf  ;;  %vm8930_vm9 = vmmov %vm8926_vm5 }
0x1bba   :  { %4180 = vmax.xlane.f32.xlu0 %v4179_v18 }
0x1bc5   :  { %4237 = vrot.lane.b32.xlu1 %v8309_v16, %s6687_s21 }
0x1bc9   :  { %4301 = vrot.lane.b32.xlu1 %v8300_v36, %s6687_s21 }
0x1bd0   :  { %4239 = vrot.lane.b32.xlu0 %v8296_v7, %s6687_s21 }
0x1c24   :  { %v4169_v8 = vpop.xlane.xlu0 %4168 }
0x1c25   :  { %v4185_v35 = vsub.f32 %v4085_v20, %v4169_v8 }
0x1c27   :  { %v4191_v62 = vmul.f32 1.442695, %v4185_v35 }
0x1c28   :  { %v4175_v0 = vpop.xlane.xlu0 %4174  ;;  %v4172_v32 = vpop.xlane.xlu1 %4171 }
0x1c29   :  { %v4187_v37 = vsub.f32 %v6017_v12, %v4175_v0  ;;  %v4186_v30 = vsub.f32 %v4088_v14, %v4172_v32 }
0x1c2b   :  { %v4195_v41 = vmul.f32 1.442695, %v4187_v37  ;;  %v4193_v60 = vmul.f32 1.442695, %v4186_v30 }
0x1c2d   :  { %6555 = vpow2.f32 %v4195_v41 }
0x1c2e   :  { %6557 = vpow2.f32 %v4191_v62 }
0x1c3a   :  { %v8509_v59 = vpop.eup %6555 }
0x1c3b   :  { %v4209_v5 = vsel %vm8923_vm10, %v8509_v59, 0.0  ;;  %v8513_v28 = vpop.eup %6557  ;;  %vm8931_vm10 = vmmov %vm8926_vm5 }
0x1c3c   :  { %4210 = vadd.xlane.f32.xlu0 %v4209_v5  ;;  %v4203_v29 = vsel %vm8924_vm11, %v8513_v28, 0.0  ;;  %vm8932_vm11 = vmmov %vm8926_vm5 }
0x1c3d   :  { %v4184_v39 = vpop.xlane.xlu1 %4183 }
0x1c3e   :  { %v4190_v23 = vsub.f32 %v6025_v27, %v4184_v39 }
0x1c3f   :  { %v4178_v17 = vpop.xlane.xlu0 %4177 }
0x1c40   :  { %v4201_v33 = vmul.f32 1.442695, %v4190_v23  ;;  %v4188_v40 = vsub.f32 %v4153_v56, %v4178_v17  ;;  %4204 = vadd.xlane.f32.xlu0 %v4203_v29 }
0x1c41   :  { %v4238_v38 = vpop.permute.xlu1 %4237 }
0x1c42   :  { %6559 = vpow2.f32 %v4201_v33  ;;  %v4197_v50 = vmul.f32 1.442695, %v4188_v40 }
0x1c43   :  { %v4181_v43 = vpop.xlane.xlu0 %4180 }
0x1c44   :  { %6561 = vpow2.f32 %v4197_v50  ;;  %v4189_v27 = vsub.f32 %v4156_v24, %v4181_v43 }
0x1c45   :  { %v4302_v19 = vpop.permute.xlu1 %4301  ;;  %6563 = vpow2.f32 %v4193_v60 }
0x1c46   :  { %v4311_v13 = vand.u32 %v4302_v19, %v7348_v49  ;;  %v4199_v63 = vmul.f32 1.442695, %v4189_v27 }
0x1c47   :  { %v4240_v12 = vpop.permute.xlu0 %4239 }
0x1c48   :  { %v4249_v20 = vand.u32 %v4240_v12, %v7348_v49  ;;  %6035 = vmatprep.subr.bf16.mxu1 %v4311_v13  ;;  %6565 = vpow2.f32 %v4199_v63 }
0x1c49   :  { %6036 = vmatpush3.bf16.msra.mxu1 %v4311_v13 }
0x1c4a   :  { %6027 = vmatprep.subr.bf16.mxu0 %v4249_v20 }
0x1c4b   :  { %6028 = vmatpush3.bf16.msra.mxu0 %v4249_v20 }
0x1c4c   :  { %6029 = vmatprep.subr.bf16.mxu0 %v4238_v38 }
0x1c4f   :  { %v8519_v42 = vpop.eup %6559  ;;  %6030 = vmatpush3.bf16.msra.mxu0 %v4238_v38 }
0x1c50   :  { %v4218_v3 = vsel %vm8925_vm4, %v8519_v42, 0.0  ;;  %vm8933_vm4 = vmmov %vm8926_vm5 }
0x1c51   :  { %v8523_v14 = vpop.eup %6561  ;;  %4219 = vadd.xlane.f32.xlu1 %v4218_v3 }
0x1c52   :  { %v4212_v6 = vsel %vm8926_vm5, %v8523_v14, 0.0  ;;  %v6564_v31 = vpop.eup %6563  ;;  %vm8934_vm5 = vcmask 131072  }
0x1c53   :  { %v4206_v46 = vsel %vm8927_vm6, %v6564_v31, 0.0  ;;  %vm8935_vm6 = vmmov %vm8933_vm4 }
0x1c55   :  { %4213 = vadd.xlane.f32.xlu1 %v4212_v6  ;;  %v6566_v56 = vpop.eup %6565 }
0x1c56   :  { %4299 = vrot.lane.b32.xlu0 %v8313_v44, %s6687_s21  ;;  %v4215_v58 = vsel %vm8928_vm7, %v6566_v56, 0.0  ;;  %vm8936_vm7 = vmmov %vm8934_vm5 }
0x1c59   :  { %4207 = vadd.xlane.f32.xlu1 %v4206_v46 }
0x1c6a   :  { %4367 = vrot.lane.b32.xlu1 %v8296_v7, %s6688_s22 }
0x1c6e   :  { %4365 = vrot.lane.b32.xlu1 %v8309_v16, %s6688_s22 }
0x1c72   :  { %4361 = vrot.lane.b32.xlu1 %v8309_v16, %s6689_s23 }
0x1c75   :  { %4216 = vadd.xlane.f32.xlu0 %v4215_v58 }
0x1c76   :  { %4433 = vrot.lane.b32.xlu1 %v8313_v44, %s6688_s22 }
0x1c7a   :  { %4431 = vrot.lane.b32.xlu1 %v8300_v36, %s6689_s23 }
0x1c8b   :  { %4435 = vrot.lane.b32.xlu0 %v8300_v36, %s6688_s22  ;;  %s6695_s22 = smov [#allocation4]  }
0x1c8f   :  { %4363 = vrot.lane.b32.xlu0 %v8296_v7, %s6689_s23 }
0x1c93   :  { %4429 = vrot.lane.b32.xlu0 %v8313_v44, %s6689_s23  ;;  %s5279_s23 = sshll.u32 %s6695_s22, 4  ;;  %s5280_s23 = int_to_ptr.vmem [resolvable:$true] %s5279_s23 }
0x1cc5   :  { %v4211_v54 = vpop.xlane.xlu0 %4210 }
0x1cc6   :  { %6567 = vrcp.f32 %v4211_v54 }
0x1cc9   :  { %v4205_v24 = vpop.xlane.xlu0 %4204 }
0x1cca   :  { %6569 = vrcp.f32 %v4205_v24 }
0x1ccd   :  { %v4300_v18 = vpop.permute.xlu0 %4299 }
0x1cce   :  { %6037 = vmatprep.subr.bf16.mxu1 %v4300_v18 }
0x1ccf   :  { %6038 = vmatpush3.bf16.msra.mxu1 %v4300_v18 }
0x1cd3   :  { %v6568_v41 = vpop.eup %6567 }
0x1cd4   :  { %v4226_v39 = vmul.f32 %v6568_v41, %v8509_v59 }
0x1cd6   :  { %v4234_v33 = vpack.c.bf16 %v4226_v39, %v4226_v39 }
0x1cd7   :  { %v6570_v62 = vpop.eup %6569 }
0x1cd8   :  { %v4222_v23 = vmul.f32 %v6570_v62, %v8513_v28 }
0x1cda   :  { %v4220_v8 = vpop.xlane.xlu1 %4219 }
0x1cde   :  { %v4214_v35 = vpop.xlane.xlu1 %4213 }
0x1ce2   :  { %v4208_v0 = vpop.xlane.xlu1 %4207 }
0x1ce3   :  { %6571 = vrcp.f32 %v4208_v0 }
0x1ce4   :  { %6573 = vrcp.f32 %v4220_v8 }
0x1ce5   :  { %6575 = vrcp.f32 %v4214_v35 }
0x1ce6   :  { %v4368_v37 = vpop.permute.xlu1 %4367 }
0x1ce7   :  { %6163 = vmatprep.subr.msk.bf16.mxu0 %vm860_vm12, %v4368_v37  ;;  %v4379_v40 = vsel %vm860_vm12, %v4368_v37, 0 }
0x1cea   :  { %v4366_v5 = vpop.permute.xlu1 %4365 }
0x1ceb   :  { %v4376_v59 = vsel %vm860_vm12, %v4366_v5, 0 }
0x1cee   :  { %v4362_v29 = vpop.permute.xlu1 %4361 }
0x1cf0   :  { %v6572_v32 = vpop.eup %6571 }
0x1cf1   :  { %v4224_v17 = vmul.f32 %v6572_v32, %v6564_v31  ;;  %v6574_v43 = vpop.eup %6573 }
0x1cf2   :  { %v6576_v60 = vpop.eup %6575  ;;  %v4232_v13 = vmul.f32 %v6574_v43, %v8519_v42  ;;  %v4434_v27 = vpop.permute.xlu1 %4433 }
0x1cf3   :  { %v4233_v30 = vpack.c.bf16 %v4224_v17, %v4222_v23  ;;  %v4228_v12 = vmul.f32 %v6576_v60, %v8523_v14  ;;  %v4444_v42 = vsel %vm860_vm12, %v4434_v27, 0 }
0x1cf4   :  { %v4236_v6 = vpack.c.bf16 %v4232_v13, %v4232_v13 }
0x1cf5   :  { %6031 = vmatprep.mubr.msk.bf16.mxu0 %vm8929_vm8, %v4233_v30  ;;  %vm8937_vm8 = vmmov %vm8933_vm4 }
0x1cf6   :  { %6032 = vmatmul.mubr.msk.bf16.vlgmr.msra.gmra.mxu0 %vm8930_vm9, %v4234_v33  ;;  %v4432_v14 = vpop.permute.xlu1 %4431  ;;  %vm8938_vm9 = vmmov %vm8933_vm4 }
0x1cf7   :  { %6044 = vmatpush3.bf16.xpose.msra.mxu0 %v4379_v40  ;;  %6047 = vmatprep.mubr.msk.bf16.mxu0 %vm860_vm12, %v4362_v29 }
0x1cf8   :  { %6164 = vmatprep.subr.msk.bf16.mxu0 %vm860_vm12, %v4366_v5 }
0x1cfe   :  { %v4217_v28 = vpop.xlane.xlu0 %4216 }
0x1cff   :  { %6046 = vmatpush3.bf16.xpose.msra.mxu0 %v4376_v59  ;;  %6577 = vrcp.f32 %v4217_v28 }
0x1d02   :  { %v4436_v38 = vpop.permute.xlu0 %4435 }
0x1d03   :  { %6165 = vmatprep.subr.msk.bf16.mxu1 %vm860_vm12, %v4436_v38  ;;  %v4447_v31 = vsel %vm860_vm12, %v4436_v38, 0 }
0x1d06   :  { %v4364_v50 = vpop.permute.xlu0 %4363 }
0x1d07   :  { %6048 = vmatmul.mubr.msk.bf16.vlgmr.msra.gmra.mxu0 %vm860_vm12, %v4364_v50 }
0x1d0a   :  { %v4430_v46 = vpop.permute.xlu0 %4429 }
0x1d0c   :  { %v6578_v19 = vpop.eup %6577 }
0x1d0d   :  { %v4230_v20 = vmul.f32 %v6578_v19, %v6566_v56 }
0x1d0f   :  { %v4235_v3 = vpack.c.bf16 %v4230_v20, %v4228_v12 }
0x1d11   :  { %6039 = vmatprep.mubr.msk.bf16.mxu1 %vm8931_vm10, %v4235_v3  ;;  %vm8939_vm10 = vmmov %vm8934_vm5 }
0x1d12   :  { %6040 = vmatmul.mubr.msk.bf16.vlgmr.msra.gmra.mxu1 %vm8932_vm11, %v4236_v6  ;;  %vm8940_vm11 = vmmov %vm8933_vm4 }
0x1d13   :  { %6052 = vmatpush3.bf16.xpose.msra.mxu1 %v4447_v31  ;;  %6055 = vmatprep.mubr.msk.bf16.mxu1 %vm860_vm12, %v4430_v46 }
0x1d14   :  { %6166 = vmatprep.subr.msk.bf16.mxu1 %vm860_vm12, %v4434_v27 }
0x1d1b   :  { %6054 = vmatpush3.bf16.xpose.msra.mxu1 %v4444_v42 }
0x1d22   :  { %6056 = vmatmul.mubr.msk.bf16.vlgmr.msra.gmra.mxu1 %vm860_vm12, %v4432_v14 }
0x1db6   :  { %v8567_v63 = vpop.f32.mrf.mxu0 }
0x1db8   :  { %v8569_v56 = vpop.f32.mrf.mxu0 }
0x1dba   :  { %v6034_v58 = vpop.f32.mrf.mxu0 }
0x1dbc   :  { %v8571_v54 = vpop.f32.mrf.mxu0 }
0x1dbd   :  { %v6294_v24 = vpack.i.bf16 %v8571_v54, %v8569_v56 }
0x1dc7   :  { %v6049_v18 = vpop.f32.mrf.mxu0 }
0x1dc8   :  { %v4503_v41 = vsel %vm8934_vm5, %v6049_v18, -inf }
0x1dc9   :  { %v4415_v8 = vpop.f32.mrf.mxu0 }
0x1dca   :  { %v4497_v35 = vsel %vm8933_vm4, %v4415_v8, -inf  ;;  %vm8941_vm4 = vmmov %vm8934_vm5 }
0x1dcb   :  { %4498 = vmax.xlane.f32.xlu0 %v4497_v35  ;;  %v6050_v0 = vpop.f32.mrf.mxu0  ;;  %vm8942_vm5 = vmmov %vm8935_vm6 }
0x1dcd   :  { %v4418_v37 = vpop.f32.mrf.mxu0 }
0x1dce   :  { %v4500_v62 = vsel %vm8935_vm6, %v4418_v37, -inf  ;;  %vm8943_vm6 = vmmov %vm8942_vm5 }
0x1dcf   :  { %4504 = vmax.xlane.f32.xlu0 %v4503_v41  ;;  %4501 = vmax.xlane.f32.xlu1 %v4500_v62 }
0x1dd2   :  { %v8578_v32 = vpop.f32.mrf.mxu1 }
0x1dd4   :  { %v8580_v5 = vpop.f32.mrf.mxu1 }
0x1dd5   :  { %v6299_v39 = vpack.i.bf16 %v8580_v5, %v8567_v63 }
0x1dd6   :  { %v6042_v23 = vpop.f32.mrf.mxu1 }
0x1dd8   :  { %v8584_v17 = vpop.f32.mrf.mxu1 }
0x1dd9   :  { %v6314_v30 = vpack.i.bf16 %v8578_v32, %v8584_v17 }
0x1de2   :  { %v6057_v33 = vpop.f32.mrf.mxu1 }
0x1de3   :  { %v4512_v40 = vsel %vm8936_vm7, %v6057_v33, -inf  ;;  %vm8944_vm7 = vmmov %vm8942_vm5 }
0x1de4   :  { %4513 = vmax.xlane.f32.xlu1 %v4512_v40  ;;  %v4483_v29 = vpop.f32.mrf.mxu1 }
0x1de5   :  { %v4506_v59 = vsel %vm8937_vm8, %v4483_v29, -inf  ;;  %vm8946_vm8 = vmmov %vm8942_vm5 }
0x1de6   :  { %4507 = vmax.xlane.f32.xlu0 %v4506_v59  ;;  %v6058_v28 = vpop.f32.mrf.mxu1 }
0x1de8   :  { %v4486_v38 = vpop.f32.mrf.mxu1 }
0x1de9   :  { %v4509_v50 = vsel %vm8938_vm9, %v4486_v38, -inf  ;;  %vm8947_vm9 = vmmov %vm8942_vm5 }
0x1dea   :  { %4510 = vmax.xlane.f32.xlu0 %v4509_v50 }
0x1e54   :  { %v4499_v43 = vpop.xlane.xlu0 %4498 }
0x1e55   :  { %v4515_v60 = vsub.f32 %v4415_v8, %v4499_v43 }
0x1e57   :  { %v4521_v20 = vmul.f32 1.442695, %v4515_v60 }
0x1e58   :  { %v4505_v19 = vpop.xlane.xlu0 %4504  ;;  %v4502_v3 = vpop.xlane.xlu1 %4501 }
0x1e59   :  { %v4517_v13 = vsub.f32 %v6049_v18, %v4505_v19  ;;  %v4516_v14 = vsub.f32 %v4418_v37, %v4502_v3 }
0x1e5b   :  { %v4525_v12 = vmul.f32 1.442695, %v4517_v13  ;;  %v4523_v0 = vmul.f32 1.442695, %v4516_v14 }
0x1e5d   :  { %6579 = vpow2.f32 %v4525_v12 }
0x1e5e   :  { %6581 = vpow2.f32 %v4521_v20 }
0x1e6a   :  { %v8591_v6 = vpop.eup %6579 }
0x1e6b   :  { %v4539_v31 = vsel %vm8939_vm10, %v8591_v6, 0.0  ;;  %v8595_v46 = vpop.eup %6581  ;;  %vm8948_vm10 = vmmov %vm8942_vm5 }
0x1e6c   :  { %4540 = vadd.xlane.f32.xlu0 %v4539_v31  ;;  %v4533_v18 = vsel %vm8940_vm11, %v8595_v46, 0.0  ;;  %vm8949_vm11 = vmmov %vm8942_vm5 }
0x1e6d   :  { %v4514_v27 = vpop.xlane.xlu1 %4513 }
0x1e6e   :  { %v4520_v42 = vsub.f32 %v6057_v33, %v4514_v27 }
0x1e6f   :  { %v4508_v63 = vpop.xlane.xlu0 %4507 }
0x1e70   :  { %v4531_v58 = vmul.f32 1.442695, %v4520_v42  ;;  %v4518_v8 = vsub.f32 %v4483_v29, %v4508_v63  ;;  %4534 = vadd.xlane.f32.xlu0 %v4533_v18 }
0x1e72   :  { %6583 = vpow2.f32 %v4531_v58  ;;  %v4527_v35 = vmul.f32 1.442695, %v4518_v8  ;;  %v6351_v8 = vld [vmem:[%s8818_s6 + $0x18] sm:$0xff]  }
0x1e73   :  { %v4511_v41 = vpop.xlane.xlu0 %4510 }
0x1e74   :  { %6585 = vpow2.f32 %v4527_v35  ;;  %v4519_v62 = vsub.f32 %v4486_v38, %v4511_v41  ;;  %v6352_v41 = vld [vmem:[%s8818_s6 + $0x10] sm:$0xff]  }
0x1e75   :  { %6587 = vpow2.f32 %v4523_v0 }
0x1e76   :  { %v4529_v5 = vmul.f32 1.442695, %v4519_v62 }
0x1e78   :  { %6589 = vpow2.f32 %v4529_v5 }
0x1e7f   :  { %v6584_v23 = vpop.eup %6583 }
0x1e80   :  { %v4548_v33 = vsel %vm8941_vm4, %v6584_v23, 0.0 }
0x1e81   :  { %v6586_v37 = vpop.eup %6585  ;;  %4549 = vadd.xlane.f32.xlu1 %v4548_v33 }
0x1e82   :  { %v6588_v40 = vpop.eup %6587  ;;  %v4542_v29 = vsel %vm8942_vm5, %v6586_v37, 0.0 }
0x1e83   :  { %v4536_v50 = vsel %vm8944_vm7, %v6588_v40, 0.0 }
0x1e85   :  { %v6590_v59 = vpop.eup %6589  ;;  %4543 = vadd.xlane.f32.xlu1 %v4542_v29 }
0x1e86   :  { %v4545_v28 = vsel %vm8943_vm6, %v6590_v59, 0.0 }
0x1e87   :  { %4546 = vadd.xlane.f32.xlu0 %v4545_v28 }
0x1e89   :  { %4537 = vadd.xlane.f32.xlu1 %v4536_v50 }
0x1e9a   :  { %4567 = vrot.lane.b32.xlu1 %v8309_v16, %s6690_s24 }
0x1e9d   :  { %4569 = vrot.lane.b32.xlu0 %v8296_v7, %s6690_s24 }
0x1e9e   :  { %4631 = vrot.lane.b32.xlu1 %v8300_v36, %s6690_s24 }
0x1ea1   :  { %6285 = vrot.lane.b32.xlu0 %v6284_v1, %s6691_s25 }
0x1ea2   :  { %4629 = vrot.lane.b32.xlu1 %v8313_v44, %s6690_s24 }
0x1ea5   :  { %6295 = vrot.lane.b32.xlu0 %v6294_v24, %s8945_s4 }
0x1ea6   :  { %6290 = vrot.lane.b32.xlu1 %v6289_v4, %s6691_s25 }
0x1eaa   :  { %6300 = vrot.lane.b32.xlu1 %v6299_v39, %s8945_s4 }
0x1ef5   :  { %v4541_v7 = vpop.xlane.xlu0 %4540 }
0x1ef6   :  { %6591 = vrcp.f32 %v4541_v7 }
0x1ef9   :  { %v4535_v16 = vpop.xlane.xlu0 %4534 }
0x1f03   :  { %v6592_v45 = vpop.eup %6591 }
0x1f04   :  { %v4556_v3 = vmul.f32 %v6592_v45, %v8591_v6 }
0x1f06   :  { %v4564_v63 = vpack.c.bf16 %v4556_v3, %v4556_v3 }
0x1f0a   :  { %v4550_v36 = vpop.xlane.xlu1 %4549 }
0x1f0b   :  { %6593 = vrcp.f32 %v4550_v36 }
0x1f0e   :  { %v4544_v15 = vpop.xlane.xlu1 %4543 }
0x1f0f   :  { %6595 = vrcp.f32 %v4544_v15 }
0x1f10   :  { %6597 = vrcp.f32 %v4535_v16  ;;  %v4547_v44 = vpop.xlane.xlu0 %4546 }
0x1f11   :  { %6599 = vrcp.f32 %v4547_v44 }
0x1f12   :  { %v4538_v10 = vpop.xlane.xlu1 %4537 }
0x1f13   :  { %6601 = vrcp.f32 %v4538_v10 }
0x1f14   :  { %v4570_v1 = vpop.permute.xlu0 %4569 }
0x1f15   :  { %v4579_v56 = vand.u32 %v4570_v1, %v7348_v49 }
0x1f16   :  { %v4568_v54 = vpop.permute.xlu1 %4567 }
0x1f17   :  { %6059 = vmatprep.subr.bf16.mxu0 %v4579_v56 }
0x1f18   :  { %6060 = vmatpush3.bf16.msra.mxu0 %v4579_v56  ;;  %v6594_v4 = vpop.eup %6593 }
0x1f19   :  { %6061 = vmatprep.subr.bf16.mxu0 %v4568_v54  ;;  %v4562_v12 = vmul.f32 %v6594_v4, %v6584_v23 }
0x1f1a   :  { %v4632_v53 = vpop.permute.xlu1 %4631 }
0x1f1b   :  { %v4641_v24 = vand.u32 %v4632_v53, %v7348_v49  ;;  %v4566_v14 = vpack.c.bf16 %v4562_v12, %v4562_v12 }
0x1f1c   :  { %v6596_v39 = vpop.eup %6595  ;;  %6062 = vmatpush3.bf16.msra.mxu0 %v4568_v54 }
0x1f1d   :  { %v6598_v38 = vpop.eup %6597  ;;  %6067 = vmatprep.subr.bf16.mxu1 %v4641_v24  ;;  %6075 = vmatprep.subr.bf16.mxu0 %v8871_v48  ;;  %v4558_v19 = vmul.f32 %v6596_v39, %v6586_v37 }
0x1f1e   :  { %v6600_v43 = vpop.eup %6599  ;;  %6068 = vmatpush3.bf16.msra.mxu1 %v4641_v24  ;;  %v4630_v60 = vpop.permute.xlu1 %4629  ;;  %v4552_v27 = vmul.f32 %v6598_v38, %v8595_v46 }
0x1f1f   :  { %6069 = vmatprep.subr.bf16.mxu1 %v4630_v60  ;;  %v4560_v13 = vmul.f32 %v6600_v43, %v6590_v59 }
0x1f20   :  { %v6602_v20 = vpop.eup %6601 }
0x1f21   :  { %v4565_v31 = vpack.c.bf16 %v4560_v13, %v4558_v19  ;;  %v4554_v49 = vmul.f32 %v6602_v20, %v6588_v40 }
0x1f22   :  { %6070 = vmatpush3.bf16.msra.mxu1 %v4630_v60  ;;  %v6291_v17 = vpop.permute.xlu1 %6290 }
0x1f23   :  { %6071 = vmatprep.mubr.msk.bf16.mxu1 %vm8946_vm8, %v4565_v31  ;;  %v4563_v42 = vpack.c.bf16 %v4554_v49, %v4552_v27  ;;  %6091 = vmatprep.subr.bf16.mxu1 %v8871_v48  ;;  %v6292_v40 = vunpack.i.l.bf16 %v6291_v17  ;;  %v6293_v38 = vunpack.i.h.bf16 %v6291_v17 }
0x1f25   :  { %6063 = vmatprep.mubr.msk.bf16.mxu0 %vm8947_vm9, %v4563_v42  ;;  %6072 = vmatmul.mubr.msk.bf16.vlgmr.msra.gmra.mxu1 %vm8948_vm10, %v4566_v14  ;;  %v4765_v16 = vsel %vm860_vm12, %v8397_v47, %v6292_v40 }
0x1f26   :  { %6064 = vmatmul.mubr.msk.bf16.vlgmr.msra.gmra.mxu0 %vm8949_vm11, %v4564_v63  ;;  %6095 = vmatprep.mubr.msk.bf16.mxu1 %vm6679_vm3, %v8871_v48  ;;  %v6301_v33 = vpop.permute.xlu1 %6300  ;;  %v4766_v63 = vsel %vm860_vm12, %v8408_v51, %v6293_v38 }
0x1f27   :  { %6079 = vmatprep.mubr.msk.bf16.mxu0 %vm6679_vm3, %v8871_v48  ;;  %6076 = vmatpush3.bf16.msra.mxu0 %v6351_v8  ;;  %v6302_v59 = vunpack.i.l.bf16 %v6301_v33  ;;  %v6303_v60 = vunpack.i.h.bf16 %v6301_v33 }
0x1f28   :  { %6077 = vmatprep.subr.bf16.mxu0 %v8871_v48 }
0x1f29   :  { %v4771_v57 = vsel %vm2253_vm0, %v4765_v16, %v6302_v59 }
0x1f2b   :  { %6078 = vmatpush3.bf16.msra.mxu0 %v6352_v41 }
0x1f2c   :  { %6107 = vmatprep.subr.bf16.mxu0 %v8871_v48 }
0x1fe5   :  { %v6073_v6 = vpop.f32.mrf.mxu1 }
0x1fe6   :  { %v6065_v46 = vpop.f32.mrf.mxu0 }
0x1fe7   :  { %v4677_v58 = vpop.f32.mrf.mxu1  ;;  %4749 = vrot.lane.b32.xlu1 %v6065_v46, %s8950_s18 }
0x1fe8   :  { %v4615_v18 = vpop.f32.mrf.mxu0 }
0x1fe9   :  { %v6074_v35 = vpop.f32.mrf.mxu1 }
0x1fea   :  { %v6066_v0 = vpop.f32.mrf.mxu0 }
0x1feb   :  { %6315 = vrot.lane.b32.xlu1 %v6314_v30, %s8945_s4  ;;  %v4680_v23 = vpop.f32.mrf.mxu1  ;;  %v6286_v30 = vpop.permute.xlu0 %6285 }
0x1fec   :  { %v4618_v62 = vpop.f32.mrf.mxu0  ;;  %v6319_v32 = vpack.i.bf16 %v4680_v23, %v4677_v58  ;;  %v6288_v29 = vunpack.i.h.bf16 %v6286_v30  ;;  %v6287_v50 = vunpack.i.l.bf16 %v6286_v30  ;;  %v5461_v30 = vld [vmem:[%s8821_s9 + $0xc] ss:$0 sm:$0xff] }
0x1fed   :  { %v6304_v5 = vpack.i.bf16 %v4618_v62, %v4615_v18 }
0x1fee   :  { %v4764_v26 = vsel %vm860_vm12, %v8401_v21, %v6288_v29  ;;  %v4763_v15 = vsel %vm860_vm12, %v8399_v25, %v6287_v50 }
0x1fef   :  { %4755 = vrot.lane.b32.xlu1 %v6073_v6, %s8950_s18  ;;  %6305 = vrot.lane.b32.xlu0 %v6304_v5, %s8950_s18  ;;  %v6296_v37 = vpop.permute.xlu0 %6295 }
0x1ff0   :  { %v6298_v7 = vunpack.i.h.bf16 %v6296_v37  ;;  %v6297_v36 = vunpack.i.l.bf16 %v6296_v37 }
0x1ff2   :  { %v4769_v56 = vsel %vm2253_vm0, %v4763_v15, %v6297_v36  ;;  %v4770_v54 = vsel %vm2253_vm0, %v4764_v26, %v6298_v7 }
0x1ff3   :  { %6310 = vrot.lane.b32.xlu0 %v6309_v9, %s6691_s25 }
0x1ff7   :  { %6320 = vrot.lane.b32.xlu0 %v6319_v32, %s8950_s18 }
0x2059   :  { %v4750_v28 = vpop.permute.xlu1 %4749 }
0x205a   :  { %v4777_v44 = vsel %vm2260_vm15, %v4771_v57, %v4750_v28 }
0x205b   :  { %v4790_v21 = vrot.slane %v4777_v44, 1 }
0x205d   :  { %v6316_v45 = vpop.permute.xlu1 %6315 }
0x205e   :  { %v6318_v19 = vunpack.i.h.bf16 %v6316_v45  ;;  %v6317_v27 = vunpack.i.l.bf16 %v6316_v45 }
0x2061   :  { %v6306_v9 = vpop.permute.xlu0 %6305  ;;  %v4756_v49 = vpop.permute.xlu1 %4755 }
0x2062   :  { %v6308_v10 = vunpack.i.h.bf16 %v6306_v9  ;;  %v6307_v1 = vunpack.i.l.bf16 %v6306_v9 }
0x2064   :  { %v4775_v47 = vsel %vm2260_vm15, %v4769_v56, %v6307_v1  ;;  %v4776_v53 = vsel %vm2260_vm15, %v4770_v54, %v6308_v10 }
0x2065   :  { %v4787_v4 = vrot.slane %v4775_v47, 1  ;;  %v4788_v24 = vrot.slane %v4776_v53, 1  ;;  %v6311_v39 = vpop.permute.xlu0 %6310 }
0x2066   :  { %v6313_v43 = vunpack.i.h.bf16 %v6311_v39  ;;  %v6312_v25 = vunpack.i.l.bf16 %v6311_v39 }
0x2067   :  { %v4789_v13 = vsel %vm2273_vm14, %v4787_v4, %v4788_v24  ;;  %v4791_v12 = vsel %vm2273_vm14, %v4788_v24, %v4790_v21 }
0x2068   :  { %v4768_v20 = vsel %vm860_vm12, %v8406_v11, %v6313_v43  ;;  %v4767_v3 = vsel %vm860_vm12, %v8410_v34, %v6312_v25  ;;  %v4804_v31 = vpack.c.bf16 %v4791_v12, %v4789_v13  ;;  %v4772_v11 = vsel %vm2253_vm0, %v4766_v63, %v6303_v60 }
0x2069   :  { %v4774_v42 = vsel %vm2253_vm0, %v4768_v20, %v6318_v19  ;;  %v6321_v14 = vpop.permute.xlu0 %6320  ;;  %v4773_v8 = vsel %vm2253_vm0, %v4767_v3, %v6317_v27 }
0x206a   :  { %v4780_v6 = vsel %vm2260_vm15, %v4774_v42, %v4756_v49  ;;  %v6323_v46 = vunpack.i.h.bf16 %v6321_v14  ;;  %v6322_v58 = vunpack.i.l.bf16 %v6321_v14  ;;  %6080 = vmatmul.mubr.msk.bf16.vlgmr.msra.gmra.mxu0 %vm136_vm1, %v4804_v31 }
0x206b   :  { %6083 = vmatprep.mubr.msk.bf16.mxu0 %vm6679_vm3, %v8871_v48  ;;  %v4795_v35 = vrot.slane %v4780_v6, 1 }
0x206c   :  { %v4778_v34 = vsel %vm2260_vm15, %v4772_v11, %v6322_v58  ;;  %v4779_v18 = vsel %vm2260_vm15, %v4773_v8, %v6323_v46 }
0x206d   :  { %v4792_v0 = vrot.slane %v4778_v34, 1  ;;  %v4793_v51 = vrot.slane %v4779_v18, 1  ;;  %v4801_v23 = vrot.slane %v4778_v34, 7  ;;  %v6353_v18 = vld [vmem:[%s8819_s7 + $0x18] sm:$0xff]  }
0x206e   :  { %6092 = vmatpush3.bf16.msra.mxu1 %v6353_v18 }
0x206f   :  { %v4794_v41 = vsel %vm2273_vm14, %v4792_v0, %v4793_v51  ;;  %v4796_v62 = vsel %vm2273_vm14, %v4793_v51, %v4795_v35  ;;  %v4802_v32 = vsel %vm2289_vm13, %v4801_v23, %v4775_v47  ;;  %v6354_v35 = vld [vmem:[%s8819_s7 + $0x10] sm:$0xff]   ;;  %6093 = vmatprep.subr.bf16.mxu1 %v8871_v48 }
0x2070   :  { %v4805_v5 = vpack.c.bf16 %v4796_v62, %v4794_v41  ;;  %v4806_v17 = vpack.c.bf16 %v4802_v32, %v4802_v32 }
0x2072   :  { %6084 = vmatmul.mubr.msk.bf16.gmra.mxu0 %vm136_vm1, %v4805_v5  ;;  %6094 = vmatpush3.bf16.msra.mxu1 %v6354_v35 }
0x2073   :  { %6087 = vmatprep.mubr.msk.bf16.mxu0 %vm6679_vm3, %v8871_v48 }
0x207a   :  { %6088 = vmatmul.mubr.msk.bf16.gmra.mxu0 %vm136_vm1, %v4806_v17 }
0x207b   :  { %6123 = vmatprep.mubr.msk.bf16.mxu0 %vm6679_vm3, %v8871_v48 }
0x212a   :  { %v4872_v33 = vpop.f32.mrf.mxu0 }
0x212b   :  { %v4873_v37 = vadd.f32 %v5461_v30, %v4872_v33 }
0x212c   :  { %v6081_v40 = vpop.f32.mrf.mxu0 }
0x212d   :  { %v8700_v29 = vadd.f32 %v4873_v37, %v7807_v52 }
0x212e   :  { %v4875_v59 = vpop.f32.mrf.mxu0 }
0x212f   :  { %v4876_v28 = vadd.f32 %v5461_v30, %v4875_v59  ;;  %v4901_v50 = vsel %vm136_vm1, %v8700_v29, 0.0 }
0x2130   :  { %4902 = vadd.xlane.f32.xlu0 %v4901_v50  ;;  %v6082_v7 = vpop.f32.mrf.mxu0 }
0x2131   :  { %v8705_v36 = vadd.f32 %v4876_v28, %v7812_v55 }
0x2132   :  { %v4880_v16 = vpop.f32.mrf.mxu0 }
0x2133   :  { %v4881_v26 = vadd.f32 %v5461_v30, %v4880_v16  ;;  %v4904_v57 = vsel %vm136_vm1, %v8705_v36, 0.0 }
0x2134   :  { %4905 = vadd.xlane.f32.xlu1 %v4904_v57  ;;  %v6085_v9 = vpop.f32.mrf.mxu0 }
0x2135   :  { %v8710_v52 = vadd.f32 %v4881_v26, %v7817_v22  ;;  %v5469_v26 = vld [vmem:[%s8821_s9 + $0xa] ss:$0 sm:$0xff] }
0x2136   :  { %v4883_v15 = vpop.f32.mrf.mxu0 }
0x2137   :  { %v4884_v44 = vadd.f32 %v5461_v30, %v4883_v15  ;;  %v4907_v10 = vsel %vm136_vm1, %v8710_v52, 0.0 }
0x2138   :  { %4908 = vadd.xlane.f32.xlu0 %v4907_v10  ;;  %v6086_v1 = vpop.f32.mrf.mxu0 }
0x2139   :  { %v8715_v55 = vadd.f32 %v4884_v44, %v7822_v2  ;;  %v5470_v44 = vld [vmem:[%s8821_s9 + $0xb] ss:$0 sm:$0xff] }
0x213a   :  { %v4888_v56 = vpop.f32.mrf.mxu0 }
0x213b   :  { %v4889_v54 = vadd.f32 %v5461_v30, %v4888_v56  ;;  %v4910_v45 = vsel %vm136_vm1, %v8715_v55, 0.0 }
0x213c   :  { %4911 = vadd.xlane.f32.xlu0 %v4910_v45  ;;  %v6089_v47 = vpop.f32.mrf.mxu0 }
0x213d   :  { %v8720_v22 = vadd.f32 %v4889_v54, %v7827_v61 }
0x213e   :  { %v4891_v53 = vpop.f32.mrf.mxu0 }
0x213f   :  { %v4913_v21 = vsel %vm225_vm2, %v8720_v22, 0.0 }
0x2140   :  { %4914 = vadd.xlane.f32.xlu0 %v4913_v21  ;;  %v6090_v4 = vpop.f32.mrf.mxu0 }
0x21b9   :  { %v4903_v24 = vpop.xlane.xlu0 %4902 }
0x21ba   :  { %v4916_v39 = vmul.f32 0.03125, %v4903_v24 }
0x21bc   :  { %v4921_v2 = vsub.f32 %v8700_v29, %v4916_v39 }
0x21bd   :  { %v4906_v38 = vpop.xlane.xlu1 %4905 }
0x21be   :  { %v4917_v43 = vmul.f32 0.03125, %v4906_v38  ;;  %v4926_v25 = vmul.f32 %v4921_v2, %v4921_v2 }
0x21c0   :  { %v4922_v60 = vsub.f32 %v8705_v36, %v4917_v43  ;;  %v4931_v19 = vsel %vm136_vm1, %v4926_v25, 0.0 }
0x21c1   :  { %4932 = vadd.xlane.f32.xlu1 %v4931_v19  ;;  %v4909_v61 = vpop.xlane.xlu0 %4908 }
0x21c2   :  { %v4918_v13 = vmul.f32 0.03125, %v4909_v61  ;;  %v4927_v12 = vmul.f32 %v4922_v60, %v4922_v60 }
0x21c4   :  { %v4923_v20 = vsub.f32 %v8710_v52, %v4918_v13  ;;  %v4934_v3 = vsel %vm136_vm1, %v4927_v12, 0.0  ;;  %v6355_v13 = vld [vmem:[%s8820_s8 + $0x78] sm:$0xff]   ;;  %v6356_v12 = vld [vmem:[%s8820_s8 + $0x70] sm:$0xff]  }
0x21c5   :  { %v4912_v31 = vpop.xlane.xlu0 %4911  ;;  %4935 = vadd.xlane.f32.xlu0 %v4934_v3  ;;  %6108 = vmatpush3.bf16.msra.mxu0 %v6355_v13  ;;  %v6358_v3 = vld [vmem:[%s8820_s8 + $0x60] sm:$0xff]  }
0x21c6   :  { %v4919_v27 = vmul.f32 0.03125, %v4912_v31  ;;  %v4928_v49 = vmul.f32 %v4923_v20, %v4923_v20  ;;  %6109 = vmatprep.subr.bf16.mxu0 %v8871_v48  ;;  %v6359_v31 = vld [vmem:[%s8820_s8 + $0x58] sm:$0xff]  }
0x21c8   :  { %v4924_v42 = vsub.f32 %v8715_v55, %v4919_v27  ;;  %v4937_v14 = vsel %vm136_vm1, %v4928_v49, 0.0  ;;  %v6360_v27 = vld [vmem:[%s8820_s8 + $0x50] sm:$0xff]   ;;  %v6361_v49 = vld [vmem:[%s8820_s8 + $0x48] sm:$0xff]  }
0x21c9   :  { %4938 = vadd.xlane.f32.xlu1 %v4937_v14  ;;  %v4915_v63 = vpop.xlane.xlu0 %4914  ;;  %6110 = vmatpush3.bf16.msra.mxu0 %v6356_v12  ;;  %v5476_v14 = vld [vmem:[%s8822_s10 + $0x1] ss:$0 sm:$0xff] }
0x21ca   :  { %v4920_v6 = vmul.f32 0.03125, %v4915_v63  ;;  %v4929_v46 = vmul.f32 %v4924_v42, %v4924_v42  ;;  %6111 = vmatprep.subr.bf16.mxu0 %v8871_v48 }
0x21cc   :  { %v4925_v58 = vsub.f32 %v8720_v22, %v4920_v6  ;;  %v4940_v11 = vsel %vm136_vm1, %v4929_v46, 0.0 }
0x21cd   :  { %4941 = vadd.xlane.f32.xlu0 %v4940_v11 }
0x21ce   :  { %v4930_v8 = vmul.f32 %v4925_v58, %v4925_v58 }
0x21d0   :  { %v4943_v34 = vsel %vm225_vm2, %v4930_v8, 0.0 }
0x21d1   :  { %4944 = vadd.xlane.f32.xlu1 %v4943_v34 }
0x224a   :  { %v4933_v0 = vpop.xlane.xlu1 %4932 }
0x224b   :  { %v4946_v51 = vmul.f32 0.03125, %v4933_v0 }
0x224d   :  { %v4951_v41 = vadd.f32 1e-05, %v4946_v51 }
0x224e   :  { %v4936_v62 = vpop.xlane.xlu0 %4935 }
0x224f   :  { %6603 = vrsqrt.f32 %v4951_v41  ;;  %v4947_v5 = vmul.f32 0.03125, %v4936_v62 }
0x2251   :  { %v4952_v23 = vadd.f32 1e-05, %v4947_v5 }
0x2252   :  { %v4939_v32 = vpop.xlane.xlu1 %4938 }
0x2253   :  { %6605 = vrsqrt.f32 %v4952_v23  ;;  %v4948_v17 = vmul.f32 0.03125, %v4939_v32 }
0x2255   :  { %v4953_v30 = vadd.f32 1e-05, %v4948_v17 }
0x2256   :  { %v4942_v33 = vpop.xlane.xlu0 %4941 }
0x2257   :  { %6607 = vrsqrt.f32 %v4953_v30  ;;  %v4949_v37 = vmul.f32 0.03125, %v4942_v33 }
0x2259   :  { %v4954_v40 = vadd.f32 1e-05, %v4949_v37 }
0x225a   :  { %v4945_v59 = vpop.xlane.xlu1 %4944 }
0x225b   :  { %6609 = vrsqrt.f32 %v4954_v40  ;;  %v4950_v28 = vmul.f32 0.03125, %v4945_v59 }
0x225c   :  { %v6604_v50 = vpop.eup %6603 }
0x225d   :  { %v4961_v7 = vmul.f32 %v6604_v50, %v4921_v2  ;;  %v4955_v16 = vadd.f32 1e-05, %v4950_v28 }
0x225f   :  { %6611 = vrsqrt.f32 %v4955_v16  ;;  %v4970_v15 = vmul.f32 %v5469_v26, %v4961_v7 }
0x2260   :  { %v6606_v57 = vpop.eup %6605 }
0x2261   :  { %v4962_v9 = vmul.f32 %v6606_v57, %v4922_v60  ;;  %v4979_v56 = vadd.f32 %v5470_v44, %v4970_v15 }
0x2263   :  { %v4971_v10 = vmul.f32 %v5469_v26, %v4962_v9 }
0x2264   :  { %v6608_v1 = vpop.eup %6607 }
0x2265   :  { %v4980_v54 = vadd.f32 %v5470_v44, %v4971_v10  ;;  %v4963_v45 = vmul.f32 %v6608_v1, %v4923_v20  ;;  %v6357_v20 = vld [vmem:[%s8820_s8 + $0x68] sm:$0xff]  }
0x2266   :  { %6112 = vmatpush3.bf16.msra.mxu0 %v6357_v20 }
0x2267   :  { %v4984_v47 = vpack.c.bf16 %v4980_v54, %v4979_v56  ;;  %v4972_v4 = vmul.f32 %v5469_v26, %v4963_v45  ;;  %6113 = vmatprep.subr.bf16.mxu0 %v8871_v48 }
0x2268   :  { %v6610_v53 = vpop.eup %6609 }
0x2269   :  { %6096 = vmatmul.mubr.msk.bf16.vlgmr.msra.gmra.mxu1 %vm136_vm1, %v4984_v47  ;;  %v4964_v21 = vmul.f32 %v6610_v53, %v4924_v42  ;;  %v4981_v2 = vadd.f32 %v5470_v44, %v4972_v4  ;;  %v6362_v42 = vld [vmem:[%s8820_s8 + $0x40] sm:$0xff]  }
0x226a   :  { %6099 = vmatprep.mubr.msk.bf16.mxu1 %vm6679_vm3, %v8871_v48  ;;  %6114 = vmatpush3.bf16.msra.mxu0 %v6358_v3 }
0x226b   :  { %v4973_v24 = vmul.f32 %v5469_v26, %v4964_v21  ;;  %6115 = vmatprep.subr.bf16.mxu0 %v8871_v48 }
0x226c   :  { %v6612_v39 = vpop.eup %6611 }
0x226d   :  { %v4982_v38 = vadd.f32 %v5470_v44, %v4973_v24  ;;  %v4965_v43 = vmul.f32 %v6612_v39, %v4925_v58 }
0x226e   :  { %6116 = vmatpush3.bf16.msra.mxu0 %v6359_v31 }
0x226f   :  { %v4985_v25 = vpack.c.bf16 %v4982_v38, %v4981_v2  ;;  %v4974_v60 = vmul.f32 %v5469_v26, %v4965_v43  ;;  %6117 = vmatprep.subr.bf16.mxu0 %v8871_v48 }
0x2271   :  { %6100 = vmatmul.mubr.msk.bf16.gmra.mxu1 %vm136_vm1, %v4985_v25  ;;  %v4983_v19 = vadd.f32 %v5470_v44, %v4974_v60 }
0x2272   :  { %6103 = vmatprep.mubr.msk.bf16.mxu1 %vm6679_vm3, %v8871_v48  ;;  %6118 = vmatpush3.bf16.msra.mxu0 %v6360_v27 }
0x2273   :  { %v4986_v61 = vpack.c.bf16 %v4983_v19, %v4983_v19  ;;  %6119 = vmatprep.subr.bf16.mxu0 %v8871_v48 }
0x2276   :  { %6120 = vmatpush3.bf16.msra.mxu0 %v6361_v49 }
0x2277   :  { %6121 = vmatprep.subr.bf16.mxu0 %v8871_v48 }
0x2279   :  { %6104 = vmatmul.mubr.msk.bf16.gmra.mxu1 %vm136_vm1, %v4986_v61 }
0x227a   :  { %6122 = vmatpush3.bf16.msra.mxu0 %v6362_v42 }
0x2329   :  { %v5055_v63 = vpop.f32.mrf.mxu1 }
0x232a   :  { %v5056_v6 = vadd.f32 %v5476_v14, %v5055_v63 }
0x232b   :  { %v6097_v46 = vpop.f32.mrf.mxu1 }
0x232c   :  { %v5082_v58 = vmul.f32 0.044715, %v5056_v6  ;;  %v5077_v25 = vmul.f32 0.5, %v5056_v6 }
0x232d   :  { %v5058_v11 = vpop.f32.mrf.mxu1 }
0x232e   :  { %v5087_v8 = vmul.f32 %v5082_v58, %v5056_v6  ;;  %v5059_v34 = vadd.f32 %v5476_v14, %v5058_v11 }
0x232f   :  { %v6098_v18 = vpop.f32.mrf.mxu1 }
0x2330   :  { %v5092_v35 = vmul.f32 %v5087_v8, %v5056_v6  ;;  %v5083_v0 = vmul.f32 0.044715, %v5059_v34  ;;  %v5078_v60 = vmul.f32 0.5, %v5059_v34  ;;  %v5499_v18 = vld [vmem:[%s8821_s9 + $0xd] ss:$0 sm:$0xff]  ;;  %s6694_s9 = smov [#allocation2]  }
0x2331   :  { %v5063_v51 = vpop.f32.mrf.mxu1  ;;  %s5266_s21 = sshll.u32 %s6694_s9, 4  ;;  %s5267_s21 = int_to_ptr.vmem [resolvable:$true] %s5266_s21 }
0x2332   :  { %v5097_v41 = vadd.f32 %v5092_v35, %v5056_v6  ;;  %v5088_v62 = vmul.f32 %v5083_v0, %v5059_v34  ;;  %v5064_v5 = vadd.f32 %v5476_v14, %v5063_v51  ;;  %s6624_s7 = scalar_lea.vmem %s5267_s21, 512  ;;  %p6629_p1 = scmp.lt.s32.totalorder %s5267_s21, %s5267_s21 }
0x2333   :  { %v6101_v23 = vpop.f32.mrf.mxu1  ;;  %p6625_p0 = scmp.ne.s32.totalorder %s5267_s21, %s6624_s7  ;;  %p6630_p2 = scmp.lt.s32.totalorder %s6624_s7, %s6624_s7 }
0x2334   :  { %v5102_v32 = vmul.f32 0.7978846, %v5097_v41  ;;  %v5093_v17 = vmul.f32 %v5088_v62, %v5059_v34  ;;  %v5084_v30 = vmul.f32 0.044715, %v5064_v5  ;;  %v5079_v27 = vmul.f32 0.5, %v5064_v5 }
0x2335   :  { %v5066_v33 = vpop.f32.mrf.mxu1  ;;  %p6631_p3 = por %p6630_p2, %p6629_p1 }
0x2336   :  { %6613 = vtanh.f32 %v5102_v32  ;;  %v5098_v37 = vadd.f32 %v5093_v17, %v5059_v34  ;;  %v5089_v40 = vmul.f32 %v5084_v30, %v5064_v5  ;;  %v5067_v59 = vadd.f32 %v5476_v14, %v5066_v33 }
0x2337   :  { %v6102_v28 = vpop.f32.mrf.mxu1  ;;  %p6632_p4 = pnand %p6631_p3, %p6625_p0 }
0x2338   :  { %v5103_v50 = vmul.f32 0.7978846, %v5098_v37  ;;  %v5094_v7 = vmul.f32 %v5089_v40, %v5064_v5  ;;  %v5085_v16 = vmul.f32 0.044715, %v5067_v59  ;;  %v5080_v49 = vmul.f32 0.5, %v5067_v59 }
0x2339   :  { %v5071_v26 = vpop.f32.mrf.mxu1 }
0x233a   :  { %6615 = vtanh.f32 %v5103_v50  ;;  %v5090_v57 = vmul.f32 %v5085_v16, %v5067_v59  ;;  %v5072_v9 = vadd.f32 %v5476_v14, %v5071_v26  ;;  %v5099_v15 = vadd.f32 %v5094_v7, %v5064_v5 }
0x233b   :  { %v6105_v44 = vpop.f32.mrf.mxu1 }
0x233c   :  { %v5095_v10 = vmul.f32 %v5090_v57, %v5067_v59  ;;  %v5086_v1 = vmul.f32 0.044715, %v5072_v9  ;;  %v5104_v56 = vmul.f32 0.7978846, %v5099_v15  ;;  %v5081_v11 = vmul.f32 0.5, %v5072_v9 }
0x233d   :  { %v5074_v54 = vpop.f32.mrf.mxu1 }
0x233e   :  { %v5091_v45 = vmul.f32 %v5086_v1, %v5072_v9  ;;  %v5100_v47 = vadd.f32 %v5095_v10, %v5067_v59  ;;  %6617 = vtanh.f32 %v5104_v56 }
0x233f   :  { %v6106_v53 = vpop.f32.mrf.mxu1 }
0x2340   :  { %v5096_v21 = vmul.f32 %v5091_v45, %v5072_v9  ;;  %v5105_v4 = vmul.f32 0.7978846, %v5100_v47 }
0x2342   :  { %v5101_v24 = vadd.f32 %v5096_v21, %v5072_v9  ;;  %6619 = vtanh.f32 %v5105_v4 }
0x2343   :  { %v6614_v39 = vpop.eup %6613 }
0x2344   :  { %v5106_v2 = vmul.f32 0.7978846, %v5101_v24  ;;  %v5112_v38 = vadd.f32 1.0, %v6614_v39 }
0x2346   :  { %6621 = vtanh.f32 %v5106_v2  ;;  %v5117_v61 = vmul.f32 %v5112_v38, %v5077_v25 }
0x2347   :  { %v6616_v43 = vpop.eup %6615 }
0x2348   :  { %v5113_v19 = vadd.f32 1.0, %v6616_v43 }
0x234a   :  { %v5118_v13 = vmul.f32 %v5113_v19, %v5078_v60 }
0x234b   :  { %v6618_v12 = vpop.eup %6617 }
0x234c   :  { %v5122_v20 = vpack.c.bf16 %v5118_v13, %v5117_v61  ;;  %v5114_v3 = vadd.f32 1.0, %v6618_v12 }
0x234e   :  { %6124 = vmatmul.mubr.bf16.vlgmr.msra.gmra.mxu0 %v5122_v20  ;;  %v5119_v14 = vmul.f32 %v5114_v3, %v5079_v27 }
0x234f   :  { %v6620_v31 = vpop.eup %6619  ;;  %6127 = vmatprep.mubr.msk.bf16.mxu0 %vm6679_vm3, %v8871_v48 }
0x2350   :  { %v5115_v42 = vadd.f32 1.0, %v6620_v31 }
0x2352   :  { %v5120_v63 = vmul.f32 %v5115_v42, %v5080_v49 }
0x2353   :  { %v6622_v46 = vpop.eup %6621 }
0x2354   :  { %v5123_v58 = vpack.c.bf16 %v5120_v63, %v5119_v14  ;;  %v5116_v6 = vadd.f32 1.0, %v6622_v46 }
0x2356   :  { %6128 = vmatmul.mubr.bf16.gmra.mxu0 %v5123_v58  ;;  %v5121_v8 = vmul.f32 %v5116_v6, %v5081_v11 }
0x2357   :  { %6131 = vmatprep.mubr.msk.bf16.mxu0 %vm6679_vm3, %v8871_v48 }
0x2358   :  { %v5124_v34 = vpack.c.bf16 %v5121_v8, %v5121_v8 }
0x235e   :  { %6132 = vmatmul.mubr.bf16.gmra.mxu0 %v5124_v34 }
0x240e   :  { %v5229_v35 = vpop.f32.mrf.mxu0 }
0x240f   :  { %v5230_v0 = vadd.f32 %v5499_v18, %v5229_v35 }
0x2410   :  { %v6125_v51 = vpop.f32.mrf.mxu0 }
0x2411   :  { %v5251_v41 = vadd.f32 %v5230_v0, %v8700_v29 }
0x2412   :  { %v5232_v62 = vpop.f32.mrf.mxu0 }
0x2413   :  { %5256 = vst.msk [vmem:[#allocation2] sm:$0xff] %vm136_vm1, %v5251_v41  ;;  %v5233_v5 = vadd.f32 %v5499_v18, %v5232_v62 }
0x2414   :  { %v6126_v23 = vpop.f32.mrf.mxu0 }
0x2415   :  { %v5252_v32 = vadd.f32 %v5233_v5, %v8705_v36 }
0x2416   :  { %v5237_v48 = vpop.f32.mrf.mxu0 }
0x2417   :  { %5257 = vst.msk [vmem:[#allocation2 + $0x8] sm:$0xff] %vm136_vm1, %v5252_v32  ;;  %v5238_v17 = vadd.f32 %v5499_v18, %v5237_v48 }
0x2418   :  { %v6129_v30 = vpop.f32.mrf.mxu0 }
0x2419   :  { %v5253_v33 = vadd.f32 %v5238_v17, %v8710_v52 }
0x241a   :  { %v5240_v37 = vpop.f32.mrf.mxu0 }
0x241b   :  { %5258 = vst.msk [vmem:[#allocation2 + $0x10] sm:$0xff] %vm136_vm1, %v5253_v33  ;;  %v5241_v29 = vadd.f32 %v5499_v18, %v5240_v37 }
0x241c   :  { %v6130_v40 = vpop.f32.mrf.mxu0 }
0x241d   :  { %v5254_v59 = vadd.f32 %v5241_v29, %v8715_v55 }
0x241e   :  { %v5245_v28 = vpop.f32.mrf.mxu0 }
0x241f   :  { %5259 = vst.msk [vmem:[#allocation2 + $0x18] sm:$0xff] %vm136_vm1, %v5254_v59  ;;  %v5246_v36 = vadd.f32 %v5499_v18, %v5245_v28 }
0x2420   :  { %v6133_v50 = vpop.f32.mrf.mxu0 }
0x2421   :  { %6635 = shalt.err (!%p6632_p4)
}
0x2422   :  { %s6696_s24 = smov 128   ;;  %v5255_v52 = vadd.f32 %v5246_v36, %v8720_v22  ;;  %v5248_v55 = vpop.f32.mrf.mxu0  ;;  %s6644_s29 = scalar_lea.vmem %s5280_s23, 32 }
0x2423   :  { %5272 = dma.vmem_to_hbm [thread:$0]  %s5267_s21, 512, %s8823_s11, [#allocation3], %s6696_s24, %s6696_s24, %s6691_s25  }
0x2424   :  { %5260 = vst.msk [vmem:[#allocation4] sm:$0x3] %vm225_vm2, %v5255_v52  ;;  %v6134_v7 = vpop.f32.mrf.mxu0  ;;  %p6645_p5 = scmp.ne.s32.totalorder %s5280_s23, %s6644_s29  ;;  %p6649_p6 = scmp.lt.s32.totalorder %s5280_s23, %s5280_s23 }
0x2425   :  { %p6650_p7 = scmp.lt.s32.totalorder %s6644_s29, %s6644_s29 }
0x2427   :  { %p6651_p8 = por %p6650_p7, %p6649_p6 }
0x2429   :  { %p6652_p9 = pnand %p6651_p8, %p6645_p5 }
0x242b   :  { %6655 = shalt.err (!%p6652_p9)
}
0x242c   :  { %5282 = dma.vmem_to_hbm [thread:$0]  %s5280_s23, 32, %s8824_s12, [#allocation5]  }
0x242d   :  { %6664 = dma.done.wait [#allocation3], 512  }
0x242e   :  { %6665 = vsyncadd [#allocation3], 4294966784 }
0x242f   :  { %6666 = dma.done.wait [#allocation5], 32  }
0x2430   :  { %6667 = vsyncadd [#allocation5], 4294967264 }
0x2431   :  { %5289 = vsyncpa [#allocation3], 1 }
0x2432   :  { %5290 = vsyncpa [#allocation5], 1 }

</bundles_post_ra>
